<compile_context>
chip_gen: v7x
topology: tpu7x:2x2x1
jax: 0.10.0
libtpu: 0.0.40
codegen_flags: <defaults>
</compile_context>

<pallas_src>
import jax
import jax.numpy as jnp
from jax.experimental import pallas as pl
from jax.experimental.pallas import tpu as pltpu


# ------------------------- Kernel 1: conv-transpose GEMM ------------------------------
def _gemm_kernel(w_ref, p_ref, o_ref):
    o_ref[...] = jnp.dot(w_ref[...], p_ref[...], preferred_element_type=jnp.float32)


def conv_transpose3d_channel_major(x, w, stride, padding, output_padding, tn=2048):
    """PyTorch-style ConvTranspose3d (bias=False).

    x: (B, Cin, D, H, W); w: (Cin, Cout, k, k, k).
    Returns (y, dims) with y shaped (Cout, B*Do, Ho*Wo) -- a free reshape of the
    lane-dense (Cout, M) GEMM output, consumed directly by the fused LN/pool kernel.
    """
    B, Cin, D, H, W = x.shape
    _, Cout, k, _, _ = w.shape
    s, p, op = stride, padding, output_padding
    Dd, Hd, Wd = (D - 1) * s + 1, (H - 1) * s + 1, (W - 1) * s + 1
    lo, hi = k - 1 - p, k - 1 - p + op
    Do, Ho, Wo = Dd + lo + hi - k + 1, Hd + lo + hi - k + 1, Wd + lo + hi - k + 1
    M = B * Do * Ho * Wo
    K = Cin * k ** 3

    # Channel-major copy of the (tiny) input, then stride-dilate + pad.
    xt = jnp.transpose(x, (1, 0, 2, 3, 4)).astype(jnp.float32)        # (Cin, B, D, H, W)
    xd = jnp.zeros((Cin, B, Dd, Hd, Wd), jnp.float32).at[:, :, ::s, ::s, ::s].set(xt)
    xp = jnp.pad(xd, ((0, 0), (0, 0), (lo, hi), (lo, hi), (lo, hi)))

    # K-major im2col: Pt[(ci, kd, kh, kw), (b, od, oh, ow)]  (no big transpose needed).
    slabs = []
    for kd in range(k):
        for kh in range(k):
            for kw in range(k):
                slabs.append(xp[:, :, kd:kd + Do, kh:kh + Ho, kw:kw + Wo])
    Pt = jnp.stack(slabs, axis=1).reshape(K, M)

    # Flipped weights arranged (Cout, K) with the same (ci, kd, kh, kw) K ordering.
    wf = w[:, :, ::-1, ::-1, ::-1].astype(jnp.float32)                # (Cin, Cout, k,k,k)
    Wt = jnp.transpose(wf, (1, 0, 2, 3, 4)).reshape(Cout, K)

    # Pad the contraction dim to a multiple of 128 -> aligned, unmasked vector loads.
    Kp = ((K + 127) // 128) * 128
    if Kp != K:
        Pt = jnp.pad(Pt, ((0, Kp - K), (0, 0)))
        Wt = jnp.pad(Wt, ((0, 0), (0, Kp - K)))

    # Pad M to the column tile (no-op at the shapes used here).
    tn = min(tn, M)
    Mp = ((M + tn - 1) // tn) * tn
    if Mp != M:
        Pt = jnp.pad(Pt, ((0, 0), (0, Mp - M)))

    y = pl.pallas_call(
        _gemm_kernel,
        out_shape=jax.ShapeDtypeStruct((Cout, Mp), jnp.float32),
        grid=(Mp // tn,),
        in_specs=[pl.BlockSpec((Cout, Kp), lambda j: (0, 0)),
                  pl.BlockSpec((Kp, tn), lambda j: (0, j))],
        out_specs=pl.BlockSpec((Cout, tn), lambda j: (0, j)),
        compiler_params=pltpu.CompilerParams(dimension_semantics=("parallel",)),
    )(Wt, Pt)
    if Mp != M:
        y = y[:, :M]
    return y.reshape(Cout, B * Do, Ho * Wo), (B, Cout, Do, Ho, Wo)


# ---------------- Kernel 2: fused aliased layernorm + 2x2x2 avgpool + GELU ------------
def _ln_pool_gelu_kernel(y_ref, bias_ref, g_ref, phw_ref, pd_ref, o_ref):
    C, D, HW = y_ref.shape
    v = y_ref[...].reshape(C * D, HW) + bias_ref[...]             # bias[j % C] per lane
    g = g_ref[...]
    m = jnp.dot(v, g, preferred_element_type=jnp.float32)         # per-lane chunk mean
    d = v - m
    var = jnp.dot(d * d, g, preferred_element_type=jnp.float32)   # centered (stable) var
    xn = d * jax.lax.rsqrt(var + 1e-5)                            # aliased "layernorm"
    ph = jnp.dot(xn, phw_ref[...], preferred_element_type=jnp.float32)  # H,W window sums
    s = jnp.dot(pd_ref[...], ph, preferred_element_type=jnp.float32)    # D pairs * (1/8)
    c0 = 0.7978845608028654
    o_ref[...] = 0.5 * s * (1.0 + jnp.tanh(c0 * (s + 0.044715 * s * s * s)))


def fused_layernorm_avgpool_gelu(y_cm, bias, dims):
    """y_cm: (Cout, B*Do, Ho*Wo) channel-major conv output -> (B, C, D/2, H/2, W/2)."""
    B, C, D, H, W = dims
    HW = H * W
    assert HW % C == 0, "length-C chunks must not cross (c, d) rows"
    assert D % 2 == 0 and H % 2 == 0 and W % 2 == 0
    D2, H2, W2 = D // 2, H // 2, W // 2
    f32 = jnp.float32

    # Constant selector matrices, hoisted out of the kernel (loaded to VMEM once).
    j = jnp.arange(HW)
    G = (j[:, None] // C == j[None, :] // C).astype(f32) / C           # chunk averaging
    h, w = j // W, j % W
    q = jnp.arange(H2 * W2)
    h2, w2 = q // W2, q % W2
    Phw = ((h[:, None] // 2 == h2[None, :]) &
           (w[:, None] // 2 == w2[None, :])).astype(f32)               # (HW, H2*W2)
    r = jnp.arange(C * D2)
    t = jnp.arange(C * D)
    Pd = ((r[:, None] // D2 == t[None, :] // D) &
          (r[:, None] % D2 == (t[None, :] % D) // 2)).astype(f32) * 0.125  # (C*D2, C*D)
    bias_hw = jnp.tile(bias.astype(f32), HW // C).reshape(1, HW)

    out = pl.pallas_call(
        _ln_pool_gelu_kernel,
        out_shape=jax.ShapeDtypeStruct((B * C * D2, H2 * W2), f32),
        grid=(B,),
        in_specs=[pl.BlockSpec((C, D, HW), lambda b: (0, b, 0)),
                  pl.BlockSpec((1, HW), lambda b: (0, 0)),
                  pl.BlockSpec((HW, HW), lambda b: (0, 0)),
                  pl.BlockSpec((HW, H2 * W2), lambda b: (0, 0)),
                  pl.BlockSpec((C * D2, C * D), lambda b: (0, 0))],
        out_specs=pl.BlockSpec((C * D2, H2 * W2), lambda b: (b, 0)),
        compiler_params=pltpu.CompilerParams(dimension_semantics=("parallel",)),
    )(y_cm, bias_hw, G, Phw, Pd)
    return out.reshape(B, C, D2, H2, W2)


# --------------------------------------------------------------------------------------
# Model wrapper (deterministic in-script parameter init)
# --------------------------------------------------------------------------------------
class PallasModel:
    def __init__(self, in_channels, out_channels, kernel_size, stride, padding,
                 output_padding, sum_weight, key):
        self.stride = stride
        self.padding = padding
        self.output_padding = output_padding
        self.weight = jax.random.normal(
            key, (in_channels, out_channels, kernel_size, kernel_size, kernel_size),
            jnp.float32) * 0.05
        self.bias = jnp.full((out_channels,), sum_weight, jnp.float32)

    def __call__(self, x):
        y, dims = conv_transpose3d_channel_major(
            x, self.weight, self.stride, self.padding, self.output_padding)
        return fused_layernorm_avgpool_gelu(y, self.bias, dims)


# --------------------------------------------------------------------------------------
# Pure-JAX reference (independent path: lax conv + reshape LN + reshape pooling)
# --------------------------------------------------------------------------------------
def reference_forward(x, w, bias, stride, padding, output_padding):
    k = w.shape[2]
    lo, hi = k - 1 - padding, k - 1 - padding + output_padding
    rhs = jnp.transpose(w[:, :, ::-1, ::-1, ::-1], (1, 0, 2, 3, 4))   # (Cout, Cin, k,k,k)
    y = jax.lax.conv_general_dilated(
        x, rhs, window_strides=(1, 1, 1),
        padding=((lo, hi), (lo, hi), (lo, hi)),
        lhs_dilation=(stride, stride, stride),
        dimension_numbers=('NCDHW', 'OIDHW', 'NCDHW'),
        precision=jax.lax.Precision.HIGHEST)
    B, C, D, H, W = y.shape
    v = y.reshape(B, (C * D * H * W) // C, C) + bias[None, None, :]
    m = v.mean(axis=-1, keepdims=True)
    var = ((v - m) ** 2).mean(axis=-1, keepdims=True)
    ln = ((v - m) * jax.lax.rsqrt(var + 1e-5)).reshape(B, C, D, H, W)
    pooled = ln.reshape(B, C, D // 2, 2, H // 2, 2, W // 2, 2).mean(axis=(3, 5, 7))
    c0 = 0.7978845608028654
    return 0.5 * pooled * (1.0 + jnp.tanh(c0 * (pooled + 0.044715 * pooled ** 3)))


if __name__ == "__main__":
    key = jax.random.PRNGKey(0)
    kx, kw = jax.random.split(key)
    B, Cin, Cout = 2, 4, 8
    D = H = W = 8
    x = jax.random.normal(kx, (B, Cin, D, H, W), jnp.float32)
    model = PallasModel(Cin, Cout, kernel_size=3, stride=2, padding=1,
                        output_padding=1, sum_weight=1.0, key=kw)

    fwd = jax.jit(lambda a: model(a))
    out = jax.block_until_ready(fwd(x))

    # ConvT: (8-1)*2 - 2*1 + 3 + 1 = 16 per spatial dim; 2x2x2 pool halves it.
    assert out.shape == (B, Cout, 8, 8, 8), out.shape
    assert bool(jnp.all(jnp.isfinite(out)))

    ref = reference_forward(x, model.weight, model.bias, 2, 1, 1)
    err = float(jnp.max(jnp.abs(out - ref)))
    assert err < 3e-2, err
    print("KERNEL_OK")
</pallas_src>

<mosaic_0001>
module attributes {stable_mosaic.version = 11 : i64} {
  func.func @_gemm_kernel(%arg0: i32, %arg1: memref<8x128xf32, #tpu.memory_space<vmem>>, %arg2: memref<128x2048xf32, #tpu.memory_space<vmem>>, %arg3: memref<8x2048xf32, #tpu.memory_space<vmem>>) attributes {dimension_semantics = [#tpu.dimension_semantics<parallel>], iteration_bounds = array<i64: 4>, scalar_prefetch = 0 : i64, scratch_operands = 0 : i64, tpu.core_type = #tpu.core_type<tc>, window_params = [{pipeline_mode = #tpu.pipeline_mode<synchronous>, transform_indices = @transform_0, window_bounds = array<i64: 8, 128>}, {transform_indices = @transform_1, window_bounds = array<i64: 128, 2048>}, {transform_indices = @transform_2, window_bounds = array<i64: 8, 2048>}]} {
    %c0 = arith.constant 0 : index
    %c0_0 = arith.constant 0 : index
    %0 = vector.load %arg1[%c0, %c0_0] : memref<8x128xf32, #tpu.memory_space<vmem>>, vector<8x128xf32>
    %c0_1 = arith.constant 0 : index
    %c0_2 = arith.constant 0 : index
    %1 = vector.load %arg2[%c0_1, %c0_2] : memref<128x2048xf32, #tpu.memory_space<vmem>>, vector<128x2048xf32>
    %cst = arith.constant dense<0.000000e+00> : vector<8x2048xf32>
    %2 = tpu.matmul %0, %1, %cst {dimension_numbers = #tpu.dot_dimension_numbers<[1], [0], [0], [1], [0, 0, 1, 1], [], []>} : vector<8x128xf32>, vector<128x2048xf32>, vector<8x2048xf32> -> vector<8x2048xf32>
    %c0_3 = arith.constant 0 : index
    %c0_4 = arith.constant 0 : index
    %3 = vector.load %arg3[%c0_3, %c0_4] : memref<8x2048xf32, #tpu.memory_space<vmem>>, vector<8x2048xf32>
    tpu.vector_store %arg3[%c0_3, %c0_4], %2 {strides = array<i32>} : memref<8x2048xf32, #tpu.memory_space<vmem>>, vector<8x2048xf32>,
    return
  }
  func.func @transform_0(%arg0: i32) -> (i32, i32) {
    %c0_i32 = arith.constant 0 : i32
    %c0_i32_0 = arith.constant 0 : i32
    %c0_i32_1 = arith.constant 0 : i32
    return %c0_i32, %c0_i32_0 : i32, i32
  }
  func.func @transform_1(%arg0: i32) -> (i32, i32) {
    %c0_i32 = arith.constant 0 : i32
    %c0_i32_0 = arith.constant 0 : i32
    return %c0_i32, %arg0 : i32, i32
  }
  func.func @transform_2(%arg0: i32) -> (i32, i32) {
    %c0_i32 = arith.constant 0 : i32
    %c0_i32_0 = arith.constant 0 : i32
    return %c0_i32, %arg0 : i32, i32
  }
}

module attributes {stable_mosaic.version = 11 : i64} {
  func.func @_ln_pool_gelu_kernel(%arg0: i32, %arg1: memref<8x16x256xf32, #tpu.memory_space<vmem>>, %arg2: memref<1x256xf32, #tpu.memory_space<vmem>>, %arg3: memref<256x256xf32, #tpu.memory_space<vmem>>, %arg4: memref<256x64xf32, #tpu.memory_space<vmem>>, %arg5: memref<64x128xf32, #tpu.memory_space<vmem>>, %arg6: memref<64x64xf32, #tpu.memory_space<vmem>>) attributes {dimension_semantics = [#tpu.dimension_semantics<parallel>], iteration_bounds = array<i64: 2>, scalar_prefetch = 0 : i64, scratch_operands = 0 : i64, tpu.core_type = #tpu.core_type<tc>, window_params = [{transform_indices = @transform_0, window_bounds = array<i64: 8, 16, 256>}, {pipeline_mode = #tpu.pipeline_mode<synchronous>, transform_indices = @transform_1, window_bounds = array<i64: 1, 256>}, {pipeline_mode = #tpu.pipeline_mode<synchronous>, transform_indices = @transform_2, window_bounds = array<i64: 256, 256>}, {pipeline_mode = #tpu.pipeline_mode<synchronous>, transform_indices = @transform_3, window_bounds = array<i64: 256, 64>}, {pipeline_mode = #tpu.pipeline_mode<synchronous>, transform_indices = @transform_4, window_bounds = array<i64: 64, 128>}, {transform_indices = @transform_5, window_bounds = array<i64: 64, 64>}]} {
    %c0 = arith.constant 0 : index
    %c0_0 = arith.constant 0 : index
    %c0_1 = arith.constant 0 : index
    %0 = vector.load %arg1[%c0, %c0_0, %c0_1] : memref<8x16x256xf32, #tpu.memory_space<vmem>>, vector<8x16x256xf32>
    %1 = vector.shape_cast %0 : vector<8x16x256xf32> to vector<128x256xf32>
    %c0_2 = arith.constant 0 : index
    %c0_3 = arith.constant 0 : index
    %2 = vector.load %arg2[%c0_2, %c0_3] : memref<1x256xf32, #tpu.memory_space<vmem>>, vector<1x256xf32>
    %3 = vector.broadcast %2 : vector<1x256xf32> to vector<128x256xf32>
    %4 = arith.addf %1, %3 : vector<128x256xf32>
    %c0_4 = arith.constant 0 : index
    %c0_5 = arith.constant 0 : index
    %5 = vector.load %arg3[%c0_4, %c0_5] : memref<256x256xf32, #tpu.memory_space<vmem>>, vector<256x256xf32>
    %cst = arith.constant dense<0.000000e+00> : vector<128x256xf32>
    %6 = tpu.matmul %4, %5, %cst {dimension_numbers = #tpu.dot_dimension_numbers<[1], [0], [0], [1], [0, 0, 1, 1], [], []>} : vector<128x256xf32>, vector<256x256xf32>, vector<128x256xf32> -> vector<128x256xf32>
    %7 = arith.subf %4, %6 : vector<128x256xf32>
    %8 = arith.mulf %7, %7 : vector<128x256xf32>
    %cst_6 = arith.constant dense<0.000000e+00> : vector<128x256xf32>
    %9 = tpu.matmul %8, %5, %cst_6 {dimension_numbers = #tpu.dot_dimension_numbers<[1], [0], [0], [1], [0, 0, 1, 1], [], []>} : vector<128x256xf32>, vector<256x256xf32>, vector<128x256xf32> -> vector<128x256xf32>
    %cst_7 = arith.constant 9.99999974E-6 : f32
    %10 = vector.broadcast %cst_7 : f32 to vector<128x256xf32>
    %11 = arith.addf %9, %10 : vector<128x256xf32>
    %12 = math.rsqrt %11 : vector<128x256xf32>
    %13 = arith.mulf %7, %12 : vector<128x256xf32>
    %c0_8 = arith.constant 0 : index
    %c0_9 = arith.constant 0 : index
    %14 = vector.load %arg4[%c0_8, %c0_9] : memref<256x64xf32, #tpu.memory_space<vmem>>, vector<256x64xf32>
    %cst_10 = arith.constant dense<0.000000e+00> : vector<128x64xf32>
    %15 = tpu.matmul %13, %14, %cst_10 {dimension_numbers = #tpu.dot_dimension_numbers<[1], [0], [0], [1], [0, 0, 1, 1], [], []>} : vector<128x256xf32>, vector<256x64xf32>, vector<128x64xf32> -> vector<128x64xf32>
    %c0_11 = arith.constant 0 : index
    %c0_12 = arith.constant 0 : index
    %16 = vector.load %arg5[%c0_11, %c0_12] : memref<64x128xf32, #tpu.memory_space<vmem>>, vector<64x128xf32>
    %cst_13 = arith.constant dense<0.000000e+00> : vector<64x64xf32>
    %17 = tpu.matmul %16, %15, %cst_13 {dimension_numbers = #tpu.dot_dimension_numbers<[1], [0], [0], [1], [0, 0, 1, 1], [], []>} : vector<64x128xf32>, vector<128x64xf32>, vector<64x64xf32> -> vector<64x64xf32>
    %cst_14 = arith.constant 5.000000e-01 : f32
    %18 = vector.broadcast %cst_14 : f32 to vector<64x64xf32>
    %19 = arith.mulf %18, %17 : vector<64x64xf32>
    %cst_15 = arith.constant 4.471500e-02 : f32
    %20 = vector.broadcast %cst_15 : f32 to vector<64x64xf32>
    %21 = arith.mulf %20, %17 : vector<64x64xf32>
    %22 = arith.mulf %21, %17 : vector<64x64xf32>
    %23 = arith.mulf %22, %17 : vector<64x64xf32>
    %24 = arith.addf %17, %23 : vector<64x64xf32>
    %cst_16 = arith.constant 0.797884583 : f32
    %25 = vector.broadcast %cst_16 : f32 to vector<64x64xf32>
    %26 = arith.mulf %25, %24 : vector<64x64xf32>
    %27 = math.tanh %26 : vector<64x64xf32>
    %cst_17 = arith.constant 1.000000e+00 : f32
    %28 = vector.broadcast %cst_17 : f32 to vector<64x64xf32>
    %29 = arith.addf %28, %27 : vector<64x64xf32>
    %30 = arith.mulf %19, %29 : vector<64x64xf32>
    %c0_18 = arith.constant 0 : index
    %c0_19 = arith.constant 0 : index
    %31 = vector.load %arg6[%c0_18, %c0_19] : memref<64x64xf32, #tpu.memory_space<vmem>>, vector<64x64xf32>
    tpu.vector_store %arg6[%c0_18, %c0_19], %30 {strides = array<i32>} : memref<64x64xf32, #tpu.memory_space<vmem>>, vector<64x64xf32>,
    return
  }
  func.func @transform_0(%arg0: i32) -> (i32, i32, i32) {
    %c0_i32 = arith.constant 0 : i32
    %c0_i32_0 = arith.constant 0 : i32
    %c0_i32_1 = arith.constant 0 : i32
    return %c0_i32, %arg0, %c0_i32_0 : i32, i32, i32
  }
  func.func @transform_1(%arg0: i32) -> (i32, i32) {
    %c0_i32 = arith.constant 0 : i32
    %c0_i32_0 = arith.constant 0 : i32
    %c0_i32_1 = arith.constant 0 : i32
    return %c0_i32, %c0_i32_0 : i32, i32
  }
  func.func @transform_2(%arg0: i32) -> (i32, i32) {
    %c0_i32 = arith.constant 0 : i32
    %c0_i32_0 = arith.constant 0 : i32
    %c0_i32_1 = arith.constant 0 : i32
    return %c0_i32, %c0_i32_0 : i32, i32
  }
  func.func @transform_3(%arg0: i32) -> (i32, i32) {
    %c0_i32 = arith.constant 0 : i32
    %c0_i32_0 = arith.constant 0 : i32
    %c0_i32_1 = arith.constant 0 : i32
    return %c0_i32, %c0_i32_0 : i32, i32
  }
  func.func @transform_4(%arg0: i32) -> (i32, i32) {
    %c0_i32 = arith.constant 0 : i32
    %c0_i32_0 = arith.constant 0 : i32
    %c0_i32_1 = arith.constant 0 : i32
    return %c0_i32, %c0_i32_0 : i32, i32
  }
  func.func @transform_5(%arg0: i32) -> (i32, i32) {
    %c0_i32 = arith.constant 0 : i32
    %c0_i32_0 = arith.constant 0 : i32
    return %arg0, %c0_i32 : i32, i32
  }
}

</mosaic_0001>

<bundles_post_ra>
// kernel: _lambda_.2
= control target key start
LH: loop header
LB: loop body
LE: loop exit
PB: predicated region body
PF: predicated region fallthrough
CT: control target
= control target key end

     0   :  { %s1914_s9 = smov 0   ;;  %s1916_s10 = smov 0   ;;  %s2779_s0 = inlined_call_operand.vmem [shape: f32[8,128], index: 0, kind: input, shape index: {}]   ;;  %s2780_s1 = inlined_call_operand.vmem [shape: f32[128,8192], index: 1, kind: input, shape index: {}]   ;;  %s2781_s2 = inlined_call_operand.vmem [shape: f32[8,8192], index: 2, kind: output, shape index: {}]  }
   0x1   :  { %s1918_s11 = smov 0  }
   0x2 LB: > { %s1579_s12 = sadd.s32 4294967295, %s1896_s11   ;;  %s1931_s13 = sadd.s32 1, %s1896_s11   ;;  %s1896_s11 = sphi %s1918_s11, %s2784_s11   ;;  %s1892_s10 = sphi %s1916_s10, %s2783_s10   ;;  %s1888_s9 = sphi %s1914_s9, %s2782_s9  }
   0x3   : > { %s37_s14 = ssub.s32 %s1896_s11, %s1931_s13  ;;  %s40_s15 = sadd.s32 1, %s1892_s10 }
   0x4   : > { %p38_p0 = scmp.eq.s32.totalorder %s37_s14, 0  ;;  %p47_p1 = scmp.ne.s32.totalorder %s1892_s10, %s1888_s9 }
   0x5   : > { %p48_p2 = scmp.eq.s32.totalorder %s1896_s11, 0  ;;  %p1582_p4 = scmp.ge.s32.totalorder %s1896_s11, 4 }
   0x6   : > { %s1940_s16 = scalar_select %p38_p0, %s1892_s10, %s40_s15  }
   0x7   : > { %p49_p3 = por %p48_p2, %p47_p1  ;;  %102 = sbr.rel (%p1582_p4) target bundleno = 146 (0x92), region = 20 }
   0xe   : > { %105 = sbr.rel (!%p49_p3) target bundleno = 146 (0x92), region = 24  ;;  %s107_s17 = sand.u32 (%p49_p3), 1, %s1892_s10  }
   0xf   : > { %s1592_s18 = sshll.u32 (%p49_p3), %s1896_s11, 7  ;;  %s1583_s19 = sshll.u32 (%p49_p3), %s107_s17, 11 }
  0x10   : > { %s1948_s22 = scalar_lea.vmem (%p49_p3), %s2780_s1, %s1592_s18  ;;  %s1953_s23 = scalar_lea.vmem (%p49_p3), [#allocation2], %s1583_s19 }
  0x11   : > { %v125_v0 = vld [vmem:[%s1948_s22] sm:$0xff] (%p49_p3)  ;;  %v127_v1 = vld [vmem:[%s1948_s22 + $0x8] sm:$0xff] (%p49_p3)  ;;  %v129_v2 = vld [vmem:[%s1948_s22 + $0x10] sm:$0xff] (%p49_p3) }
  0x12   : > { %126 = vst [vmem:[%s1953_s23] sm:$0xff] (%p49_p3), %v125_v0  ;;  %128 = vst [vmem:[%s1953_s23 + $0x8] sm:$0xff] (%p49_p3), %v127_v1  ;;  %v131_v3 = vld [vmem:[%s1948_s22 + $0x18] sm:$0xff] (%p49_p3)  ;;  %v133_v4 = vld [vmem:[%s1948_s22 + $0x20] sm:$0xff] (%p49_p3) }
  0x13   : > { %130 = vst [vmem:[%s1953_s23 + $0x10] sm:$0xff] (%p49_p3), %v129_v2  ;;  %v135_v5 = vld [vmem:[%s1948_s22 + $0x28] sm:$0xff] (%p49_p3)  ;;  %132 = vst [vmem:[%s1953_s23 + $0x18] sm:$0xff] (%p49_p3), %v131_v3  ;;  %v137_v6 = vld [vmem:[%s1948_s22 + $0x30] sm:$0xff] (%p49_p3) }
  0x14   : > { %134 = vst [vmem:[%s1953_s23 + $0x20] sm:$0xff] (%p49_p3), %v133_v4  ;;  %136 = vst [vmem:[%s1953_s23 + $0x28] sm:$0xff] (%p49_p3), %v135_v5  ;;  %v139_v7 = vld [vmem:[%s1948_s22 + $0x38] sm:$0xff] (%p49_p3)  ;;  %v141_v8 = vld [vmem:[%s1948_s22 + $0x40] sm:$0xff] (%p49_p3) }
  0x15   : > { %138 = vst [vmem:[%s1953_s23 + $0x30] sm:$0xff] %v137_v6  ;;  %140 = vst [vmem:[%s1953_s23 + $0x38] sm:$0xff] %v139_v7  ;;  %v143_v9 = vld [vmem:[%s1948_s22 + $0x48] sm:$0xff]  ;;  %v145_v10 = vld [vmem:[%s1948_s22 + $0x50] sm:$0xff] }
  0x16   : > { %142 = vst [vmem:[%s1953_s23 + $0x40] sm:$0xff] %v141_v8  ;;  %v147_v11 = vld [vmem:[%s1948_s22 + $0x58] sm:$0xff]  ;;  %144 = vst [vmem:[%s1953_s23 + $0x48] sm:$0xff] %v143_v9  ;;  %v149_v12 = vld [vmem:[%s1948_s22 + $0x60] sm:$0xff] }
  0x17   : > { %146 = vst [vmem:[%s1953_s23 + $0x50] sm:$0xff] %v145_v10  ;;  %148 = vst [vmem:[%s1953_s23 + $0x58] sm:$0xff] %v147_v11  ;;  %v151_v13 = vld [vmem:[%s1948_s22 + $0x68] sm:$0xff]  ;;  %v153_v14 = vld [vmem:[%s1948_s22 + $0x70] sm:$0xff] }
  0x18   : > { %150 = vst [vmem:[%s1953_s23 + $0x60] sm:$0xff] %v149_v12  ;;  %152 = vst [vmem:[%s1953_s23 + $0x68] sm:$0xff] %v151_v13  ;;  %v155_v15 = vld [vmem:[%s1948_s22 + $0x78] sm:$0xff]  ;;  %v157_v16 = vld [vmem:[%s1948_s22 + $0x200] sm:$0xff] }
  0x19   : > { %154 = vst [vmem:[%s1953_s23 + $0x70] sm:$0xff] %v153_v14  ;;  %v159_v17 = vld [vmem:[%s1948_s22 + $0x208] sm:$0xff]  ;;  %156 = vst [vmem:[%s1953_s23 + $0x78] sm:$0xff] %v155_v15  ;;  %v161_v18 = vld [vmem:[%s1948_s22 + $0x210] sm:$0xff] }
  0x1a   : > { %158 = vst [vmem:[%s1953_s23 + $0x80] sm:$0xff] %v157_v16  ;;  %160 = vst [vmem:[%s1953_s23 + $0x88] sm:$0xff] %v159_v17  ;;  %v163_v19 = vld [vmem:[%s1948_s22 + $0x218] sm:$0xff]  ;;  %v165_v20 = vld [vmem:[%s1948_s22 + $0x220] sm:$0xff] }
  0x1b   : > { %162 = vst [vmem:[%s1953_s23 + $0x90] sm:$0xff] %v161_v18  ;;  %164 = vst [vmem:[%s1953_s23 + $0x98] sm:$0xff] %v163_v19  ;;  %v167_v21 = vld [vmem:[%s1948_s22 + $0x228] sm:$0xff]  ;;  %v169_v22 = vld [vmem:[%s1948_s22 + $0x230] sm:$0xff] }
  0x1c   : > { %166 = vst [vmem:[%s1953_s23 + $0xa0] sm:$0xff] %v165_v20  ;;  %v171_v23 = vld [vmem:[%s1948_s22 + $0x238] sm:$0xff]  ;;  %168 = vst [vmem:[%s1953_s23 + $0xa8] sm:$0xff] %v167_v21  ;;  %v173_v24 = vld [vmem:[%s1948_s22 + $0x240] sm:$0xff] }
  0x1d   : > { %170 = vst [vmem:[%s1953_s23 + $0xb0] sm:$0xff] %v169_v22  ;;  %172 = vst [vmem:[%s1953_s23 + $0xb8] sm:$0xff] %v171_v23  ;;  %v175_v25 = vld [vmem:[%s1948_s22 + $0x248] sm:$0xff]  ;;  %v177_v26 = vld [vmem:[%s1948_s22 + $0x250] sm:$0xff] }
  0x1e   : > { %174 = vst [vmem:[%s1953_s23 + $0xc0] sm:$0xff] %v173_v24  ;;  %176 = vst [vmem:[%s1953_s23 + $0xc8] sm:$0xff] %v175_v25  ;;  %v179_v27 = vld [vmem:[%s1948_s22 + $0x258] sm:$0xff]  ;;  %v181_v28 = vld [vmem:[%s1948_s22 + $0x260] sm:$0xff] }
  0x1f   : > { %178 = vst [vmem:[%s1953_s23 + $0xd0] sm:$0xff] %v177_v26  ;;  %v183_v29 = vld [vmem:[%s1948_s22 + $0x268] sm:$0xff]  ;;  %180 = vst [vmem:[%s1953_s23 + $0xd8] sm:$0xff] %v179_v27  ;;  %v185_v30 = vld [vmem:[%s1948_s22 + $0x270] sm:$0xff] }
  0x20   : > { %182 = vst [vmem:[%s1953_s23 + $0xe0] sm:$0xff] %v181_v28  ;;  %184 = vst [vmem:[%s1953_s23 + $0xe8] sm:$0xff] %v183_v29  ;;  %v187_v31 = vld [vmem:[%s1948_s22 + $0x278] sm:$0xff]  ;;  %v189_v32 = vld [vmem:[%s1948_s22 + $0x400] sm:$0xff] }
  0x21   : > { %186 = vst [vmem:[%s1953_s23 + $0xf0] sm:$0xff] %v185_v30  ;;  %188 = vst [vmem:[%s1953_s23 + $0xf8] sm:$0xff] %v187_v31  ;;  %v191_v33 = vld [vmem:[%s1948_s22 + $0x408] sm:$0xff]  ;;  %v193_v34 = vld [vmem:[%s1948_s22 + $0x410] sm:$0xff] }
  0x22   : > { %190 = vst [vmem:[%s1953_s23 + $0x100] sm:$0xff] %v189_v32  ;;  %v195_v35 = vld [vmem:[%s1948_s22 + $0x418] sm:$0xff]  ;;  %192 = vst [vmem:[%s1953_s23 + $0x108] sm:$0xff] %v191_v33  ;;  %v197_v36 = vld [vmem:[%s1948_s22 + $0x420] sm:$0xff] }
  0x23   : > { %194 = vst [vmem:[%s1953_s23 + $0x110] sm:$0xff] %v193_v34  ;;  %196 = vst [vmem:[%s1953_s23 + $0x118] sm:$0xff] %v195_v35  ;;  %v199_v37 = vld [vmem:[%s1948_s22 + $0x428] sm:$0xff]  ;;  %v201_v38 = vld [vmem:[%s1948_s22 + $0x430] sm:$0xff] }
  0x24   : > { %198 = vst [vmem:[%s1953_s23 + $0x120] sm:$0xff] %v197_v36  ;;  %200 = vst [vmem:[%s1953_s23 + $0x128] sm:$0xff] %v199_v37  ;;  %v203_v39 = vld [vmem:[%s1948_s22 + $0x438] sm:$0xff]  ;;  %v205_v40 = vld [vmem:[%s1948_s22 + $0x440] sm:$0xff] }
  0x25   : > { %202 = vst [vmem:[%s1953_s23 + $0x130] sm:$0xff] %v201_v38  ;;  %v207_v41 = vld [vmem:[%s1948_s22 + $0x448] sm:$0xff]  ;;  %204 = vst [vmem:[%s1953_s23 + $0x138] sm:$0xff] %v203_v39  ;;  %v209_v42 = vld [vmem:[%s1948_s22 + $0x450] sm:$0xff] }
  0x26   : > { %206 = vst [vmem:[%s1953_s23 + $0x140] sm:$0xff] %v205_v40  ;;  %208 = vst [vmem:[%s1953_s23 + $0x148] sm:$0xff] %v207_v41  ;;  %v211_v43 = vld [vmem:[%s1948_s22 + $0x458] sm:$0xff]  ;;  %v213_v44 = vld [vmem:[%s1948_s22 + $0x460] sm:$0xff] }
  0x27   : > { %210 = vst [vmem:[%s1953_s23 + $0x150] sm:$0xff] %v209_v42  ;;  %212 = vst [vmem:[%s1953_s23 + $0x158] sm:$0xff] %v211_v43  ;;  %v215_v45 = vld [vmem:[%s1948_s22 + $0x468] sm:$0xff]  ;;  %v217_v46 = vld [vmem:[%s1948_s22 + $0x470] sm:$0xff] }
  0x28   : > { %214 = vst [vmem:[%s1953_s23 + $0x160] sm:$0xff] %v213_v44  ;;  %v219_v47 = vld [vmem:[%s1948_s22 + $0x478] sm:$0xff]  ;;  %216 = vst [vmem:[%s1953_s23 + $0x168] sm:$0xff] %v215_v45  ;;  %v221_v48 = vld [vmem:[%s1948_s22 + $0x600] sm:$0xff] }
  0x29   : > { %218 = vst [vmem:[%s1953_s23 + $0x170] sm:$0xff] %v217_v46  ;;  %220 = vst [vmem:[%s1953_s23 + $0x178] sm:$0xff] %v219_v47  ;;  %v223_v49 = vld [vmem:[%s1948_s22 + $0x608] sm:$0xff]  ;;  %v225_v50 = vld [vmem:[%s1948_s22 + $0x610] sm:$0xff] }
  0x2a   : > { %222 = vst [vmem:[%s1953_s23 + $0x180] sm:$0xff] %v221_v48  ;;  %224 = vst [vmem:[%s1953_s23 + $0x188] sm:$0xff] %v223_v49  ;;  %v227_v51 = vld [vmem:[%s1948_s22 + $0x618] sm:$0xff]  ;;  %v229_v52 = vld [vmem:[%s1948_s22 + $0x620] sm:$0xff] }
  0x2b   : > { %226 = vst [vmem:[%s1953_s23 + $0x190] sm:$0xff] %v225_v50  ;;  %v231_v53 = vld [vmem:[%s1948_s22 + $0x628] sm:$0xff]  ;;  %228 = vst [vmem:[%s1953_s23 + $0x198] sm:$0xff] %v227_v51  ;;  %v233_v54 = vld [vmem:[%s1948_s22 + $0x630] sm:$0xff] }
  0x2c   : > { %230 = vst [vmem:[%s1953_s23 + $0x1a0] sm:$0xff] %v229_v52  ;;  %232 = vst [vmem:[%s1953_s23 + $0x1a8] sm:$0xff] %v231_v53  ;;  %v235_v55 = vld [vmem:[%s1948_s22 + $0x638] sm:$0xff]  ;;  %v237_v56 = vld [vmem:[%s1948_s22 + $0x640] sm:$0xff] }
  0x2d   : > { %234 = vst [vmem:[%s1953_s23 + $0x1b0] sm:$0xff] %v233_v54  ;;  %236 = vst [vmem:[%s1953_s23 + $0x1b8] sm:$0xff] %v235_v55  ;;  %v239_v57 = vld [vmem:[%s1948_s22 + $0x648] sm:$0xff]  ;;  %v241_v58 = vld [vmem:[%s1948_s22 + $0x650] sm:$0xff] }
  0x2e   : > { %238 = vst [vmem:[%s1953_s23 + $0x1c0] sm:$0xff] %v237_v56  ;;  %v243_v59 = vld [vmem:[%s1948_s22 + $0x658] sm:$0xff]  ;;  %240 = vst [vmem:[%s1953_s23 + $0x1c8] sm:$0xff] %v239_v57  ;;  %v245_v60 = vld [vmem:[%s1948_s22 + $0x660] sm:$0xff] }
  0x2f   : > { %242 = vst [vmem:[%s1953_s23 + $0x1d0] sm:$0xff] %v241_v58  ;;  %244 = vst [vmem:[%s1953_s23 + $0x1d8] sm:$0xff] %v243_v59  ;;  %v247_v61 = vld [vmem:[%s1948_s22 + $0x668] sm:$0xff]  ;;  %v249_v62 = vld [vmem:[%s1948_s22 + $0x670] sm:$0xff] }
  0x30   : > { %246 = vst [vmem:[%s1953_s23 + $0x1e0] sm:$0xff] %v245_v60  ;;  %248 = vst [vmem:[%s1953_s23 + $0x1e8] sm:$0xff] %v247_v61  ;;  %v251_v63 = vld [vmem:[%s1948_s22 + $0x678] sm:$0xff]  ;;  %v253_v0 = vld [vmem:[%s1948_s22 + $0x800] sm:$0xff] }
  0x31   : > { %250 = vst [vmem:[%s1953_s23 + $0x1f0] sm:$0xff] %v249_v62  ;;  %v255_v1 = vld [vmem:[%s1948_s22 + $0x808] sm:$0xff]  ;;  %252 = vst [vmem:[%s1953_s23 + $0x1f8] sm:$0xff] %v251_v63  ;;  %v257_v2 = vld [vmem:[%s1948_s22 + $0x810] sm:$0xff] }
  0x32   : > { %254 = vst [vmem:[%s1953_s23 + $0x200] sm:$0xff] %v253_v0  ;;  %256 = vst [vmem:[%s1953_s23 + $0x208] sm:$0xff] %v255_v1  ;;  %v259_v3 = vld [vmem:[%s1948_s22 + $0x818] sm:$0xff]  ;;  %v261_v4 = vld [vmem:[%s1948_s22 + $0x820] sm:$0xff] }
  0x33   : > { %258 = vst [vmem:[%s1953_s23 + $0x210] sm:$0xff] %v257_v2  ;;  %260 = vst [vmem:[%s1953_s23 + $0x218] sm:$0xff] %v259_v3  ;;  %v263_v5 = vld [vmem:[%s1948_s22 + $0x828] sm:$0xff]  ;;  %v265_v6 = vld [vmem:[%s1948_s22 + $0x830] sm:$0xff] }
  0x34   : > { %262 = vst [vmem:[%s1953_s23 + $0x220] sm:$0xff] %v261_v4  ;;  %v267_v7 = vld [vmem:[%s1948_s22 + $0x838] sm:$0xff]  ;;  %264 = vst [vmem:[%s1953_s23 + $0x228] sm:$0xff] %v263_v5  ;;  %v269_v8 = vld [vmem:[%s1948_s22 + $0x840] sm:$0xff] }
  0x35   : > { %266 = vst [vmem:[%s1953_s23 + $0x230] sm:$0xff] %v265_v6  ;;  %268 = vst [vmem:[%s1953_s23 + $0x238] sm:$0xff] %v267_v7  ;;  %v271_v9 = vld [vmem:[%s1948_s22 + $0x848] sm:$0xff]  ;;  %v273_v10 = vld [vmem:[%s1948_s22 + $0x850] sm:$0xff] }
  0x36   : > { %270 = vst [vmem:[%s1953_s23 + $0x240] sm:$0xff] %v269_v8  ;;  %272 = vst [vmem:[%s1953_s23 + $0x248] sm:$0xff] %v271_v9  ;;  %v275_v11 = vld [vmem:[%s1948_s22 + $0x858] sm:$0xff]  ;;  %v277_v12 = vld [vmem:[%s1948_s22 + $0x860] sm:$0xff] }
  0x37   : > { %274 = vst [vmem:[%s1953_s23 + $0x250] sm:$0xff] %v273_v10  ;;  %v279_v13 = vld [vmem:[%s1948_s22 + $0x868] sm:$0xff]  ;;  %276 = vst [vmem:[%s1953_s23 + $0x258] sm:$0xff] %v275_v11  ;;  %v281_v14 = vld [vmem:[%s1948_s22 + $0x870] sm:$0xff] }
  0x38   : > { %278 = vst [vmem:[%s1953_s23 + $0x260] sm:$0xff] %v277_v12  ;;  %280 = vst [vmem:[%s1953_s23 + $0x268] sm:$0xff] %v279_v13  ;;  %v283_v15 = vld [vmem:[%s1948_s22 + $0x878] sm:$0xff]  ;;  %v285_v16 = vld [vmem:[%s1948_s22 + $0xa00] sm:$0xff] }
  0x39   : > { %282 = vst [vmem:[%s1953_s23 + $0x270] sm:$0xff] %v281_v14  ;;  %284 = vst [vmem:[%s1953_s23 + $0x278] sm:$0xff] %v283_v15  ;;  %v287_v17 = vld [vmem:[%s1948_s22 + $0xa08] sm:$0xff]  ;;  %v289_v18 = vld [vmem:[%s1948_s22 + $0xa10] sm:$0xff] }
  0x3a   : > { %286 = vst [vmem:[%s1953_s23 + $0x280] sm:$0xff] %v285_v16  ;;  %v291_v19 = vld [vmem:[%s1948_s22 + $0xa18] sm:$0xff]  ;;  %288 = vst [vmem:[%s1953_s23 + $0x288] sm:$0xff] %v287_v17  ;;  %v293_v20 = vld [vmem:[%s1948_s22 + $0xa20] sm:$0xff] }
  0x3b   : > { %290 = vst [vmem:[%s1953_s23 + $0x290] sm:$0xff] %v289_v18  ;;  %292 = vst [vmem:[%s1953_s23 + $0x298] sm:$0xff] %v291_v19  ;;  %v295_v21 = vld [vmem:[%s1948_s22 + $0xa28] sm:$0xff]  ;;  %v297_v22 = vld [vmem:[%s1948_s22 + $0xa30] sm:$0xff] }
  0x3c   : > { %294 = vst [vmem:[%s1953_s23 + $0x2a0] sm:$0xff] %v293_v20  ;;  %296 = vst [vmem:[%s1953_s23 + $0x2a8] sm:$0xff] %v295_v21  ;;  %v299_v23 = vld [vmem:[%s1948_s22 + $0xa38] sm:$0xff]  ;;  %v301_v24 = vld [vmem:[%s1948_s22 + $0xa40] sm:$0xff] }
  0x3d   : > { %298 = vst [vmem:[%s1953_s23 + $0x2b0] sm:$0xff] %v297_v22  ;;  %v303_v25 = vld [vmem:[%s1948_s22 + $0xa48] sm:$0xff]  ;;  %300 = vst [vmem:[%s1953_s23 + $0x2b8] sm:$0xff] %v299_v23  ;;  %v305_v26 = vld [vmem:[%s1948_s22 + $0xa50] sm:$0xff] }
  0x3e   : > { %302 = vst [vmem:[%s1953_s23 + $0x2c0] sm:$0xff] %v301_v24  ;;  %304 = vst [vmem:[%s1953_s23 + $0x2c8] sm:$0xff] %v303_v25  ;;  %v307_v27 = vld [vmem:[%s1948_s22 + $0xa58] sm:$0xff]  ;;  %v309_v28 = vld [vmem:[%s1948_s22 + $0xa60] sm:$0xff] }
  0x3f   : > { %306 = vst [vmem:[%s1953_s23 + $0x2d0] sm:$0xff] %v305_v26  ;;  %308 = vst [vmem:[%s1953_s23 + $0x2d8] sm:$0xff] %v307_v27  ;;  %v311_v29 = vld [vmem:[%s1948_s22 + $0xa68] sm:$0xff]  ;;  %v313_v30 = vld [vmem:[%s1948_s22 + $0xa70] sm:$0xff] }
  0x40   : > { %310 = vst [vmem:[%s1953_s23 + $0x2e0] sm:$0xff] %v309_v28  ;;  %v315_v31 = vld [vmem:[%s1948_s22 + $0xa78] sm:$0xff]  ;;  %312 = vst [vmem:[%s1953_s23 + $0x2e8] sm:$0xff] %v311_v29  ;;  %v317_v32 = vld [vmem:[%s1948_s22 + $0xc00] sm:$0xff] }
  0x41   : > { %314 = vst [vmem:[%s1953_s23 + $0x2f0] sm:$0xff] %v313_v30  ;;  %316 = vst [vmem:[%s1953_s23 + $0x2f8] sm:$0xff] %v315_v31  ;;  %v319_v33 = vld [vmem:[%s1948_s22 + $0xc08] sm:$0xff]  ;;  %v321_v34 = vld [vmem:[%s1948_s22 + $0xc10] sm:$0xff] }
  0x42   : > { %318 = vst [vmem:[%s1953_s23 + $0x300] sm:$0xff] %v317_v32  ;;  %320 = vst [vmem:[%s1953_s23 + $0x308] sm:$0xff] %v319_v33  ;;  %v323_v35 = vld [vmem:[%s1948_s22 + $0xc18] sm:$0xff]  ;;  %v325_v36 = vld [vmem:[%s1948_s22 + $0xc20] sm:$0xff] }
  0x43   : > { %322 = vst [vmem:[%s1953_s23 + $0x310] sm:$0xff] %v321_v34  ;;  %v327_v37 = vld [vmem:[%s1948_s22 + $0xc28] sm:$0xff]  ;;  %324 = vst [vmem:[%s1953_s23 + $0x318] sm:$0xff] %v323_v35  ;;  %v329_v38 = vld [vmem:[%s1948_s22 + $0xc30] sm:$0xff] }
  0x44   : > { %326 = vst [vmem:[%s1953_s23 + $0x320] sm:$0xff] %v325_v36  ;;  %328 = vst [vmem:[%s1953_s23 + $0x328] sm:$0xff] %v327_v37  ;;  %v331_v39 = vld [vmem:[%s1948_s22 + $0xc38] sm:$0xff]  ;;  %v333_v40 = vld [vmem:[%s1948_s22 + $0xc40] sm:$0xff] }
  0x45   : > { %330 = vst [vmem:[%s1953_s23 + $0x330] sm:$0xff] %v329_v38  ;;  %332 = vst [vmem:[%s1953_s23 + $0x338] sm:$0xff] %v331_v39  ;;  %v335_v41 = vld [vmem:[%s1948_s22 + $0xc48] sm:$0xff]  ;;  %v337_v42 = vld [vmem:[%s1948_s22 + $0xc50] sm:$0xff] }
  0x46   : > { %334 = vst [vmem:[%s1953_s23 + $0x340] sm:$0xff] %v333_v40  ;;  %v339_v43 = vld [vmem:[%s1948_s22 + $0xc58] sm:$0xff]  ;;  %336 = vst [vmem:[%s1953_s23 + $0x348] sm:$0xff] %v335_v41  ;;  %v341_v44 = vld [vmem:[%s1948_s22 + $0xc60] sm:$0xff] }
  0x47   : > { %338 = vst [vmem:[%s1953_s23 + $0x350] sm:$0xff] %v337_v42  ;;  %340 = vst [vmem:[%s1953_s23 + $0x358] sm:$0xff] %v339_v43  ;;  %v343_v45 = vld [vmem:[%s1948_s22 + $0xc68] sm:$0xff]  ;;  %v345_v46 = vld [vmem:[%s1948_s22 + $0xc70] sm:$0xff] }
  0x48   : > { %342 = vst [vmem:[%s1953_s23 + $0x360] sm:$0xff] %v341_v44  ;;  %344 = vst [vmem:[%s1953_s23 + $0x368] sm:$0xff] %v343_v45  ;;  %v347_v47 = vld [vmem:[%s1948_s22 + $0xc78] sm:$0xff]  ;;  %v349_v48 = vld [vmem:[%s1948_s22 + $0xe00] sm:$0xff] }
  0x49   : > { %346 = vst [vmem:[%s1953_s23 + $0x370] sm:$0xff] %v345_v46  ;;  %v351_v49 = vld [vmem:[%s1948_s22 + $0xe08] sm:$0xff]  ;;  %348 = vst [vmem:[%s1953_s23 + $0x378] sm:$0xff] %v347_v47  ;;  %v353_v50 = vld [vmem:[%s1948_s22 + $0xe10] sm:$0xff] }
  0x4a   : > { %350 = vst [vmem:[%s1953_s23 + $0x380] sm:$0xff] %v349_v48  ;;  %352 = vst [vmem:[%s1953_s23 + $0x388] sm:$0xff] %v351_v49  ;;  %v355_v51 = vld [vmem:[%s1948_s22 + $0xe18] sm:$0xff]  ;;  %v357_v52 = vld [vmem:[%s1948_s22 + $0xe20] sm:$0xff] }
  0x4b   : > { %354 = vst [vmem:[%s1953_s23 + $0x390] sm:$0xff] %v353_v50  ;;  %356 = vst [vmem:[%s1953_s23 + $0x398] sm:$0xff] %v355_v51  ;;  %v359_v53 = vld [vmem:[%s1948_s22 + $0xe28] sm:$0xff]  ;;  %v361_v54 = vld [vmem:[%s1948_s22 + $0xe30] sm:$0xff] }
  0x4c   : > { %358 = vst [vmem:[%s1953_s23 + $0x3a0] sm:$0xff] %v357_v52  ;;  %v363_v55 = vld [vmem:[%s1948_s22 + $0xe38] sm:$0xff]  ;;  %360 = vst [vmem:[%s1953_s23 + $0x3a8] sm:$0xff] %v359_v53  ;;  %v365_v56 = vld [vmem:[%s1948_s22 + $0xe40] sm:$0xff] }
  0x4d   : > { %362 = vst [vmem:[%s1953_s23 + $0x3b0] sm:$0xff] %v361_v54  ;;  %364 = vst [vmem:[%s1953_s23 + $0x3b8] sm:$0xff] %v363_v55  ;;  %v367_v57 = vld [vmem:[%s1948_s22 + $0xe48] sm:$0xff]  ;;  %v369_v58 = vld [vmem:[%s1948_s22 + $0xe50] sm:$0xff] }
  0x4e   : > { %366 = vst [vmem:[%s1953_s23 + $0x3c0] sm:$0xff] %v365_v56  ;;  %368 = vst [vmem:[%s1953_s23 + $0x3c8] sm:$0xff] %v367_v57  ;;  %v371_v59 = vld [vmem:[%s1948_s22 + $0xe58] sm:$0xff]  ;;  %v373_v60 = vld [vmem:[%s1948_s22 + $0xe60] sm:$0xff] }
  0x4f   : > { %370 = vst [vmem:[%s1953_s23 + $0x3d0] sm:$0xff] %v369_v58  ;;  %v375_v61 = vld [vmem:[%s1948_s22 + $0xe68] sm:$0xff]  ;;  %372 = vst [vmem:[%s1953_s23 + $0x3d8] sm:$0xff] %v371_v59  ;;  %v377_v62 = vld [vmem:[%s1948_s22 + $0xe70] sm:$0xff] }
  0x50   : > { %374 = vst [vmem:[%s1953_s23 + $0x3e0] sm:$0xff] %v373_v60  ;;  %376 = vst [vmem:[%s1953_s23 + $0x3e8] sm:$0xff] %v375_v61  ;;  %v379_v63 = vld [vmem:[%s1948_s22 + $0xe78] sm:$0xff]  ;;  %v381_v0 = vld [vmem:[%s1948_s22 + $0x1000] sm:$0xff] }
  0x51   : > { %378 = vst [vmem:[%s1953_s23 + $0x3f0] sm:$0xff] %v377_v62  ;;  %380 = vst [vmem:[%s1953_s23 + $0x3f8] sm:$0xff] %v379_v63  ;;  %v383_v1 = vld [vmem:[%s1948_s22 + $0x1008] sm:$0xff]  ;;  %v385_v2 = vld [vmem:[%s1948_s22 + $0x1010] sm:$0xff] }
  0x52   : > { %382 = vst [vmem:[%s1953_s23 + $0x400] sm:$0xff] %v381_v0  ;;  %v387_v3 = vld [vmem:[%s1948_s22 + $0x1018] sm:$0xff]  ;;  %384 = vst [vmem:[%s1953_s23 + $0x408] sm:$0xff] %v383_v1  ;;  %v389_v4 = vld [vmem:[%s1948_s22 + $0x1020] sm:$0xff] }
  0x53   : > { %386 = vst [vmem:[%s1953_s23 + $0x410] sm:$0xff] %v385_v2  ;;  %388 = vst [vmem:[%s1953_s23 + $0x418] sm:$0xff] %v387_v3  ;;  %v391_v5 = vld [vmem:[%s1948_s22 + $0x1028] sm:$0xff]  ;;  %v393_v6 = vld [vmem:[%s1948_s22 + $0x1030] sm:$0xff] }
  0x54   : > { %390 = vst [vmem:[%s1953_s23 + $0x420] sm:$0xff] %v389_v4  ;;  %392 = vst [vmem:[%s1953_s23 + $0x428] sm:$0xff] %v391_v5  ;;  %v395_v7 = vld [vmem:[%s1948_s22 + $0x1038] sm:$0xff]  ;;  %v397_v8 = vld [vmem:[%s1948_s22 + $0x1040] sm:$0xff] }
  0x55   : > { %394 = vst [vmem:[%s1953_s23 + $0x430] sm:$0xff] %v393_v6  ;;  %v399_v9 = vld [vmem:[%s1948_s22 + $0x1048] sm:$0xff]  ;;  %396 = vst [vmem:[%s1953_s23 + $0x438] sm:$0xff] %v395_v7  ;;  %v401_v10 = vld [vmem:[%s1948_s22 + $0x1050] sm:$0xff] }
  0x56   : > { %398 = vst [vmem:[%s1953_s23 + $0x440] sm:$0xff] %v397_v8  ;;  %400 = vst [vmem:[%s1953_s23 + $0x448] sm:$0xff] %v399_v9  ;;  %v403_v11 = vld [vmem:[%s1948_s22 + $0x1058] sm:$0xff]  ;;  %v405_v12 = vld [vmem:[%s1948_s22 + $0x1060] sm:$0xff] }
  0x57   : > { %402 = vst [vmem:[%s1953_s23 + $0x450] sm:$0xff] %v401_v10  ;;  %404 = vst [vmem:[%s1953_s23 + $0x458] sm:$0xff] %v403_v11  ;;  %v407_v13 = vld [vmem:[%s1948_s22 + $0x1068] sm:$0xff]  ;;  %v409_v14 = vld [vmem:[%s1948_s22 + $0x1070] sm:$0xff] }
  0x58   : > { %406 = vst [vmem:[%s1953_s23 + $0x460] sm:$0xff] %v405_v12  ;;  %v411_v15 = vld [vmem:[%s1948_s22 + $0x1078] sm:$0xff]  ;;  %408 = vst [vmem:[%s1953_s23 + $0x468] sm:$0xff] %v407_v13  ;;  %v413_v16 = vld [vmem:[%s1948_s22 + $0x1200] sm:$0xff] }
  0x59   : > { %410 = vst [vmem:[%s1953_s23 + $0x470] sm:$0xff] %v409_v14  ;;  %412 = vst [vmem:[%s1953_s23 + $0x478] sm:$0xff] %v411_v15  ;;  %v415_v17 = vld [vmem:[%s1948_s22 + $0x1208] sm:$0xff]  ;;  %v417_v18 = vld [vmem:[%s1948_s22 + $0x1210] sm:$0xff] }
  0x5a   : > { %414 = vst [vmem:[%s1953_s23 + $0x480] sm:$0xff] %v413_v16  ;;  %416 = vst [vmem:[%s1953_s23 + $0x488] sm:$0xff] %v415_v17  ;;  %v419_v19 = vld [vmem:[%s1948_s22 + $0x1218] sm:$0xff]  ;;  %v421_v20 = vld [vmem:[%s1948_s22 + $0x1220] sm:$0xff] }
  0x5b   : > { %418 = vst [vmem:[%s1953_s23 + $0x490] sm:$0xff] %v417_v18  ;;  %v423_v21 = vld [vmem:[%s1948_s22 + $0x1228] sm:$0xff]  ;;  %420 = vst [vmem:[%s1953_s23 + $0x498] sm:$0xff] %v419_v19  ;;  %v425_v22 = vld [vmem:[%s1948_s22 + $0x1230] sm:$0xff] }
  0x5c   : > { %422 = vst [vmem:[%s1953_s23 + $0x4a0] sm:$0xff] %v421_v20  ;;  %424 = vst [vmem:[%s1953_s23 + $0x4a8] sm:$0xff] %v423_v21  ;;  %v427_v23 = vld [vmem:[%s1948_s22 + $0x1238] sm:$0xff]  ;;  %v429_v24 = vld [vmem:[%s1948_s22 + $0x1240] sm:$0xff] }
  0x5d   : > { %426 = vst [vmem:[%s1953_s23 + $0x4b0] sm:$0xff] %v425_v22  ;;  %428 = vst [vmem:[%s1953_s23 + $0x4b8] sm:$0xff] %v427_v23  ;;  %v431_v25 = vld [vmem:[%s1948_s22 + $0x1248] sm:$0xff]  ;;  %v433_v26 = vld [vmem:[%s1948_s22 + $0x1250] sm:$0xff] }
  0x5e   : > { %430 = vst [vmem:[%s1953_s23 + $0x4c0] sm:$0xff] %v429_v24  ;;  %v435_v27 = vld [vmem:[%s1948_s22 + $0x1258] sm:$0xff]  ;;  %432 = vst [vmem:[%s1953_s23 + $0x4c8] sm:$0xff] %v431_v25  ;;  %v437_v28 = vld [vmem:[%s1948_s22 + $0x1260] sm:$0xff] }
  0x5f   : > { %434 = vst [vmem:[%s1953_s23 + $0x4d0] sm:$0xff] %v433_v26  ;;  %436 = vst [vmem:[%s1953_s23 + $0x4d8] sm:$0xff] %v435_v27  ;;  %v439_v29 = vld [vmem:[%s1948_s22 + $0x1268] sm:$0xff]  ;;  %v441_v30 = vld [vmem:[%s1948_s22 + $0x1270] sm:$0xff] }
  0x60   : > { %438 = vst [vmem:[%s1953_s23 + $0x4e0] sm:$0xff] %v437_v28  ;;  %440 = vst [vmem:[%s1953_s23 + $0x4e8] sm:$0xff] %v439_v29  ;;  %v443_v31 = vld [vmem:[%s1948_s22 + $0x1278] sm:$0xff]  ;;  %v445_v32 = vld [vmem:[%s1948_s22 + $0x1400] sm:$0xff] }
  0x61   : > { %442 = vst [vmem:[%s1953_s23 + $0x4f0] sm:$0xff] %v441_v30  ;;  %v447_v33 = vld [vmem:[%s1948_s22 + $0x1408] sm:$0xff]  ;;  %444 = vst [vmem:[%s1953_s23 + $0x4f8] sm:$0xff] %v443_v31  ;;  %v449_v34 = vld [vmem:[%s1948_s22 + $0x1410] sm:$0xff] }
  0x62   : > { %446 = vst [vmem:[%s1953_s23 + $0x500] sm:$0xff] %v445_v32  ;;  %448 = vst [vmem:[%s1953_s23 + $0x508] sm:$0xff] %v447_v33  ;;  %v451_v35 = vld [vmem:[%s1948_s22 + $0x1418] sm:$0xff]  ;;  %v453_v36 = vld [vmem:[%s1948_s22 + $0x1420] sm:$0xff] }
  0x63   : > { %450 = vst [vmem:[%s1953_s23 + $0x510] sm:$0xff] %v449_v34  ;;  %452 = vst [vmem:[%s1953_s23 + $0x518] sm:$0xff] %v451_v35  ;;  %v455_v37 = vld [vmem:[%s1948_s22 + $0x1428] sm:$0xff]  ;;  %v457_v38 = vld [vmem:[%s1948_s22 + $0x1430] sm:$0xff] }
  0x64   : > { %454 = vst [vmem:[%s1953_s23 + $0x520] sm:$0xff] %v453_v36  ;;  %v459_v39 = vld [vmem:[%s1948_s22 + $0x1438] sm:$0xff]  ;;  %456 = vst [vmem:[%s1953_s23 + $0x528] sm:$0xff] %v455_v37  ;;  %v461_v40 = vld [vmem:[%s1948_s22 + $0x1440] sm:$0xff] }
  0x65   : > { %458 = vst [vmem:[%s1953_s23 + $0x530] sm:$0xff] %v457_v38  ;;  %460 = vst [vmem:[%s1953_s23 + $0x538] sm:$0xff] %v459_v39  ;;  %v463_v41 = vld [vmem:[%s1948_s22 + $0x1448] sm:$0xff]  ;;  %v465_v42 = vld [vmem:[%s1948_s22 + $0x1450] sm:$0xff] }
  0x66   : > { %462 = vst [vmem:[%s1953_s23 + $0x540] sm:$0xff] %v461_v40  ;;  %464 = vst [vmem:[%s1953_s23 + $0x548] sm:$0xff] %v463_v41  ;;  %v467_v43 = vld [vmem:[%s1948_s22 + $0x1458] sm:$0xff]  ;;  %v469_v44 = vld [vmem:[%s1948_s22 + $0x1460] sm:$0xff] }
  0x67   : > { %466 = vst [vmem:[%s1953_s23 + $0x550] sm:$0xff] %v465_v42  ;;  %v471_v45 = vld [vmem:[%s1948_s22 + $0x1468] sm:$0xff]  ;;  %468 = vst [vmem:[%s1953_s23 + $0x558] sm:$0xff] %v467_v43  ;;  %v473_v46 = vld [vmem:[%s1948_s22 + $0x1470] sm:$0xff] }
  0x68   : > { %470 = vst [vmem:[%s1953_s23 + $0x560] sm:$0xff] %v469_v44  ;;  %472 = vst [vmem:[%s1953_s23 + $0x568] sm:$0xff] %v471_v45  ;;  %v475_v47 = vld [vmem:[%s1948_s22 + $0x1478] sm:$0xff]  ;;  %v477_v48 = vld [vmem:[%s1948_s22 + $0x1600] sm:$0xff] }
  0x69   : > { %474 = vst [vmem:[%s1953_s23 + $0x570] sm:$0xff] %v473_v46  ;;  %476 = vst [vmem:[%s1953_s23 + $0x578] sm:$0xff] %v475_v47  ;;  %v479_v49 = vld [vmem:[%s1948_s22 + $0x1608] sm:$0xff]  ;;  %v481_v50 = vld [vmem:[%s1948_s22 + $0x1610] sm:$0xff] }
  0x6a   : > { %478 = vst [vmem:[%s1953_s23 + $0x580] sm:$0xff] %v477_v48  ;;  %v483_v51 = vld [vmem:[%s1948_s22 + $0x1618] sm:$0xff]  ;;  %480 = vst [vmem:[%s1953_s23 + $0x588] sm:$0xff] %v479_v49  ;;  %v485_v52 = vld [vmem:[%s1948_s22 + $0x1620] sm:$0xff] }
  0x6b   : > { %482 = vst [vmem:[%s1953_s23 + $0x590] sm:$0xff] %v481_v50  ;;  %484 = vst [vmem:[%s1953_s23 + $0x598] sm:$0xff] %v483_v51  ;;  %v487_v53 = vld [vmem:[%s1948_s22 + $0x1628] sm:$0xff]  ;;  %v489_v54 = vld [vmem:[%s1948_s22 + $0x1630] sm:$0xff] }
  0x6c   : > { %486 = vst [vmem:[%s1953_s23 + $0x5a0] sm:$0xff] %v485_v52  ;;  %488 = vst [vmem:[%s1953_s23 + $0x5a8] sm:$0xff] %v487_v53  ;;  %v491_v55 = vld [vmem:[%s1948_s22 + $0x1638] sm:$0xff]  ;;  %v493_v56 = vld [vmem:[%s1948_s22 + $0x1640] sm:$0xff] }
  0x6d   : > { %490 = vst [vmem:[%s1953_s23 + $0x5b0] sm:$0xff] %v489_v54  ;;  %v495_v57 = vld [vmem:[%s1948_s22 + $0x1648] sm:$0xff]  ;;  %492 = vst [vmem:[%s1953_s23 + $0x5b8] sm:$0xff] %v491_v55  ;;  %v497_v58 = vld [vmem:[%s1948_s22 + $0x1650] sm:$0xff] }
  0x6e   : > { %494 = vst [vmem:[%s1953_s23 + $0x5c0] sm:$0xff] %v493_v56  ;;  %496 = vst [vmem:[%s1953_s23 + $0x5c8] sm:$0xff] %v495_v57  ;;  %v499_v59 = vld [vmem:[%s1948_s22 + $0x1658] sm:$0xff]  ;;  %v501_v60 = vld [vmem:[%s1948_s22 + $0x1660] sm:$0xff] }
  0x6f   : > { %498 = vst [vmem:[%s1953_s23 + $0x5d0] sm:$0xff] %v497_v58  ;;  %500 = vst [vmem:[%s1953_s23 + $0x5d8] sm:$0xff] %v499_v59  ;;  %v503_v61 = vld [vmem:[%s1948_s22 + $0x1668] sm:$0xff]  ;;  %v505_v62 = vld [vmem:[%s1948_s22 + $0x1670] sm:$0xff] }
  0x70   : > { %502 = vst [vmem:[%s1953_s23 + $0x5e0] sm:$0xff] %v501_v60  ;;  %v507_v63 = vld [vmem:[%s1948_s22 + $0x1678] sm:$0xff]  ;;  %504 = vst [vmem:[%s1953_s23 + $0x5e8] sm:$0xff] %v503_v61  ;;  %v509_v0 = vld [vmem:[%s1948_s22 + $0x1800] sm:$0xff] }
  0x71   : > { %506 = vst [vmem:[%s1953_s23 + $0x5f0] sm:$0xff] %v505_v62  ;;  %508 = vst [vmem:[%s1953_s23 + $0x5f8] sm:$0xff] %v507_v63  ;;  %v511_v1 = vld [vmem:[%s1948_s22 + $0x1808] sm:$0xff]  ;;  %v513_v2 = vld [vmem:[%s1948_s22 + $0x1810] sm:$0xff] }
  0x72   : > { %510 = vst [vmem:[%s1953_s23 + $0x600] sm:$0xff] %v509_v0  ;;  %512 = vst [vmem:[%s1953_s23 + $0x608] sm:$0xff] %v511_v1  ;;  %v515_v3 = vld [vmem:[%s1948_s22 + $0x1818] sm:$0xff]  ;;  %v517_v4 = vld [vmem:[%s1948_s22 + $0x1820] sm:$0xff] }
  0x73   : > { %514 = vst [vmem:[%s1953_s23 + $0x610] sm:$0xff] %v513_v2  ;;  %v519_v5 = vld [vmem:[%s1948_s22 + $0x1828] sm:$0xff]  ;;  %516 = vst [vmem:[%s1953_s23 + $0x618] sm:$0xff] %v515_v3  ;;  %v521_v6 = vld [vmem:[%s1948_s22 + $0x1830] sm:$0xff] }
  0x74   : > { %518 = vst [vmem:[%s1953_s23 + $0x620] sm:$0xff] %v517_v4  ;;  %520 = vst [vmem:[%s1953_s23 + $0x628] sm:$0xff] %v519_v5  ;;  %v523_v7 = vld [vmem:[%s1948_s22 + $0x1838] sm:$0xff]  ;;  %v525_v8 = vld [vmem:[%s1948_s22 + $0x1840] sm:$0xff] }
  0x75   : > { %522 = vst [vmem:[%s1953_s23 + $0x630] sm:$0xff] %v521_v6  ;;  %524 = vst [vmem:[%s1953_s23 + $0x638] sm:$0xff] %v523_v7  ;;  %v527_v9 = vld [vmem:[%s1948_s22 + $0x1848] sm:$0xff]  ;;  %v529_v10 = vld [vmem:[%s1948_s22 + $0x1850] sm:$0xff] }
  0x76   : > { %526 = vst [vmem:[%s1953_s23 + $0x640] sm:$0xff] %v525_v8  ;;  %v531_v11 = vld [vmem:[%s1948_s22 + $0x1858] sm:$0xff]  ;;  %528 = vst [vmem:[%s1953_s23 + $0x648] sm:$0xff] %v527_v9  ;;  %v533_v12 = vld [vmem:[%s1948_s22 + $0x1860] sm:$0xff] }
  0x77   : > { %530 = vst [vmem:[%s1953_s23 + $0x650] sm:$0xff] %v529_v10  ;;  %532 = vst [vmem:[%s1953_s23 + $0x658] sm:$0xff] %v531_v11  ;;  %v535_v13 = vld [vmem:[%s1948_s22 + $0x1868] sm:$0xff]  ;;  %v537_v14 = vld [vmem:[%s1948_s22 + $0x1870] sm:$0xff] }
  0x78   : > { %534 = vst [vmem:[%s1953_s23 + $0x660] sm:$0xff] %v533_v12  ;;  %536 = vst [vmem:[%s1953_s23 + $0x668] sm:$0xff] %v535_v13  ;;  %v539_v15 = vld [vmem:[%s1948_s22 + $0x1878] sm:$0xff]  ;;  %v541_v16 = vld [vmem:[%s1948_s22 + $0x1a00] sm:$0xff] }
  0x79   : > { %538 = vst [vmem:[%s1953_s23 + $0x670] sm:$0xff] %v537_v14  ;;  %v543_v17 = vld [vmem:[%s1948_s22 + $0x1a08] sm:$0xff]  ;;  %540 = vst [vmem:[%s1953_s23 + $0x678] sm:$0xff] %v539_v15  ;;  %v545_v18 = vld [vmem:[%s1948_s22 + $0x1a10] sm:$0xff] }
  0x7a   : > { %542 = vst [vmem:[%s1953_s23 + $0x680] sm:$0xff] %v541_v16  ;;  %544 = vst [vmem:[%s1953_s23 + $0x688] sm:$0xff] %v543_v17  ;;  %v547_v19 = vld [vmem:[%s1948_s22 + $0x1a18] sm:$0xff]  ;;  %v549_v20 = vld [vmem:[%s1948_s22 + $0x1a20] sm:$0xff] }
  0x7b   : > { %546 = vst [vmem:[%s1953_s23 + $0x690] sm:$0xff] %v545_v18  ;;  %548 = vst [vmem:[%s1953_s23 + $0x698] sm:$0xff] %v547_v19  ;;  %v551_v21 = vld [vmem:[%s1948_s22 + $0x1a28] sm:$0xff]  ;;  %v553_v22 = vld [vmem:[%s1948_s22 + $0x1a30] sm:$0xff] }
  0x7c   : > { %550 = vst [vmem:[%s1953_s23 + $0x6a0] sm:$0xff] %v549_v20  ;;  %v555_v23 = vld [vmem:[%s1948_s22 + $0x1a38] sm:$0xff]  ;;  %552 = vst [vmem:[%s1953_s23 + $0x6a8] sm:$0xff] %v551_v21  ;;  %v557_v24 = vld [vmem:[%s1948_s22 + $0x1a40] sm:$0xff] }
  0x7d   : > { %554 = vst [vmem:[%s1953_s23 + $0x6b0] sm:$0xff] %v553_v22  ;;  %556 = vst [vmem:[%s1953_s23 + $0x6b8] sm:$0xff] %v555_v23  ;;  %v559_v25 = vld [vmem:[%s1948_s22 + $0x1a48] sm:$0xff]  ;;  %v561_v26 = vld [vmem:[%s1948_s22 + $0x1a50] sm:$0xff] }
  0x7e   : > { %558 = vst [vmem:[%s1953_s23 + $0x6c0] sm:$0xff] %v557_v24  ;;  %560 = vst [vmem:[%s1953_s23 + $0x6c8] sm:$0xff] %v559_v25  ;;  %v563_v27 = vld [vmem:[%s1948_s22 + $0x1a58] sm:$0xff]  ;;  %v565_v28 = vld [vmem:[%s1948_s22 + $0x1a60] sm:$0xff] }
  0x7f   : > { %562 = vst [vmem:[%s1953_s23 + $0x6d0] sm:$0xff] %v561_v26  ;;  %v567_v29 = vld [vmem:[%s1948_s22 + $0x1a68] sm:$0xff]  ;;  %564 = vst [vmem:[%s1953_s23 + $0x6d8] sm:$0xff] %v563_v27  ;;  %v569_v30 = vld [vmem:[%s1948_s22 + $0x1a70] sm:$0xff] }
  0x80   : > { %566 = vst [vmem:[%s1953_s23 + $0x6e0] sm:$0xff] %v565_v28  ;;  %568 = vst [vmem:[%s1953_s23 + $0x6e8] sm:$0xff] %v567_v29  ;;  %v571_v31 = vld [vmem:[%s1948_s22 + $0x1a78] sm:$0xff]  ;;  %v573_v32 = vld [vmem:[%s1948_s22 + $0x1c00] sm:$0xff] }
  0x81   : > { %570 = vst [vmem:[%s1953_s23 + $0x6f0] sm:$0xff] %v569_v30  ;;  %572 = vst [vmem:[%s1953_s23 + $0x6f8] sm:$0xff] %v571_v31  ;;  %v575_v33 = vld [vmem:[%s1948_s22 + $0x1c08] sm:$0xff]  ;;  %v577_v34 = vld [vmem:[%s1948_s22 + $0x1c10] sm:$0xff] }
  0x82   : > { %574 = vst [vmem:[%s1953_s23 + $0x700] sm:$0xff] %v573_v32  ;;  %v579_v35 = vld [vmem:[%s1948_s22 + $0x1c18] sm:$0xff]  ;;  %576 = vst [vmem:[%s1953_s23 + $0x708] sm:$0xff] %v575_v33  ;;  %v581_v36 = vld [vmem:[%s1948_s22 + $0x1c20] sm:$0xff] }
  0x83   : > { %578 = vst [vmem:[%s1953_s23 + $0x710] sm:$0xff] %v577_v34  ;;  %580 = vst [vmem:[%s1953_s23 + $0x718] sm:$0xff] %v579_v35  ;;  %v583_v37 = vld [vmem:[%s1948_s22 + $0x1c28] sm:$0xff]  ;;  %v585_v38 = vld [vmem:[%s1948_s22 + $0x1c30] sm:$0xff] }
  0x84   : > { %582 = vst [vmem:[%s1953_s23 + $0x720] sm:$0xff] %v581_v36  ;;  %584 = vst [vmem:[%s1953_s23 + $0x728] sm:$0xff] %v583_v37  ;;  %v587_v39 = vld [vmem:[%s1948_s22 + $0x1c38] sm:$0xff]  ;;  %v589_v40 = vld [vmem:[%s1948_s22 + $0x1c40] sm:$0xff] }
  0x85   : > { %586 = vst [vmem:[%s1953_s23 + $0x730] sm:$0xff] %v585_v38  ;;  %v591_v41 = vld [vmem:[%s1948_s22 + $0x1c48] sm:$0xff]  ;;  %588 = vst [vmem:[%s1953_s23 + $0x738] sm:$0xff] %v587_v39  ;;  %v593_v42 = vld [vmem:[%s1948_s22 + $0x1c50] sm:$0xff] }
  0x86   : > { %590 = vst [vmem:[%s1953_s23 + $0x740] sm:$0xff] %v589_v40  ;;  %592 = vst [vmem:[%s1953_s23 + $0x748] sm:$0xff] %v591_v41  ;;  %v595_v43 = vld [vmem:[%s1948_s22 + $0x1c58] sm:$0xff]  ;;  %v597_v44 = vld [vmem:[%s1948_s22 + $0x1c60] sm:$0xff] }
  0x87   : > { %594 = vst [vmem:[%s1953_s23 + $0x750] sm:$0xff] %v593_v42  ;;  %596 = vst [vmem:[%s1953_s23 + $0x758] sm:$0xff] %v595_v43  ;;  %v599_v45 = vld [vmem:[%s1948_s22 + $0x1c68] sm:$0xff]  ;;  %v601_v46 = vld [vmem:[%s1948_s22 + $0x1c70] sm:$0xff] }
  0x88   : > { %598 = vst [vmem:[%s1953_s23 + $0x760] sm:$0xff] %v597_v44  ;;  %v603_v47 = vld [vmem:[%s1948_s22 + $0x1c78] sm:$0xff]  ;;  %600 = vst [vmem:[%s1953_s23 + $0x768] sm:$0xff] %v599_v45  ;;  %v605_v48 = vld [vmem:[%s1948_s22 + $0x1e00] sm:$0xff] }
  0x89   : > { %602 = vst [vmem:[%s1953_s23 + $0x770] sm:$0xff] %v601_v46  ;;  %604 = vst [vmem:[%s1953_s23 + $0x778] sm:$0xff] %v603_v47  ;;  %v607_v49 = vld [vmem:[%s1948_s22 + $0x1e08] sm:$0xff]  ;;  %v609_v50 = vld [vmem:[%s1948_s22 + $0x1e10] sm:$0xff] }
  0x8a   : > { %606 = vst [vmem:[%s1953_s23 + $0x780] sm:$0xff] %v605_v48  ;;  %608 = vst [vmem:[%s1953_s23 + $0x788] sm:$0xff] %v607_v49  ;;  %v611_v51 = vld [vmem:[%s1948_s22 + $0x1e18] sm:$0xff]  ;;  %v613_v52 = vld [vmem:[%s1948_s22 + $0x1e20] sm:$0xff] }
  0x8b   : > { %610 = vst [vmem:[%s1953_s23 + $0x790] sm:$0xff] %v609_v50  ;;  %v615_v53 = vld [vmem:[%s1948_s22 + $0x1e28] sm:$0xff]  ;;  %612 = vst [vmem:[%s1953_s23 + $0x798] sm:$0xff] %v611_v51  ;;  %v617_v54 = vld [vmem:[%s1948_s22 + $0x1e30] sm:$0xff] }
  0x8c   : > { %614 = vst [vmem:[%s1953_s23 + $0x7a0] sm:$0xff] %v613_v52  ;;  %616 = vst [vmem:[%s1953_s23 + $0x7a8] sm:$0xff] %v615_v53  ;;  %v619_v55 = vld [vmem:[%s1948_s22 + $0x1e38] sm:$0xff]  ;;  %v621_v56 = vld [vmem:[%s1948_s22 + $0x1e40] sm:$0xff] }
  0x8d   : > { %618 = vst [vmem:[%s1953_s23 + $0x7b0] sm:$0xff] %v617_v54  ;;  %620 = vst [vmem:[%s1953_s23 + $0x7b8] sm:$0xff] %v619_v55  ;;  %v623_v57 = vld [vmem:[%s1948_s22 + $0x1e48] sm:$0xff]  ;;  %v625_v58 = vld [vmem:[%s1948_s22 + $0x1e50] sm:$0xff] }
  0x8e   : > { %622 = vst [vmem:[%s1953_s23 + $0x7c0] sm:$0xff] %v621_v56  ;;  %v627_v59 = vld [vmem:[%s1948_s22 + $0x1e58] sm:$0xff]  ;;  %624 = vst [vmem:[%s1953_s23 + $0x7c8] sm:$0xff] %v623_v57  ;;  %v629_v60 = vld [vmem:[%s1948_s22 + $0x1e60] sm:$0xff] }
  0x8f   : > { %626 = vst [vmem:[%s1953_s23 + $0x7d0] sm:$0xff] %v625_v58  ;;  %628 = vst [vmem:[%s1953_s23 + $0x7d8] sm:$0xff] %v627_v59  ;;  %v631_v61 = vld [vmem:[%s1948_s22 + $0x1e68] sm:$0xff]  ;;  %v633_v62 = vld [vmem:[%s1948_s22 + $0x1e70] sm:$0xff] }
  0x90   : > { %630 = vst [vmem:[%s1953_s23 + $0x7e0] sm:$0xff] %v629_v60  ;;  %632 = vst [vmem:[%s1953_s23 + $0x7e8] sm:$0xff] %v631_v61  ;;  %v635_v63 = vld [vmem:[%s1948_s22 + $0x1e78] sm:$0xff] }
  0x91   : > { %634 = vst [vmem:[%s1953_s23 + $0x7f0] sm:$0xff] %v633_v62  ;;  %636 = vst [vmem:[%s1953_s23 + $0x7f8] sm:$0xff] %v635_v63 }
  0x92 PF: > { %p1586_p5 = scmp.ge.s32.totalorder %s1896_s11, 1  ;;  %p641_p6 = scmp.lt.s32.totalorder %s1896_s11, 5 }
  0x94   : > { %p642_p7 = pnand %p1586_p5, %p641_p6 }
  0x95   : > { %s648_s24 = sand.u32 (!%p642_p7), 1, %s1888_s9   ;;  %v1898_v0 = vmov (!%p642_p7), 0.0   ;;  %s1588_s29 = sshll.u32 (!%p642_p7), %s1579_s12, 4 }
  0x96   : > { %645 = sbr.rel (%p642_p7) target bundleno = 499 (0x1f3), region = 47  ;;  %s1587_s25 = sshll.u32 (!%p642_p7), %s648_s24, 11  ;;  %997 = vmatprep.mubr.f32.mxu0 (!%p642_p7), %v1898_v0  ;;  %1068 = vmatprep.mubr.f32.mxu1 (!%p642_p7), %v1898_v0 }
  0x97   : > { %s2469_s26 = scalar_lea.vmem (!%p642_p7), [#allocation2], %s1587_s25  ;;  %p671_p8 = scmp.lt.s32.totalorder (!%p642_p7), %s1588_s29, 63 }
  0x98   : > { %v678_v1 = vld [vmem:[%s2469_s26 + $0x8] sm:$0xff] (!%p642_p7)  ;;  %v680_v3 = vld [vmem:[%s2469_s26 + $0x18] sm:$0xff] (!%p642_p7)  ;;  %v677_v6 = vld [vmem:[%s2469_s26] sm:$0xff] (!%p642_p7) }
  0x99   : > { %v694_v2 = vld [vmem:[%s2469_s26 + $0x88] sm:$0xff] (!%p642_p7)  ;;  %v696_v5 = vld [vmem:[%s2469_s26 + $0x98] sm:$0xff] (!%p642_p7)  ;;  %v693_v7 = vld [vmem:[%s2469_s26 + $0x80] sm:$0xff] (!%p642_p7) }
  0x9a   : > { %v1593_v4 = vpack.c.bf16 (!%p642_p7), %v694_v2, %v678_v1  ;;  %v1625_v8 = vpack.c.bf16 (!%p642_p7), %v696_v5, %v680_v3  ;;  %v1595_v9 = vpack.c.bf16 (!%p642_p7), %v693_v7, %v677_v6  ;;  %v679_v10 = vld [vmem:[%s2469_s26 + $0x10] sm:$0xff] (!%p642_p7)  ;;  %v710_v12 = vld [vmem:[%s2469_s26 + $0x108] sm:$0xff] (!%p642_p7)  ;;  %v712_v15 = vld [vmem:[%s2469_s26 + $0x118] sm:$0xff] (!%p642_p7) }
  0x9b   : > { %v695_v11 = vld [vmem:[%s2469_s26 + $0x90] sm:$0xff] (!%p642_p7)  ;;  %v726_v14 = vld [vmem:[%s2469_s26 + $0x188] sm:$0xff] (!%p642_p7)  ;;  %v728_v16 = vld [vmem:[%s2469_s26 + $0x198] sm:$0xff] (!%p642_p7) }
  0x9c   : > { %1594 = vmatprep.subr.bf16.mxu0 (!%p642_p7), %v1593_v4  ;;  %v1627_v13 = vpack.c.bf16 (!%p642_p7), %v695_v11, %v679_v10  ;;  %1626 = vmatprep.subr.bf16.mxu1 (!%p642_p7), %v1625_v8  ;;  %v1597_v17 = vpack.c.bf16 (!%p642_p7), %v726_v14, %v710_v12  ;;  %v1629_v18 = vpack.c.bf16 (!%p642_p7), %v728_v16, %v712_v15  ;;  %v709_v19 = vld [vmem:[%s2469_s26 + $0x100] sm:$0xff] (!%p642_p7)  ;;  %v711_v21 = vld [vmem:[%s2469_s26 + $0x110] sm:$0xff] (!%p642_p7)  ;;  %v742_v24 = vld [vmem:[%s2469_s26 + $0x208] sm:$0xff] (!%p642_p7) }
  0x9d   : > { %1596 = vmatpush1.bf16.msra.mxu0 %v1595_v9  ;;  %v725_v20 = vld [vmem:[%s2469_s26 + $0x180] sm:$0xff]  ;;  %v727_v23 = vld [vmem:[%s2469_s26 + $0x190] sm:$0xff]  ;;  %v758_v25 = vld [vmem:[%s2469_s26 + $0x288] sm:$0xff]  ;;  %s2786_s29 = smov (!%p671_p8, %s1588_s29), 63 }
  0x9e   : > { %1628 = vmatpush1.bf16.msra.mxu1 %v1627_v13  ;;  %v1599_v22 = vpack.c.bf16 %v725_v20, %v709_v19  ;;  %1598 = vmatprep.subr.bf16.mxu0 %v1597_v17  ;;  %v1631_v26 = vpack.c.bf16 %v727_v23, %v711_v21  ;;  %v1601_v27 = vpack.c.bf16 %v758_v25, %v742_v24  ;;  %v744_v28 = vld [vmem:[%s2469_s26 + $0x218] sm:$0xff]  ;;  %v741_v30 = vld [vmem:[%s2469_s26 + $0x200] sm:$0xff]  ;;  %v743_v33 = vld [vmem:[%s2469_s26 + $0x210] sm:$0xff]  ;;  %s1589_s30 = sshll.u32 %s2786_s29, 3 }
  0x9f   : > { %1630 = vmatprep.subr.bf16.mxu1 %v1629_v18  ;;  %v760_v29 = vld [vmem:[%s2469_s26 + $0x298] sm:$0xff]  ;;  %v757_v32 = vld [vmem:[%s2469_s26 + $0x280] sm:$0xff]  ;;  %v759_v34 = vld [vmem:[%s2469_s26 + $0x290] sm:$0xff]  ;;  %s2751_s5 = scalar_lea.vmem %s2781_s2, %s1589_s30 }
  0xa0   : > { %v1633_v31 = vpack.c.bf16 %v760_v29, %v744_v28  ;;  %v1603_v35 = vpack.c.bf16 %v757_v32, %v741_v30  ;;  %v774_v36 = vld [vmem:[%s2469_s26 + $0x308] sm:$0xff]  ;;  %v776_v38 = vld [vmem:[%s2469_s26 + $0x318] sm:$0xff]  ;;  %v1635_v39 = vpack.c.bf16 %v759_v34, %v743_v33  ;;  %v773_v42 = vld [vmem:[%s2469_s26 + $0x300] sm:$0xff] }
  0xa1   : > { %1600 = vmatpush1.bf16.msra.mxu0 %v1599_v22  ;;  %v790_v37 = vld [vmem:[%s2469_s26 + $0x388] sm:$0xff]  ;;  %v792_v41 = vld [vmem:[%s2469_s26 + $0x398] sm:$0xff]  ;;  %v789_v43 = vld [vmem:[%s2469_s26 + $0x380] sm:$0xff] }
  0xa2   : > { %1632 = vmatpush1.bf16.msra.mxu1 %v1631_v26  ;;  %1602 = vmatprep.subr.bf16.mxu0 %v1601_v27  ;;  %v1605_v40 = vpack.c.bf16 %v790_v37, %v774_v36  ;;  %v1637_v44 = vpack.c.bf16 %v792_v41, %v776_v38  ;;  %v775_v45 = vld [vmem:[%s2469_s26 + $0x310] sm:$0xff]  ;;  %v806_v47 = vld [vmem:[%s2469_s26 + $0x408] sm:$0xff]  ;;  %v808_v49 = vld [vmem:[%s2469_s26 + $0x418] sm:$0xff]  ;;  %v1607_v51 = vpack.c.bf16 %v789_v43, %v773_v42 }
  0xa3   : > { %1634 = vmatprep.subr.bf16.mxu1 %v1633_v31  ;;  %v791_v46 = vld [vmem:[%s2469_s26 + $0x390] sm:$0xff]  ;;  %v822_v48 = vld [vmem:[%s2469_s26 + $0x488] sm:$0xff]  ;;  %v824_v50 = vld [vmem:[%s2469_s26 + $0x498] sm:$0xff] }
  0xa4   : > { %v1639_v52 = vpack.c.bf16 %v791_v46, %v775_v45  ;;  %v1609_v53 = vpack.c.bf16 %v822_v48, %v806_v47  ;;  %v805_v54 = vld [vmem:[%s2469_s26 + $0x400] sm:$0xff]  ;;  %v807_v56 = vld [vmem:[%s2469_s26 + $0x410] sm:$0xff]  ;;  %v1641_v57 = vpack.c.bf16 %v824_v50, %v808_v49  ;;  %v838_v59 = vld [vmem:[%s2469_s26 + $0x508] sm:$0xff] }
  0xa5   : > { %1604 = vmatpush1.bf16.msra.mxu0 %v1603_v35  ;;  %v821_v55 = vld [vmem:[%s2469_s26 + $0x480] sm:$0xff]  ;;  %v823_v58 = vld [vmem:[%s2469_s26 + $0x490] sm:$0xff]  ;;  %v854_v60 = vld [vmem:[%s2469_s26 + $0x588] sm:$0xff] }
  0xa6   : > { %1636 = vmatpush1.bf16.msra.mxu1 %v1635_v39  ;;  %1606 = vmatprep.subr.bf16.mxu0 %v1605_v40  ;;  %v840_v61 = vld [vmem:[%s2469_s26 + $0x518] sm:$0xff]  ;;  %v1611_v63 = vpack.c.bf16 %v821_v55, %v805_v54  ;;  %v1643_v1 = vpack.c.bf16 %v823_v58, %v807_v56  ;;  %v1613_v2 = vpack.c.bf16 %v854_v60, %v838_v59  ;;  %v837_v3 = vld [vmem:[%s2469_s26 + $0x500] sm:$0xff]  ;;  %v839_v5 = vld [vmem:[%s2469_s26 + $0x510] sm:$0xff] }
  0xa7   : > { %1638 = vmatprep.subr.bf16.mxu1 %v1637_v44  ;;  %v856_v62 = vld [vmem:[%s2469_s26 + $0x598] sm:$0xff]  ;;  %v853_v4 = vld [vmem:[%s2469_s26 + $0x580] sm:$0xff]  ;;  %v855_v7 = vld [vmem:[%s2469_s26 + $0x590] sm:$0xff] }
  0xa8   : > { %v1645_v6 = vpack.c.bf16 %v856_v62, %v840_v61  ;;  %v870_v8 = vld [vmem:[%s2469_s26 + $0x608] sm:$0xff]  ;;  %v872_v10 = vld [vmem:[%s2469_s26 + $0x618] sm:$0xff]  ;;  %v1615_v12 = vpack.c.bf16 %v853_v4, %v837_v3  ;;  %v1647_v13 = vpack.c.bf16 %v855_v7, %v839_v5  ;;  %v869_v15 = vld [vmem:[%s2469_s26 + $0x600] sm:$0xff] }
  0xa9   : > { %1608 = vmatpush1.bf16.msra.mxu0 %v1607_v51  ;;  %v886_v9 = vld [vmem:[%s2469_s26 + $0x688] sm:$0xff]  ;;  %v888_v11 = vld [vmem:[%s2469_s26 + $0x698] sm:$0xff]  ;;  %v885_v16 = vld [vmem:[%s2469_s26 + $0x680] sm:$0xff] }
  0xaa   : > { %1640 = vmatpush1.bf16.msra.mxu1 %v1639_v52  ;;  %1610 = vmatprep.subr.bf16.mxu0 %v1609_v53  ;;  %v1617_v14 = vpack.c.bf16 %v886_v9, %v870_v8  ;;  %v871_v17 = vld [vmem:[%s2469_s26 + $0x610] sm:$0xff]  ;;  %v1649_v18 = vpack.c.bf16 %v888_v11, %v872_v10  ;;  %v902_v20 = vld [vmem:[%s2469_s26 + $0x708] sm:$0xff]  ;;  %v904_v22 = vld [vmem:[%s2469_s26 + $0x718] sm:$0xff]  ;;  %v1619_v24 = vpack.c.bf16 %v885_v16, %v869_v15 }
  0xab   : > { %1642 = vmatprep.subr.bf16.mxu1 %v1641_v57  ;;  %v887_v19 = vld [vmem:[%s2469_s26 + $0x690] sm:$0xff]  ;;  %v918_v21 = vld [vmem:[%s2469_s26 + $0x788] sm:$0xff]  ;;  %v920_v23 = vld [vmem:[%s2469_s26 + $0x798] sm:$0xff] }
  0xac   : > { %v1651_v25 = vpack.c.bf16 %v887_v19, %v871_v17  ;;  %v1621_v26 = vpack.c.bf16 %v918_v21, %v902_v20  ;;  %v901_v27 = vld [vmem:[%s2469_s26 + $0x700] sm:$0xff]  ;;  %v903_v29 = vld [vmem:[%s2469_s26 + $0x710] sm:$0xff]  ;;  %v1653_v30 = vpack.c.bf16 %v920_v23, %v904_v22  ;;  %v682_v32 = vld [vmem:[%s2469_s26 + $0x28] sm:$0xff] }
  0xad   : > { %1612 = vmatpush1.bf16.msra.mxu0 %v1611_v63  ;;  %v917_v28 = vld [vmem:[%s2469_s26 + $0x780] sm:$0xff]  ;;  %v919_v31 = vld [vmem:[%s2469_s26 + $0x790] sm:$0xff]  ;;  %v698_v33 = vld [vmem:[%s2469_s26 + $0xa8] sm:$0xff] }
  0xae   : > { %1644 = vmatpush1.bf16.msra.mxu1 %v1643_v1  ;;  %1614 = vmatprep.subr.bf16.mxu0 %v1613_v2  ;;  %v684_v34 = vld [vmem:[%s2469_s26 + $0x38] sm:$0xff]  ;;  %v1623_v36 = vpack.c.bf16 %v917_v28, %v901_v27  ;;  %v1655_v37 = vpack.c.bf16 %v919_v31, %v903_v29  ;;  %v1657_v38 = vpack.c.bf16 %v698_v33, %v682_v32  ;;  %v681_v39 = vld [vmem:[%s2469_s26 + $0x20] sm:$0xff]  ;;  %v683_v41 = vld [vmem:[%s2469_s26 + $0x30] sm:$0xff] }
  0xaf   : > { %1646 = vmatprep.subr.bf16.mxu1 %v1645_v6  ;;  %v700_v35 = vld [vmem:[%s2469_s26 + $0xb8] sm:$0xff]  ;;  %v697_v40 = vld [vmem:[%s2469_s26 + $0xa0] sm:$0xff]  ;;  %v699_v43 = vld [vmem:[%s2469_s26 + $0xb0] sm:$0xff] }
  0xb0   : > { %v1689_v42 = vpack.c.bf16 %v700_v35, %v684_v34  ;;  %v714_v44 = vld [vmem:[%s2469_s26 + $0x128] sm:$0xff]  ;;  %v716_v46 = vld [vmem:[%s2469_s26 + $0x138] sm:$0xff]  ;;  %v2550_v48 = vld [vmem:[%s2779_s0] sm:$0xff]  ;;  %v1659_v49 = vpack.c.bf16 %v697_v40, %v681_v39  ;;  %v1691_v50 = vpack.c.bf16 %v699_v43, %v683_v41 }
  0xb1   : > { %1616 = vmatpush1.bf16.msra.mxu0 %v1615_v12  ;;  %v730_v45 = vld [vmem:[%s2469_s26 + $0x1a8] sm:$0xff]  ;;  %v732_v47 = vld [vmem:[%s2469_s26 + $0x1b8] sm:$0xff]  ;;  %v713_v52 = vld [vmem:[%s2469_s26 + $0x120] sm:$0xff] }
  0xb2   : > { %1648 = vmatpush1.bf16.msra.mxu1 %v1647_v13  ;;  %1618 = vmatprep.subr.bf16.mxu0 %v1617_v14  ;;  %v1661_v51 = vpack.c.bf16 %v730_v45, %v714_v44  ;;  %v729_v53 = vld [vmem:[%s2469_s26 + $0x1a0] sm:$0xff]  ;;  %v715_v54 = vld [vmem:[%s2469_s26 + $0x130] sm:$0xff]  ;;  %v1693_v55 = vpack.c.bf16 %v732_v47, %v716_v46  ;;  %v746_v57 = vld [vmem:[%s2469_s26 + $0x228] sm:$0xff] }
  0xb3   : > { %1650 = vmatprep.subr.bf16.mxu1 %v1649_v18  ;;  %v731_v56 = vld [vmem:[%s2469_s26 + $0x1b0] sm:$0xff]  ;;  %v762_v58 = vld [vmem:[%s2469_s26 + $0x2a8] sm:$0xff]  ;;  %v748_v59 = vld [vmem:[%s2469_s26 + $0x238] sm:$0xff]  ;;  %v1663_v61 = vpack.c.bf16 %v729_v53, %v713_v52 }
  0xb4   : > { %v764_v60 = vld [vmem:[%s2469_s26 + $0x2b8] sm:$0xff]  ;;  %v1695_v62 = vpack.c.bf16 %v731_v56, %v715_v54  ;;  %v1665_v63 = vpack.c.bf16 %v762_v58, %v746_v57  ;;  %v745_v1 = vld [vmem:[%s2469_s26 + $0x220] sm:$0xff]  ;;  %v747_v3 = vld [vmem:[%s2469_s26 + $0x230] sm:$0xff] }
  0xb5   : > { %1620 = vmatpush1.bf16.msra.mxu0 %v1619_v24  ;;  %v761_v2 = vld [vmem:[%s2469_s26 + $0x2a0] sm:$0xff]  ;;  %v1697_v4 = vpack.c.bf16 %v764_v60, %v748_v59  ;;  %v763_v5 = vld [vmem:[%s2469_s26 + $0x2b0] sm:$0xff]  ;;  %v778_v6 = vld [vmem:[%s2469_s26 + $0x328] sm:$0xff] }
  0xb6   : > { %1652 = vmatpush1.bf16.msra.mxu1 %v1651_v25  ;;  %1622 = vmatprep.subr.bf16.mxu0 %v1621_v26  ;;  %v794_v7 = vld [vmem:[%s2469_s26 + $0x3a8] sm:$0xff]  ;;  %v780_v8 = vld [vmem:[%s2469_s26 + $0x338] sm:$0xff]  ;;  %v1667_v10 = vpack.c.bf16 %v761_v2, %v745_v1  ;;  %v1699_v11 = vpack.c.bf16 %v763_v5, %v747_v3  ;;  %v777_v13 = vld [vmem:[%s2469_s26 + $0x320] sm:$0xff] }
  0xb7   : > { %1654 = vmatprep.subr.bf16.mxu1 %v1653_v30  ;;  %v796_v9 = vld [vmem:[%s2469_s26 + $0x3b8] sm:$0xff]  ;;  %v1669_v12 = vpack.c.bf16 %v794_v7, %v778_v6  ;;  %v793_v14 = vld [vmem:[%s2469_s26 + $0x3a0] sm:$0xff]  ;;  %v779_v15 = vld [vmem:[%s2469_s26 + $0x330] sm:$0xff] }
  0xb8   : > { %v1701_v16 = vpack.c.bf16 %v796_v9, %v780_v8  ;;  %v795_v17 = vld [vmem:[%s2469_s26 + $0x3b0] sm:$0xff]  ;;  %v810_v18 = vld [vmem:[%s2469_s26 + $0x428] sm:$0xff]  ;;  %v812_v20 = vld [vmem:[%s2469_s26 + $0x438] sm:$0xff]  ;;  %v1671_v22 = vpack.c.bf16 %v793_v14, %v777_v13 }
  0xb9   : > { %1624 = vmatpush1.bf16.msra.mxu0 %v1623_v36  ;;  %v826_v19 = vld [vmem:[%s2469_s26 + $0x4a8] sm:$0xff]  ;;  %v828_v21 = vld [vmem:[%s2469_s26 + $0x4b8] sm:$0xff]  ;;  %v1703_v23 = vpack.c.bf16 %v795_v17, %v779_v15  ;;  %v809_v25 = vld [vmem:[%s2469_s26 + $0x420] sm:$0xff] }
  0xba   : > { %1656 = vmatpush1.bf16.msra.mxu1 %v1655_v37  ;;  %1658 = vmatprep.subr.bf16.mxu0 %v1657_v38  ;;  %v1673_v24 = vpack.c.bf16 %v826_v19, %v810_v18  ;;  %v825_v26 = vld [vmem:[%s2469_s26 + $0x4a0] sm:$0xff]  ;;  %v811_v27 = vld [vmem:[%s2469_s26 + $0x430] sm:$0xff]  ;;  %v1705_v28 = vpack.c.bf16 %v828_v21, %v812_v20  ;;  %v842_v30 = vld [vmem:[%s2469_s26 + $0x528] sm:$0xff] }
  0xbb   : > { %1690 = vmatprep.subr.bf16.mxu1 %v1689_v42  ;;  %v827_v29 = vld [vmem:[%s2469_s26 + $0x4b0] sm:$0xff]  ;;  %v858_v31 = vld [vmem:[%s2469_s26 + $0x5a8] sm:$0xff]  ;;  %v844_v32 = vld [vmem:[%s2469_s26 + $0x538] sm:$0xff]  ;;  %v1675_v34 = vpack.c.bf16 %v825_v26, %v809_v25 }
  0xbc   : > { %998 = vmatmul.mubr.f32.vlgmr.msra.gmra.mrb[0].mxu0 %v2550_v48  ;;  %v860_v33 = vld [vmem:[%s2469_s26 + $0x5b8] sm:$0xff]  ;;  %v1707_v35 = vpack.c.bf16 %v827_v29, %v811_v27  ;;  %v1677_v36 = vpack.c.bf16 %v858_v31, %v842_v30  ;;  %v841_v37 = vld [vmem:[%s2469_s26 + $0x520] sm:$0xff]  ;;  %v843_v39 = vld [vmem:[%s2469_s26 + $0x530] sm:$0xff] }
  0xbd   : > { %1069 = vmatmul.mubr.f32.vlgmr.msra.gmra.mrb[0].mxu1 %v2550_v48  ;;  %1660 = vmatpush1.bf16.msra.mxu0 %v1659_v49  ;;  %v857_v38 = vld [vmem:[%s2469_s26 + $0x5a0] sm:$0xff]  ;;  %v1709_v40 = vpack.c.bf16 %v860_v33, %v844_v32  ;;  %v859_v41 = vld [vmem:[%s2469_s26 + $0x5b0] sm:$0xff]  ;;  %v874_v42 = vld [vmem:[%s2469_s26 + $0x628] sm:$0xff] }
  0xbe   : > { %1692 = vmatpush1.bf16.msra.mxu1 %v1691_v50  ;;  %1662 = vmatprep.subr.bf16.mxu0 %v1661_v51  ;;  %v890_v43 = vld [vmem:[%s2469_s26 + $0x6a8] sm:$0xff]  ;;  %v876_v44 = vld [vmem:[%s2469_s26 + $0x638] sm:$0xff]  ;;  %v1679_v46 = vpack.c.bf16 %v857_v38, %v841_v37  ;;  %v1711_v47 = vpack.c.bf16 %v859_v41, %v843_v39  ;;  %v873_v50 = vld [vmem:[%s2469_s26 + $0x620] sm:$0xff] }
  0xbf   : > { %1694 = vmatprep.subr.bf16.mxu1 %v1693_v55  ;;  %1139 = vmatprep.mubr.f32.mxu0 %v1898_v0  ;;  %v892_v45 = vld [vmem:[%s2469_s26 + $0x6b8] sm:$0xff]  ;;  %v1681_v49 = vpack.c.bf16 %v890_v43, %v874_v42  ;;  %v889_v51 = vld [vmem:[%s2469_s26 + $0x6a0] sm:$0xff]  ;;  %v875_v52 = vld [vmem:[%s2469_s26 + $0x630] sm:$0xff] }
  0xc0   : > { %1210 = vmatprep.mubr.f32.mxu1 %v1898_v0  ;;  %v1713_v53 = vpack.c.bf16 %v892_v45, %v876_v44  ;;  %v891_v54 = vld [vmem:[%s2469_s26 + $0x6b0] sm:$0xff]  ;;  %v906_v55 = vld [vmem:[%s2469_s26 + $0x728] sm:$0xff]  ;;  %v908_v57 = vld [vmem:[%s2469_s26 + $0x738] sm:$0xff]  ;;  %v1683_v59 = vpack.c.bf16 %v889_v51, %v873_v50 }
  0xc1   : > { %1664 = vmatpush1.bf16.msra.mxu0 %v1663_v61  ;;  %v922_v56 = vld [vmem:[%s2469_s26 + $0x7a8] sm:$0xff]  ;;  %v924_v58 = vld [vmem:[%s2469_s26 + $0x7b8] sm:$0xff]  ;;  %v1715_v60 = vpack.c.bf16 %v891_v54, %v875_v52  ;;  %v907_v1 = vld [vmem:[%s2469_s26 + $0x730] sm:$0xff] }
  0xc2   : > { %1696 = vmatpush1.bf16.msra.mxu1 %v1695_v62  ;;  %1666 = vmatprep.subr.bf16.mxu0 %v1665_v63  ;;  %v1685_v61 = vpack.c.bf16 %v922_v56, %v906_v55  ;;  %v905_v62 = vld [vmem:[%s2469_s26 + $0x720] sm:$0xff]  ;;  %v1717_v2 = vpack.c.bf16 %v924_v58, %v908_v57  ;;  %v923_v3 = vld [vmem:[%s2469_s26 + $0x7b0] sm:$0xff]  ;;  %v702_v5 = vld [vmem:[%s2469_s26 + $0xc8] sm:$0xff] }
  0xc3   : > { %1698 = vmatprep.subr.bf16.mxu1 %v1697_v4  ;;  %v921_v63 = vld [vmem:[%s2469_s26 + $0x7a0] sm:$0xff]  ;;  %v686_v4 = vld [vmem:[%s2469_s26 + $0x48] sm:$0xff]  ;;  %v688_v6 = vld [vmem:[%s2469_s26 + $0x58] sm:$0xff]  ;;  %v1719_v9 = vpack.c.bf16 %v923_v3, %v907_v1 }
  0xc4   : > { %v704_v7 = vld [vmem:[%s2469_s26 + $0xd8] sm:$0xff]  ;;  %v1687_v8 = vpack.c.bf16 %v921_v63, %v905_v62  ;;  %v687_v13 = vld [vmem:[%s2469_s26 + $0x50] sm:$0xff]  ;;  %v734_v17 = vld [vmem:[%s2469_s26 + $0x1c8] sm:$0xff] }
  0xc5   : > { %1668 = vmatpush1.bf16.msra.mxu0 %v1667_v10  ;;  %v1721_v10 = vpack.c.bf16 %v702_v5, %v686_v4  ;;  %v1753_v14 = vpack.c.bf16 %v704_v7, %v688_v6  ;;  %v703_v15 = vld [vmem:[%s2469_s26 + $0xd0] sm:$0xff]  ;;  %v720_v18 = vld [vmem:[%s2469_s26 + $0x158] sm:$0xff]  ;;  %v766_v29 = vld [vmem:[%s2469_s26 + $0x2c8] sm:$0xff] }
  0xc6   : > { %1700 = vmatpush1.bf16.msra.mxu1 %v1699_v11  ;;  %1670 = vmatprep.subr.bf16.mxu0 %v1669_v12  ;;  %v685_v11 = vld [vmem:[%s2469_s26 + $0x40] sm:$0xff]  ;;  %v736_v19 = vld [vmem:[%s2469_s26 + $0x1d8] sm:$0xff]  ;;  %v1755_v21 = vpack.c.bf16 %v703_v15, %v687_v13  ;;  %v719_v25 = vld [vmem:[%s2469_s26 + $0x150] sm:$0xff] }
  0xc7   : > { %1702 = vmatprep.subr.bf16.mxu1 %v1701_v16  ;;  %v701_v12 = vld [vmem:[%s2469_s26 + $0xc0] sm:$0xff]  ;;  %v718_v16 = vld [vmem:[%s2469_s26 + $0x148] sm:$0xff]  ;;  %v1757_v26 = vpack.c.bf16 %v736_v19, %v720_v18  ;;  %v735_v27 = vld [vmem:[%s2469_s26 + $0x1d0] sm:$0xff] }
  0xc8   : > { %v1723_v20 = vpack.c.bf16 %v701_v12, %v685_v11  ;;  %v752_v30 = vld [vmem:[%s2469_s26 + $0x258] sm:$0xff]  ;;  %v1759_v33 = vpack.c.bf16 %v735_v27, %v719_v25  ;;  %v751_v37 = vld [vmem:[%s2469_s26 + $0x250] sm:$0xff]  ;;  %v798_v41 = vld [vmem:[%s2469_s26 + $0x3c8] sm:$0xff] }
  0xc9   : > { %1672 = vmatpush1.bf16.msra.mxu0 %v1671_v22  ;;  %v1725_v22 = vpack.c.bf16 %v734_v17, %v718_v16  ;;  %v768_v31 = vld [vmem:[%s2469_s26 + $0x2d8] sm:$0xff]  ;;  %v767_v39 = vld [vmem:[%s2469_s26 + $0x2d0] sm:$0xff]  ;;  %v830_v54 = vld [vmem:[%s2469_s26 + $0x4c8] sm:$0xff] }
  0xca   : > { %1704 = vmatpush1.bf16.msra.mxu1 %v1703_v23  ;;  %1674 = vmatprep.subr.bf16.mxu0 %v1673_v24  ;;  %v717_v23 = vld [vmem:[%s2469_s26 + $0x140] sm:$0xff]  ;;  %v1761_v38 = vpack.c.bf16 %v768_v31, %v752_v30  ;;  %v784_v42 = vld [vmem:[%s2469_s26 + $0x358] sm:$0xff]  ;;  %v1763_v45 = vpack.c.bf16 %v767_v39, %v751_v37  ;;  %v783_v50 = vld [vmem:[%s2469_s26 + $0x350] sm:$0xff] }
  0xcb   : > { %1706 = vmatprep.subr.bf16.mxu1 %v1705_v28  ;;  %v733_v24 = vld [vmem:[%s2469_s26 + $0x1c0] sm:$0xff]  ;;  %v750_v28 = vld [vmem:[%s2469_s26 + $0x248] sm:$0xff]  ;;  %v800_v43 = vld [vmem:[%s2469_s26 + $0x3d8] sm:$0xff] }
  0xcc   : > { %v1727_v32 = vpack.c.bf16 %v733_v24, %v717_v23  ;;  %v1765_v51 = vpack.c.bf16 %v800_v43, %v784_v42  ;;  %v799_v52 = vld [vmem:[%s2469_s26 + $0x3d0] sm:$0xff]  ;;  %v816_v55 = vld [vmem:[%s2469_s26 + $0x458] sm:$0xff]  ;;  %v862_v3 = vld [vmem:[%s2469_s26 + $0x5c8] sm:$0xff] }
  0xcd   : > { %1676 = vmatpush1.bf16.msra.mxu0 %v1675_v34  ;;  %v1729_v34 = vpack.c.bf16 %v766_v29, %v750_v28  ;;  %v832_v56 = vld [vmem:[%s2469_s26 + $0x4d8] sm:$0xff]  ;;  %v1767_v58 = vpack.c.bf16 %v799_v52, %v783_v50  ;;  %v815_v62 = vld [vmem:[%s2469_s26 + $0x450] sm:$0xff]  ;;  %v894_v15 = vld [vmem:[%s2469_s26 + $0x6c8] sm:$0xff] }
  0xce   : > { %1708 = vmatpush1.bf16.msra.mxu1 %v1707_v35  ;;  %1678 = vmatprep.subr.bf16.mxu0 %v1677_v36  ;;  %v749_v35 = vld [vmem:[%s2469_s26 + $0x240] sm:$0xff]  ;;  %v1769_v63 = vpack.c.bf16 %v832_v56, %v816_v55  ;;  %v831_v1 = vld [vmem:[%s2469_s26 + $0x4d0] sm:$0xff]  ;;  %v848_v4 = vld [vmem:[%s2469_s26 + $0x558] sm:$0xff] }
  0xcf   : > { %1710 = vmatprep.subr.bf16.mxu1 %v1709_v40  ;;  %v765_v36 = vld [vmem:[%s2469_s26 + $0x2c0] sm:$0xff]  ;;  %v782_v40 = vld [vmem:[%s2469_s26 + $0x348] sm:$0xff]  ;;  %v864_v5 = vld [vmem:[%s2469_s26 + $0x5d8] sm:$0xff]  ;;  %v1771_v7 = vpack.c.bf16 %v831_v1, %v815_v62 }
  0xd0   : > { %v1731_v44 = vpack.c.bf16 %v765_v36, %v749_v35  ;;  %v847_v11 = vld [vmem:[%s2469_s26 + $0x550] sm:$0xff]  ;;  %v1773_v12 = vpack.c.bf16 %v864_v5, %v848_v4  ;;  %v880_v16 = vld [vmem:[%s2469_s26 + $0x658] sm:$0xff]  ;;  %v926_v27 = vld [vmem:[%s2469_s26 + $0x7c8] sm:$0xff] }
  0xd1   : > { %1680 = vmatpush1.bf16.msra.mxu0 %v1679_v46  ;;  %v1733_v46 = vpack.c.bf16 %v798_v41, %v782_v40  ;;  %v863_v13 = vld [vmem:[%s2469_s26 + $0x5d0] sm:$0xff]  ;;  %v896_v17 = vld [vmem:[%s2469_s26 + $0x6d8] sm:$0xff]  ;;  %v706_v39 = vld [vmem:[%s2469_s26 + $0xe8] sm:$0xff] }
  0xd2   : > { %1712 = vmatpush1.bf16.msra.mxu1 %v1711_v47  ;;  %1682 = vmatprep.subr.bf16.mxu0 %v1681_v49  ;;  %v781_v47 = vld [vmem:[%s2469_s26 + $0x340] sm:$0xff]  ;;  %v1775_v19 = vpack.c.bf16 %v863_v13, %v847_v11  ;;  %v879_v23 = vld [vmem:[%s2469_s26 + $0x650] sm:$0xff]  ;;  %v1777_v24 = vpack.c.bf16 %v896_v17, %v880_v16  ;;  %v912_v28 = vld [vmem:[%s2469_s26 + $0x758] sm:$0xff] }
  0xd3   : > { %1714 = vmatprep.subr.bf16.mxu1 %v1713_v53  ;;  %v797_v49 = vld [vmem:[%s2469_s26 + $0x3c0] sm:$0xff]  ;;  %v814_v53 = vld [vmem:[%s2469_s26 + $0x448] sm:$0xff]  ;;  %v895_v25 = vld [vmem:[%s2469_s26 + $0x6d0] sm:$0xff] }
  0xd4   : > { %v1735_v57 = vpack.c.bf16 %v797_v49, %v781_v47  ;;  %v928_v29 = vld [vmem:[%s2469_s26 + $0x7d8] sm:$0xff]  ;;  %v1779_v31 = vpack.c.bf16 %v895_v25, %v879_v23  ;;  %v911_v35 = vld [vmem:[%s2469_s26 + $0x750] sm:$0xff]  ;;  %v738_v52 = vld [vmem:[%s2469_s26 + $0x1e8] sm:$0xff] }
  0xd5   : > { %1684 = vmatpush1.bf16.msra.mxu0 %v1683_v59  ;;  %v1737_v59 = vpack.c.bf16 %v830_v54, %v814_v53  ;;  %v1781_v36 = vpack.c.bf16 %v928_v29, %v912_v28  ;;  %v927_v37 = vld [vmem:[%s2469_s26 + $0x7d0] sm:$0xff]  ;;  %v692_v40 = vld [vmem:[%s2469_s26 + $0x78] sm:$0xff]  ;;  %v770_v1 = vld [vmem:[%s2469_s26 + $0x2e8] sm:$0xff] }
  0xd6   : > { %1716 = vmatpush1.bf16.msra.mxu1 %v1715_v60  ;;  %1686 = vmatprep.subr.bf16.mxu0 %v1685_v61  ;;  %v813_v60 = vld [vmem:[%s2469_s26 + $0x440] sm:$0xff]  ;;  %v708_v41 = vld [vmem:[%s2469_s26 + $0xf8] sm:$0xff]  ;;  %v1783_v43 = vpack.c.bf16 %v927_v37, %v911_v35  ;;  %v691_v47 = vld [vmem:[%s2469_s26 + $0x70] sm:$0xff] }
  0xd7   : > { %1718 = vmatprep.subr.bf16.mxu1 %v1717_v2  ;;  %v829_v61 = vld [vmem:[%s2469_s26 + $0x4c0] sm:$0xff]  ;;  %v846_v2 = vld [vmem:[%s2469_s26 + $0x548] sm:$0xff]  ;;  %v1817_v49 = vpack.c.bf16 %v708_v41, %v692_v40  ;;  %v707_v50 = vld [vmem:[%s2469_s26 + $0xf0] sm:$0xff] }
  0xd8   : > { %v1739_v6 = vpack.c.bf16 %v829_v61, %v813_v60  ;;  %v724_v53 = vld [vmem:[%s2469_s26 + $0x178] sm:$0xff]  ;;  %v1819_v56 = vpack.c.bf16 %v707_v50, %v691_v47  ;;  %v723_v60 = vld [vmem:[%s2469_s26 + $0x170] sm:$0xff]  ;;  %v802_v13 = vld [vmem:[%s2469_s26 + $0x3e8] sm:$0xff] }
  0xd9   : > { %1688 = vmatpush1.bf16.msra.mxu0 %v1687_v8  ;;  %v1741_v8 = vpack.c.bf16 %v862_v3, %v846_v2  ;;  %v740_v54 = vld [vmem:[%s2469_s26 + $0x1f8] sm:$0xff]  ;;  %v739_v62 = vld [vmem:[%s2469_s26 + $0x1f0] sm:$0xff]  ;;  %v850_v35 = vld [vmem:[%s2469_s26 + $0x568] sm:$0xff] }
  0xda   : > { %1720 = vmatpush1.bf16.msra.mxu1 %v1719_v9  ;;  %1722 = vmatprep.subr.bf16.mxu0 %v1721_v10  ;;  %v845_v9 = vld [vmem:[%s2469_s26 + $0x540] sm:$0xff]  ;;  %v1821_v61 = vpack.c.bf16 %v740_v54, %v724_v53  ;;  %v756_v2 = vld [vmem:[%s2469_s26 + $0x278] sm:$0xff]  ;;  %v1823_v5 = vpack.c.bf16 %v739_v62, %v723_v60  ;;  %v771_v11 = vld [vmem:[%s2469_s26 + $0x2f0] sm:$0xff] }
  0xdb   : > { %1754 = vmatprep.subr.bf16.mxu1 %v1753_v14  ;;  %v861_v10 = vld [vmem:[%s2469_s26 + $0x5c0] sm:$0xff]  ;;  %v878_v14 = vld [vmem:[%s2469_s26 + $0x648] sm:$0xff]  ;;  %v772_v3 = vld [vmem:[%s2469_s26 + $0x2f8] sm:$0xff] }
  0xdc   : > { %1140 = vmatmul.mubr.f32.vlgmr.msra.gmra.mrb[2].mxu0 %v2550_v48  ;;  %v1743_v18 = vpack.c.bf16 %v861_v10, %v845_v9  ;;  %v755_v9 = vld [vmem:[%s2469_s26 + $0x270] sm:$0xff]  ;;  %v1825_v10 = vpack.c.bf16 %v772_v3, %v756_v2  ;;  %v820_v25 = vld [vmem:[%s2469_s26 + $0x478] sm:$0xff]  ;;  %v882_v47 = vld [vmem:[%s2469_s26 + $0x668] sm:$0xff] }
  0xdd   : > { %1211 = vmatmul.mubr.f32.vlgmr.msra.gmra.mrb[2].mxu1 %v2550_v48  ;;  %1724 = vmatpush1.bf16.msra.mxu0 %v1723_v20  ;;  %v1745_v20 = vpack.c.bf16 %v894_v15, %v878_v14  ;;  %v788_v14 = vld [vmem:[%s2469_s26 + $0x378] sm:$0xff]  ;;  %v1827_v17 = vpack.c.bf16 %v771_v11, %v755_v9  ;;  %v803_v23 = vld [vmem:[%s2469_s26 + $0x3f0] sm:$0xff]  ;;  %v914_v60 = vld [vmem:[%s2469_s26 + $0x768] sm:$0xff] }
  0xde   : > { %1756 = vmatpush1.bf16.msra.mxu1 %v1755_v21  ;;  %1726 = vmatprep.subr.bf16.mxu0 %v1725_v22  ;;  %v877_v21 = vld [vmem:[%s2469_s26 + $0x640] sm:$0xff]  ;;  %v804_v15 = vld [vmem:[%s2469_s26 + $0x3f8] sm:$0xff] }
  0xdf   : > { %1758 = vmatprep.subr.bf16.mxu1 %v1757_v26  ;;  %1281 = vmatprep.mubr.f32.mxu0 %v1898_v0  ;;  %v893_v22 = vld [vmem:[%s2469_s26 + $0x6c0] sm:$0xff]  ;;  %v910_v26 = vld [vmem:[%s2469_s26 + $0x748] sm:$0xff]  ;;  %v852_v37 = vld [vmem:[%s2469_s26 + $0x578] sm:$0xff] }
  0xe0   : > { %1352 = vmatprep.mubr.f32.mxu1 %v1898_v0  ;;  %v1747_v30 = vpack.c.bf16 %v893_v22, %v877_v21  ;;  %v787_v21 = vld [vmem:[%s2469_s26 + $0x370] sm:$0xff]  ;;  %v1829_v22 = vpack.c.bf16 %v804_v15, %v788_v14  ;;  %v884_v50 = vld [vmem:[%s2469_s26 + $0x678] sm:$0xff] }
  0xe1   : > { %1728 = vmatpush1.bf16.msra.mxu0 %v1727_v32  ;;  %v1749_v32 = vpack.c.bf16 %v926_v27, %v910_v26  ;;  %v836_v26 = vld [vmem:[%s2469_s26 + $0x4f8] sm:$0xff]  ;;  %v1831_v28 = vpack.c.bf16 %v803_v23, %v787_v21 }
  0xe2   : > { %1760 = vmatpush1.bf16.msra.mxu1 %v1759_v33  ;;  %1730 = vmatprep.subr.bf16.mxu0 %v1729_v34  ;;  %v909_v33 = vld [vmem:[%s2469_s26 + $0x740] sm:$0xff]  ;;  %v916_v62 = vld [vmem:[%s2469_s26 + $0x778] sm:$0xff] }
  0xe3   : > { %1762 = vmatprep.subr.bf16.mxu1 %v1761_v38  ;;  %v925_v34 = vld [vmem:[%s2469_s26 + $0x7c0] sm:$0xff]  ;;  %v690_v38 = vld [vmem:[%s2469_s26 + $0x68] sm:$0xff] }
  0xe4   : > { %v1751_v42 = vpack.c.bf16 %v925_v34, %v909_v33  ;;  %v1833_v33 = vpack.c.bf16 %v836_v26, %v820_v25  ;;  %v835_v34 = vld [vmem:[%s2469_s26 + $0x4f0] sm:$0xff] }
  0xe5   : > { %1732 = vmatpush1.bf16.msra.mxu0 %v1731_v44  ;;  %v1785_v44 = vpack.c.bf16 %v706_v39, %v690_v38  ;;  %v868_v38 = vld [vmem:[%s2469_s26 + $0x5f8] sm:$0xff] }
  0xe6   : > { %1764 = vmatpush1.bf16.msra.mxu1 %v1763_v45  ;;  %1734 = vmatprep.subr.bf16.mxu0 %v1733_v46  ;;  %v689_v45 = vld [vmem:[%s2469_s26 + $0x60] sm:$0xff] }
  0xe7   : > { %1766 = vmatprep.subr.bf16.mxu1 %v1765_v51  ;;  %v705_v46 = vld [vmem:[%s2469_s26 + $0xe0] sm:$0xff]  ;;  %v722_v51 = vld [vmem:[%s2469_s26 + $0x168] sm:$0xff] }
  0xe8   : > { %v1787_v55 = vpack.c.bf16 %v705_v46, %v689_v45  ;;  %v1837_v45 = vpack.c.bf16 %v868_v38, %v852_v37  ;;  %v867_v46 = vld [vmem:[%s2469_s26 + $0x5f0] sm:$0xff] }
  0xe9   : > { %1736 = vmatpush1.bf16.msra.mxu0 %v1735_v57  ;;  %v1789_v57 = vpack.c.bf16 %v738_v52, %v722_v51  ;;  %v900_v51 = vld [vmem:[%s2469_s26 + $0x6f8] sm:$0xff] }
  0xea   : > { %1768 = vmatpush1.bf16.msra.mxu1 %v1767_v58  ;;  %1738 = vmatprep.subr.bf16.mxu0 %v1737_v59  ;;  %v721_v58 = vld [vmem:[%s2469_s26 + $0x160] sm:$0xff] }
  0xeb   : > { %1770 = vmatprep.subr.bf16.mxu1 %v1769_v63  ;;  %v737_v59 = vld [vmem:[%s2469_s26 + $0x1e0] sm:$0xff]  ;;  %v754_v63 = vld [vmem:[%s2469_s26 + $0x268] sm:$0xff] }
  0xec   : > { %v1791_v4 = vpack.c.bf16 %v737_v59, %v721_v58  ;;  %v1841_v58 = vpack.c.bf16 %v900_v51, %v884_v50  ;;  %v899_v59 = vld [vmem:[%s2469_s26 + $0x6f0] sm:$0xff] }
  0xed   : > { %1740 = vmatpush1.bf16.msra.mxu0 %v1739_v6  ;;  %v1793_v6 = vpack.c.bf16 %v770_v1, %v754_v63  ;;  %v932_v63 = vld [vmem:[%s2469_s26 + $0x7f8] sm:$0xff] }
  0xee   : > { %1772 = vmatpush1.bf16.msra.mxu1 %v1771_v7  ;;  %1742 = vmatprep.subr.bf16.mxu0 %v1741_v8  ;;  %v753_v7 = vld [vmem:[%s2469_s26 + $0x260] sm:$0xff] }
  0xef   : > { %1774 = vmatprep.subr.bf16.mxu1 %v1773_v12  ;;  %v769_v8 = vld [vmem:[%s2469_s26 + $0x2e0] sm:$0xff]  ;;  %v786_v12 = vld [vmem:[%s2469_s26 + $0x368] sm:$0xff] }
  0xf0   : > { %v1795_v16 = vpack.c.bf16 %v769_v8, %v753_v7  ;;  %v915_v7 = vld [vmem:[%s2469_s26 + $0x770] sm:$0xff] }
  0xf1   : > { %1744 = vmatpush1.bf16.msra.mxu0 %v1743_v18  ;;  %v1797_v18 = vpack.c.bf16 %v802_v13, %v786_v12  ;;  %v931_v8 = vld [vmem:[%s2469_s26 + $0x7f0] sm:$0xff] }
  0xf2   : > { %1776 = vmatpush1.bf16.msra.mxu1 %v1775_v19  ;;  %1746 = vmatprep.subr.bf16.mxu0 %v1745_v20  ;;  %v785_v19 = vld [vmem:[%s2469_s26 + $0x360] sm:$0xff] }
  0xf3   : > { %1778 = vmatprep.subr.bf16.mxu1 %v1777_v24  ;;  %v801_v20 = vld [vmem:[%s2469_s26 + $0x3e0] sm:$0xff]  ;;  %v818_v24 = vld [vmem:[%s2469_s26 + $0x468] sm:$0xff] }
  0xf4   : > { %v1799_v27 = vpack.c.bf16 %v801_v20, %v785_v19 }
  0xf5   : > { %1748 = vmatpush1.bf16.msra.mxu0 %v1747_v30  ;;  %v817_v30 = vld [vmem:[%s2469_s26 + $0x460] sm:$0xff] }
  0xf6   : > { %1780 = vmatpush1.bf16.msra.mxu1 %v1779_v31  ;;  %1750 = vmatprep.subr.bf16.mxu0 %v1749_v32  ;;  %v833_v31 = vld [vmem:[%s2469_s26 + $0x4e0] sm:$0xff]  ;;  %v819_v32 = vld [vmem:[%s2469_s26 + $0x470] sm:$0xff] }
  0xf7   : > { %1782 = vmatprep.subr.bf16.mxu1 %v1781_v36  ;;  %v866_v36 = vld [vmem:[%s2469_s26 + $0x5e8] sm:$0xff]  ;;  %v1803_v39 = vpack.c.bf16 %v833_v31, %v817_v30  ;;  %v1835_v40 = vpack.c.bf16 %v835_v34, %v819_v32 }
  0xf8   : > { %v1805_v41 = vpack.c.bf16 %v866_v36, %v850_v35 }
  0xf9   : > { %1752 = vmatpush1.bf16.msra.mxu0 %v1751_v42  ;;  %v849_v42 = vld [vmem:[%s2469_s26 + $0x560] sm:$0xff] }
  0xfa   : > { %1784 = vmatpush1.bf16.msra.mxu1 %v1783_v43  ;;  %1786 = vmatprep.subr.bf16.mxu0 %v1785_v44  ;;  %v865_v43 = vld [vmem:[%s2469_s26 + $0x5e0] sm:$0xff]  ;;  %v851_v44 = vld [vmem:[%s2469_s26 + $0x570] sm:$0xff] }
  0xfb   : > { %1818 = vmatprep.subr.bf16.mxu1 %v1817_v49  ;;  %v898_v49 = vld [vmem:[%s2469_s26 + $0x6e8] sm:$0xff]  ;;  %v1807_v52 = vpack.c.bf16 %v865_v43, %v849_v42  ;;  %v1839_v53 = vpack.c.bf16 %v867_v46, %v851_v44 }
  0xfc   : > { %1282 = vmatmul.mubr.f32.vlgmr.msra.gmra.mrb[4].mxu0 %v2550_v48  ;;  %v1809_v54 = vpack.c.bf16 %v898_v49, %v882_v47 }
  0xfd   : > { %1353 = vmatmul.mubr.f32.vlgmr.msra.gmra.mrb[4].mxu1 %v2550_v48  ;;  %1788 = vmatpush1.bf16.msra.mxu0 %v1787_v55  ;;  %v881_v55 = vld [vmem:[%s2469_s26 + $0x660] sm:$0xff] }
  0xfe   : > { %1820 = vmatpush1.bf16.msra.mxu1 %v1819_v56  ;;  %1790 = vmatprep.subr.bf16.mxu0 %v1789_v57  ;;  %v897_v56 = vld [vmem:[%s2469_s26 + $0x6e0] sm:$0xff]  ;;  %v883_v57 = vld [vmem:[%s2469_s26 + $0x670] sm:$0xff] }
  0xff   : > { %1822 = vmatprep.subr.bf16.mxu1 %v1821_v61  ;;  %1423 = vmatprep.mubr.f32.mxu0 %v1898_v0  ;;  %v930_v61 = vld [vmem:[%s2469_s26 + $0x7e8] sm:$0xff]  ;;  %v1811_v1 = vpack.c.bf16 %v897_v56, %v881_v55  ;;  %v1843_v2 = vpack.c.bf16 %v899_v59, %v883_v57 }
 0x100   : > { %1494 = vmatprep.mubr.f32.mxu1 %v1898_v0  ;;  %v834_v0 = vld [vmem:[%s2469_s26 + $0x4e8] sm:$0xff]  ;;  %v1813_v3 = vpack.c.bf16 %v930_v61, %v914_v60 }
 0x101   : > { %1792 = vmatpush1.bf16.msra.mxu0 %v1791_v4  ;;  %v1801_v29 = vpack.c.bf16 %v834_v0, %v818_v24  ;;  %v913_v4 = vld [vmem:[%s2469_s26 + $0x760] sm:$0xff] }
 0x102   : > { %1824 = vmatpush1.bf16.msra.mxu1 %v1823_v5  ;;  %1794 = vmatprep.subr.bf16.mxu0 %v1793_v6  ;;  %v929_v5 = vld [vmem:[%s2469_s26 + $0x7e0] sm:$0xff]  ;;  %v1845_v6 = vpack.c.bf16 %v932_v63, %v916_v62 }
 0x103   : > { %1826 = vmatprep.subr.bf16.mxu1 %v1825_v10  ;;  %v1815_v9 = vpack.c.bf16 %v929_v5, %v913_v4  ;;  %v1847_v10 = vpack.c.bf16 %v931_v8, %v915_v7 }
 0x105   : > { %1796 = vmatpush1.bf16.msra.mxu0 %v1795_v16 }
 0x106   : > { %1828 = vmatpush1.bf16.msra.mxu1 %v1827_v17  ;;  %1798 = vmatprep.subr.bf16.mxu0 %v1797_v18 }
 0x107   : > { %1830 = vmatprep.subr.bf16.mxu1 %v1829_v22 }
 0x109   : > { %1800 = vmatpush1.bf16.msra.mxu0 %v1799_v27 }
 0x10a   : > { %1832 = vmatpush1.bf16.msra.mxu1 %v1831_v28  ;;  %1802 = vmatprep.subr.bf16.mxu0 %v1801_v29 }
 0x10b   : > { %1834 = vmatprep.subr.bf16.mxu1 %v1833_v33 }
 0x10d   : > { %1804 = vmatpush1.bf16.msra.mxu0 %v1803_v39 }
 0x10e   : > { %1836 = vmatpush1.bf16.msra.mxu1 %v1835_v40  ;;  %1806 = vmatprep.subr.bf16.mxu0 %v1805_v41 }
 0x10f   : > { %1838 = vmatprep.subr.bf16.mxu1 %v1837_v45 }
 0x111   : > { %1808 = vmatpush1.bf16.msra.mxu0 %v1807_v52 }
 0x112   : > { %1840 = vmatpush1.bf16.msra.mxu1 %v1839_v53  ;;  %1810 = vmatprep.subr.bf16.mxu0 %v1809_v54 }
 0x113   : > { %1842 = vmatprep.subr.bf16.mxu1 %v1841_v58 }
 0x115   : > { %1812 = vmatpush1.bf16.msra.mxu0 %v1811_v1 }
 0x116   : > { %1844 = vmatpush1.bf16.msra.mxu1 %v1843_v2  ;;  %1814 = vmatprep.subr.bf16.mxu0 %v1813_v3 }
 0x117   : > { %1846 = vmatprep.subr.bf16.mxu1 %v1845_v6 }
 0x119   : > { %1816 = vmatpush1.bf16.msra.mxu0 %v1815_v9 }
 0x11a   : > { %1848 = vmatpush1.bf16.msra.mxu1 %v1847_v10 }
 0x11c   : > { %1424 = vmatmul.mubr.f32.vlgmr.msra.gmra.mrb[6].mxu0 %v2550_v48 }
 0x11d   : > { %1495 = vmatmul.mubr.f32.vlgmr.msra.gmra.mrb[6].mxu1 %v2550_v48 }
 0x18f   : > { %v999_v11 = vpop.f32.mrb[0].mxu0 }
 0x190   : > { %1501 = vst [vmem:[%s2751_s5] sm:$0xff] %v999_v11  ;;  %v1070_v48 = vpop.f32.mrb[0].mxu1  ;;  %v1001_v12 = vpop.f32.mrb[1].mxu0 }
 0x191   : > { %1503 = vst [vmem:[%s2751_s5 + $0x10] sm:$0xff] %v1070_v48  ;;  %1502 = vst [vmem:[%s2751_s5 + $0x8] sm:$0xff] %v1001_v12  ;;  %v1072_v13 = vpop.f32.mrb[1].mxu1 }
 0x192   : > { %1504 = vst [vmem:[%s2751_s5 + $0x18] sm:$0xff] %v1072_v13 }
 0x1af   : > { %v1141_v14 = vpop.f32.mrb[2].mxu0 }
 0x1b0   : > { %1505 = vst [vmem:[%s2751_s5 + $0x20] sm:$0xff] %v1141_v14  ;;  %v1212_v15 = vpop.f32.mrb[2].mxu1  ;;  %v1143_v16 = vpop.f32.mrb[3].mxu0 }
 0x1b1   : > { %1507 = vst [vmem:[%s2751_s5 + $0x30] sm:$0xff] %v1212_v15  ;;  %1506 = vst [vmem:[%s2751_s5 + $0x28] sm:$0xff] %v1143_v16  ;;  %v1214_v17 = vpop.f32.mrb[3].mxu1 }
 0x1b2   : > { %1508 = vst [vmem:[%s2751_s5 + $0x38] sm:$0xff] %v1214_v17 }
 0x1cf   : > { %v1283_v18 = vpop.f32.mrb[4].mxu0 }
 0x1d0   : > { %1509 = vst [vmem:[%s2751_s5 + $0x40] sm:$0xff] %v1283_v18  ;;  %v1354_v19 = vpop.f32.mrb[4].mxu1  ;;  %v1285_v20 = vpop.f32.mrb[5].mxu0 }
 0x1d1   : > { %1511 = vst [vmem:[%s2751_s5 + $0x50] sm:$0xff] %v1354_v19  ;;  %1510 = vst [vmem:[%s2751_s5 + $0x48] sm:$0xff] %v1285_v20  ;;  %v1356_v21 = vpop.f32.mrb[5].mxu1 }
 0x1d2   : > { %1512 = vst [vmem:[%s2751_s5 + $0x58] sm:$0xff] %v1356_v21 }
 0x1ef   : > { %v1425_v22 = vpop.f32.mrb[6].mxu0 }
 0x1f0   : > { %1513 = vst [vmem:[%s2751_s5 + $0x60] sm:$0xff] %v1425_v22  ;;  %v1496_v23 = vpop.f32.mrb[6].mxu1  ;;  %v1427_v24 = vpop.f32.mrb[7].mxu0 }
 0x1f1   : > { %1515 = vst [vmem:[%s2751_s5 + $0x70] sm:$0xff] %v1496_v23  ;;  %1514 = vst [vmem:[%s2751_s5 + $0x68] sm:$0xff] %v1427_v24  ;;  %v1498_v0 = vpop.f32.mrb[7].mxu1 }
 0x1f2   : > { %1516 = vst [vmem:[%s2751_s5 + $0x78] sm:$0xff] %v1498_v0 }
 0x1f3 PF: > { %p9_p9 = scmp.ge.s32.totalorder %s1931_s13, 6   ;;  %s2782_s9 = smov %s1892_s10 }
 0x1f4   : > { %s2783_s10 = smov %s1940_s16  ;;  %s2784_s11 = smov %s1931_s13 }
 0x1f5   :  { %11 = sbr.rel (!%p9_p9) target bundleno = 2 (0x2), region = 86 }

// kernel: tile.1
= control target key start
LH: loop header
LB: loop body
LE: loop exit
PB: predicated region body
PF: predicated region fallthrough
CT: control target
= control target key end

     0   :  { %s26_s0 = inlined_call_operand.<no memory space> [shape: f32[], index: 0, kind: input, shape index: {}]   ;;  %s27_s1 = inlined_call_operand.vmem [shape: f32[1,256], index: 1, kind: output, shape index: {}]  }
   0x1   :  { %v2_v0 = vstv %s26_s0 }
   0x2   :  { %3 = vst [vmem:[%s27_s1] sm:$0x1] %v2_v0  ;;  %6 = vst [vmem:[%s27_s1 + $0x1] sm:$0x1] %v2_v0 }

// kernel: _lambda_.3
= control target key start
LH: loop header
LB: loop body
LE: loop exit
PB: predicated region body
PF: predicated region fallthrough
CT: control target
= control target key end

     0   :  { %s1847_s18 = smov 0   ;;  %s1849_s19 = smov 0   ;;  %s2695_s0 = inlined_call_operand.vmem [shape: f32[8,32,256], index: 0, kind: input, shape index: {}]   ;;  %s2696_s1 = inlined_call_operand.vmem [shape: f32[1,256], index: 1, kind: input, shape index: {}]   ;;  %s2697_s2 = inlined_call_operand.vmem [shape: f32[256,256], index: 2, kind: input, shape index: {}]   ;;  %s2698_s3 = inlined_call_operand.vmem [shape: f32[256,64], index: 3, kind: input, shape index: {}]   ;;  %s2699_s4 = inlined_call_operand.vmem [shape: f32[64,128], index: 4, kind: input, shape index: {}]   ;;  %s2700_s5 = inlined_call_operand.vmem [shape: f32[128,64], index: 5, kind: output, shape index: {}]  }
   0x1   :  { %s1851_s20 = smov 0  }
   0x2 LB: > { %s1333_s21 = sadd.s32 4294967295, %s1815_s20   ;;  %s1864_s22 = sadd.s32 1, %s1815_s20   ;;  %s1815_s20 = sphi %s1851_s20, %s2703_s20   ;;  %s1811_s19 = sphi %s1849_s19, %s2702_s19   ;;  %s1807_s18 = sphi %s1847_s18, %s2701_s18  }
   0x3   : > { %s19_s23 = ssub.s32 %s1815_s20, %s1864_s22  ;;  %s22_s24 = sadd.s32 1, %s1811_s19 }
   0x4   : > { %p20_p0 = scmp.eq.s32.totalorder %s19_s23, 0  ;;  %p29_p1 = scmp.ne.s32.totalorder %s1811_s19, %s1807_s18 }
   0x5   : > { %p30_p2 = scmp.eq.s32.totalorder %s1815_s20, 0  ;;  %p1336_p4 = scmp.ge.s32.totalorder %s1815_s20, 2 }
   0x6   : > { %s1873_s25 = scalar_select %p20_p0, %s1811_s19, %s22_s24  }
   0x7   : > { %p31_p3 = por %p30_p2, %p29_p1  ;;  %177 = sbr.rel (%p1336_p4) target bundleno = 34 (0x22), region = 32 }
   0xe   : > { %180 = sbr.rel (!%p31_p3) target bundleno = 34 (0x22), region = 36  ;;  %s182_s26 = sand.u32 (%p31_p3), 1, %s1811_s19  }
   0xf   : > { %s1348_s27 = sshll.u32 (%p31_p3), %s1815_s20, 5  ;;  %s1337_s28 = sshll.u32 (%p31_p3), %s182_s26, 8 }
  0x10   : > { %s1881_s6 = scalar_lea.vmem (%p31_p3), %s2695_s0, %s1348_s27  ;;  %s1886_s7 = scalar_lea.vmem (%p31_p3), [#allocation2], %s1337_s28 }
  0x11   : > { %v201_v0 = vld [vmem:[%s1881_s6] sm:$0xff] (%p31_p3)  ;;  %v203_v1 = vld [vmem:[%s1881_s6 + $0x8] sm:$0xff] (%p31_p3)  ;;  %v205_v2 = vld [vmem:[%s1881_s6 + $0x10] sm:$0xff] (%p31_p3) }
  0x12   : > { %202 = vst [vmem:[%s1886_s7] sm:$0xff] (%p31_p3), %v201_v0  ;;  %204 = vst [vmem:[%s1886_s7 + $0x8] sm:$0xff] (%p31_p3), %v203_v1  ;;  %v207_v3 = vld [vmem:[%s1881_s6 + $0x18] sm:$0xff] (%p31_p3)  ;;  %v209_v4 = vld [vmem:[%s1881_s6 + $0x40] sm:$0xff] (%p31_p3) }
  0x13   : > { %206 = vst [vmem:[%s1886_s7 + $0x10] sm:$0xff] (%p31_p3), %v205_v2  ;;  %v211_v5 = vld [vmem:[%s1881_s6 + $0x48] sm:$0xff] (%p31_p3)  ;;  %208 = vst [vmem:[%s1886_s7 + $0x18] sm:$0xff] (%p31_p3), %v207_v3  ;;  %v213_v6 = vld [vmem:[%s1881_s6 + $0x50] sm:$0xff] (%p31_p3) }
  0x14   : > { %210 = vst [vmem:[%s1886_s7 + $0x20] sm:$0xff] (%p31_p3), %v209_v4  ;;  %212 = vst [vmem:[%s1886_s7 + $0x28] sm:$0xff] (%p31_p3), %v211_v5  ;;  %v215_v7 = vld [vmem:[%s1881_s6 + $0x58] sm:$0xff] (%p31_p3)  ;;  %v217_v8 = vld [vmem:[%s1881_s6 + $0x80] sm:$0xff] (%p31_p3) }
  0x15   : > { %214 = vst [vmem:[%s1886_s7 + $0x30] sm:$0xff] %v213_v6  ;;  %216 = vst [vmem:[%s1886_s7 + $0x38] sm:$0xff] %v215_v7  ;;  %v219_v9 = vld [vmem:[%s1881_s6 + $0x88] sm:$0xff]  ;;  %v221_v10 = vld [vmem:[%s1881_s6 + $0x90] sm:$0xff] }
  0x16   : > { %218 = vst [vmem:[%s1886_s7 + $0x40] sm:$0xff] %v217_v8  ;;  %v223_v11 = vld [vmem:[%s1881_s6 + $0x98] sm:$0xff]  ;;  %220 = vst [vmem:[%s1886_s7 + $0x48] sm:$0xff] %v219_v9  ;;  %v225_v12 = vld [vmem:[%s1881_s6 + $0xc0] sm:$0xff] }
  0x17   : > { %222 = vst [vmem:[%s1886_s7 + $0x50] sm:$0xff] %v221_v10  ;;  %224 = vst [vmem:[%s1886_s7 + $0x58] sm:$0xff] %v223_v11  ;;  %v227_v13 = vld [vmem:[%s1881_s6 + $0xc8] sm:$0xff]  ;;  %v229_v14 = vld [vmem:[%s1881_s6 + $0xd0] sm:$0xff] }
  0x18   : > { %226 = vst [vmem:[%s1886_s7 + $0x60] sm:$0xff] %v225_v12  ;;  %228 = vst [vmem:[%s1886_s7 + $0x68] sm:$0xff] %v227_v13  ;;  %v231_v15 = vld [vmem:[%s1881_s6 + $0xd8] sm:$0xff]  ;;  %v233_v16 = vld [vmem:[%s1881_s6 + $0x100] sm:$0xff] }
  0x19   : > { %230 = vst [vmem:[%s1886_s7 + $0x70] sm:$0xff] %v229_v14  ;;  %v235_v17 = vld [vmem:[%s1881_s6 + $0x108] sm:$0xff]  ;;  %232 = vst [vmem:[%s1886_s7 + $0x78] sm:$0xff] %v231_v15  ;;  %v237_v18 = vld [vmem:[%s1881_s6 + $0x110] sm:$0xff] }
  0x1a   : > { %234 = vst [vmem:[%s1886_s7 + $0x80] sm:$0xff] %v233_v16  ;;  %236 = vst [vmem:[%s1886_s7 + $0x88] sm:$0xff] %v235_v17  ;;  %v239_v19 = vld [vmem:[%s1881_s6 + $0x118] sm:$0xff]  ;;  %v241_v20 = vld [vmem:[%s1881_s6 + $0x140] sm:$0xff] }
  0x1b   : > { %238 = vst [vmem:[%s1886_s7 + $0x90] sm:$0xff] %v237_v18  ;;  %240 = vst [vmem:[%s1886_s7 + $0x98] sm:$0xff] %v239_v19  ;;  %v243_v21 = vld [vmem:[%s1881_s6 + $0x148] sm:$0xff]  ;;  %v245_v22 = vld [vmem:[%s1881_s6 + $0x150] sm:$0xff] }
  0x1c   : > { %242 = vst [vmem:[%s1886_s7 + $0xa0] sm:$0xff] %v241_v20  ;;  %v247_v23 = vld [vmem:[%s1881_s6 + $0x158] sm:$0xff]  ;;  %244 = vst [vmem:[%s1886_s7 + $0xa8] sm:$0xff] %v243_v21  ;;  %v249_v24 = vld [vmem:[%s1881_s6 + $0x180] sm:$0xff] }
  0x1d   : > { %246 = vst [vmem:[%s1886_s7 + $0xb0] sm:$0xff] %v245_v22  ;;  %248 = vst [vmem:[%s1886_s7 + $0xb8] sm:$0xff] %v247_v23  ;;  %v251_v25 = vld [vmem:[%s1881_s6 + $0x188] sm:$0xff]  ;;  %v253_v26 = vld [vmem:[%s1881_s6 + $0x190] sm:$0xff] }
  0x1e   : > { %250 = vst [vmem:[%s1886_s7 + $0xc0] sm:$0xff] %v249_v24  ;;  %252 = vst [vmem:[%s1886_s7 + $0xc8] sm:$0xff] %v251_v25  ;;  %v255_v27 = vld [vmem:[%s1881_s6 + $0x198] sm:$0xff]  ;;  %v257_v28 = vld [vmem:[%s1881_s6 + $0x1c0] sm:$0xff] }
  0x1f   : > { %254 = vst [vmem:[%s1886_s7 + $0xd0] sm:$0xff] %v253_v26  ;;  %v259_v29 = vld [vmem:[%s1881_s6 + $0x1c8] sm:$0xff]  ;;  %256 = vst [vmem:[%s1886_s7 + $0xd8] sm:$0xff] %v255_v27  ;;  %v261_v30 = vld [vmem:[%s1881_s6 + $0x1d0] sm:$0xff] }
  0x20   : > { %258 = vst [vmem:[%s1886_s7 + $0xe0] sm:$0xff] %v257_v28  ;;  %260 = vst [vmem:[%s1886_s7 + $0xe8] sm:$0xff] %v259_v29  ;;  %v263_v31 = vld [vmem:[%s1881_s6 + $0x1d8] sm:$0xff] }
  0x21   : > { %262 = vst [vmem:[%s1886_s7 + $0xf0] sm:$0xff] %v261_v30  ;;  %264 = vst [vmem:[%s1886_s7 + $0xf8] sm:$0xff] %v263_v31 }
  0x22 PF: > { %p1341_p5 = scmp.ge.s32.totalorder %s1815_s20, 1  ;;  %p269_p6 = scmp.lt.s32.totalorder %s1815_s20, 3 }
  0x24   : > { %p270_p7 = pnand %p1341_p5, %p269_p6 }
  0x25   : > { %v387_v32 = vld [vmem:[%s2697_s2 + $0x8] sm:$0xff] (!%p270_p7)  ;;  %v389_v33 = vld [vmem:[%s2697_s2 + $0x18] sm:$0xff] (!%p270_p7)  ;;  %v386_v34 = vld [vmem:[%s2697_s2] sm:$0xff] (!%p270_p7)  ;;  %v344_v57 = vlaneseq (!%p270_p7)  ;;  %s276_s6 = sand.u32 (!%p270_p7), 1, %s1807_s18   ;;  %vm1262_vm0 = vcmask (!%p270_p7), 523264  }
  0x26   : > { %273 = sbr.rel (%p270_p7) target bundleno = 1083 (0x43b), region = 59  ;;  %v1497_v35 = vpack.c.bf16 (!%p270_p7), %v389_v33, %v387_v32  ;;  %v388_v36 = vld [vmem:[%s2697_s2 + $0x10] sm:$0xff] (!%p270_p7)  ;;  %v391_v37 = vld [vmem:[%s2697_s2 + $0x28] sm:$0xff] (!%p270_p7)  ;;  %v393_v38 = vld [vmem:[%s2697_s2 + $0x38] sm:$0xff] (!%p270_p7)  ;;  %s1342_s18 = sshll.u32 (!%p270_p7), %s276_s6, 8 }
  0x27   : > { %v1499_v39 = vpack.c.bf16 (!%p270_p7), %v388_v36, %v386_v34  ;;  %v1501_v40 = vpack.c.bf16 (!%p270_p7), %v393_v38, %v391_v37  ;;  %v390_v41 = vld [vmem:[%s2697_s2 + $0x20] sm:$0xff] (!%p270_p7)  ;;  %v392_v42 = vld [vmem:[%s2697_s2 + $0x30] sm:$0xff] (!%p270_p7)  ;;  %v395_v43 = vld [vmem:[%s2697_s2 + $0x48] sm:$0xff] (!%p270_p7)  ;;  %v2018_v0 = vshrl.u32 (!%p270_p7), %v344_v57, 7  ;;  %s2039_s8 = scalar_lea.vmem (!%p270_p7), [#allocation2], %s1342_s18  ;;  %s1343_s6 = sshll.u32 (!%p270_p7), %s1333_s21, 3 }
  0x28   : > { %1498 = vmatprep.subr.bf16.mxu0 (!%p270_p7), %v1497_v35  ;;  %v397_v44 = vld [vmem:[%s2697_s2 + $0x58] sm:$0xff] (!%p270_p7)  ;;  %1562 = vmatprep.subr.bf16.mxu1 (!%p270_p7), %v1497_v35  ;;  %v1503_v45 = vpack.c.bf16 (!%p270_p7), %v392_v42, %v390_v41  ;;  %v394_v47 = vld [vmem:[%s2697_s2 + $0x40] sm:$0xff] (!%p270_p7)  ;;  %v396_v48 = vld [vmem:[%s2697_s2 + $0x50] sm:$0xff] (!%p270_p7)  ;;  %p305_p8 = scmp.lt.s32.totalorder (!%p270_p7), %s1343_s6, 15 }
  0x29   : > { %1500 = vmatpush1.bf16.msra.mxu0 (!%p270_p7), %v1499_v39  ;;  %1564 = vmatpush1.bf16.msra.mxu1 (!%p270_p7), %v1499_v39  ;;  %v1505_v46 = vpack.c.bf16 (!%p270_p7), %v397_v44, %v395_v43  ;;  %v399_v49 = vld [vmem:[%s2697_s2 + $0x68] sm:$0xff] (!%p270_p7)  ;;  %v401_v50 = vld [vmem:[%s2697_s2 + $0x78] sm:$0xff] (!%p270_p7)  ;;  %v1507_v51 = vpack.c.bf16 (!%p270_p7), %v396_v48, %v394_v47  ;;  %v398_v53 = vld [vmem:[%s2697_s2 + $0x60] sm:$0xff] (!%p270_p7)  ;;  %v350_v7 = vsub.s32 (!%p270_p7), 1, %v2018_v0 }
  0x2a   : > { %1502 = vmatprep.subr.bf16.mxu0 (!%p270_p7), %v1501_v40  ;;  %1566 = vmatprep.subr.bf16.mxu1 (!%p270_p7), %v1501_v40  ;;  %v1509_v52 = vpack.c.bf16 (!%p270_p7), %v401_v50, %v399_v49  ;;  %v400_v54 = vld [vmem:[%s2697_s2 + $0x70] sm:$0xff] (!%p270_p7)  ;;  %v403_v55 = vld [vmem:[%s2697_s2 + $0x88] sm:$0xff] (!%p270_p7)  ;;  %v405_v56 = vld [vmem:[%s2697_s2 + $0x98] sm:$0xff] (!%p270_p7) }
  0x2b   : > { %v1511_v58 = vpack.c.bf16 (!%p270_p7), %v400_v54, %v398_v53  ;;  %v1513_v59 = vpack.c.bf16 (!%p270_p7), %v405_v56, %v403_v55  ;;  %v402_v60 = vld [vmem:[%s2697_s2 + $0x80] sm:$0xff] (!%p270_p7)  ;;  %v404_v61 = vld [vmem:[%s2697_s2 + $0x90] sm:$0xff] (!%p270_p7)  ;;  %v407_v62 = vld [vmem:[%s2697_s2 + $0xa8] sm:$0xff] (!%p270_p7) }
  0x2c   : > { %v409_v63 = vld [vmem:[%s2697_s2 + $0xb8] sm:$0xff] (!%p270_p7)  ;;  %v1515_v1 = vpack.c.bf16 (!%p270_p7), %v404_v61, %v402_v60  ;;  %v406_v3 = vld [vmem:[%s2697_s2 + $0xa0] sm:$0xff] (!%p270_p7)  ;;  %v408_v4 = vld [vmem:[%s2697_s2 + $0xb0] sm:$0xff] (!%p270_p7) }
  0x2d   : > { %1504 = vmatpush1.bf16.msra.mxu0 %v1503_v45  ;;  %1568 = vmatpush1.bf16.msra.mxu1 %v1503_v45  ;;  %v1517_v2 = vpack.c.bf16 %v409_v63, %v407_v62  ;;  %v411_v5 = vld [vmem:[%s2697_s2 + $0xc8] sm:$0xff]  ;;  %v413_v6 = vld [vmem:[%s2697_s2 + $0xd8] sm:$0xff]  ;;  %v1519_v8 = vpack.c.bf16 %v408_v4, %v406_v3  ;;  %v410_v9 = vld [vmem:[%s2697_s2 + $0xc0] sm:$0xff]  ;;  %s2705_s6 = smov (!%p305_p8, %s1343_s6), 15 }
  0x2e   : > { %1506 = vmatprep.subr.bf16.mxu0 %v1505_v46  ;;  %1570 = vmatprep.subr.bf16.mxu1 %v1505_v46  ;;  %v1521_v10 = vpack.c.bf16 %v413_v6, %v411_v5  ;;  %v412_v11 = vld [vmem:[%s2697_s2 + $0xd0] sm:$0xff]  ;;  %v311_v12 = vld [vmem:[%s2039_s8 + $0x8] sm:$0xff]  ;;  %v2045_v13 = vld [vmem:[%s2696_s1] sm:$0x3]  ;;  %s1344_s20 = sshll.u32 %s2705_s6, 3 }
  0x2f   : > { %v415_v14 = vld [vmem:[%s2697_s2 + $0xe8] sm:$0xff]  ;;  %v417_v15 = vld [vmem:[%s2697_s2 + $0xf8] sm:$0xff]  ;;  %v2054_v16 = vrot.slane %v2045_v13, %v350_v7  ;;  %v1523_v17 = vpack.c.bf16 %v412_v11, %v410_v9  ;;  %v414_v20 = vld [vmem:[%s2697_s2 + $0xe0] sm:$0xff]  ;;  %s2663_s9 = scalar_lea.vmem %s2700_s5, %s1344_s20 }
  0x30   : > { %v1525_v19 = vpack.c.bf16 %v417_v15, %v415_v14  ;;  %v416_v21 = vld [vmem:[%s2697_s2 + $0xf0] sm:$0xff]  ;;  %v419_v22 = vld [vmem:[%s2697_s2 + $0x108] sm:$0xff]  ;;  %v421_v23 = vld [vmem:[%s2697_s2 + $0x118] sm:$0xff] }
  0x31   : > { %1508 = vmatpush1.bf16.msra.mxu0 %v1507_v51  ;;  %1572 = vmatpush1.bf16.msra.mxu1 %v1507_v51  ;;  %v2057_v18 = vadd.f32 %v2054_v16, %v311_v12  ;;  %v325_v24 = vld [vmem:[%s2039_s8 + $0x78] sm:$0xff]  ;;  %v327_v26 = vld [vmem:[%s2039_s8 + $0x88] sm:$0xff]  ;;  %v1527_v28 = vpack.c.bf16 %v416_v21, %v414_v20  ;;  %v418_v29 = vld [vmem:[%s2697_s2 + $0x100] sm:$0xff]  ;;  %v1529_v33 = vpack.c.bf16 %v421_v23, %v419_v22 }
  0x32   : > { %1510 = vmatprep.subr.bf16.mxu0 %v1509_v52  ;;  %1574 = vmatprep.subr.bf16.mxu1 %v1509_v52  ;;  %v2074_v25 = vadd.f32 %v2054_v16, %v325_v24  ;;  %v329_v27 = vld [vmem:[%s2039_s8 + $0x98] sm:$0xff]  ;;  %v2082_v30 = vadd.f32 %v2054_v16, %v327_v26  ;;  %v331_v32 = vld [vmem:[%s2039_s8 + $0xa8] sm:$0xff]  ;;  %v420_v34 = vld [vmem:[%s2697_s2 + $0x110] sm:$0xff]  ;;  %v346_v24 = vsub.s32 0, %v2018_v0 }
  0x33   : > { %514 = vmatprep.mubr.f32.mxu0 %v2057_v18  ;;  %v2085_v31 = vadd.f32 %v2054_v16, %v329_v27  ;;  %v2092_v35 = vadd.f32 %v2054_v16, %v331_v32  ;;  %v333_v36 = vld [vmem:[%s2039_s8 + $0xb8] sm:$0xff]  ;;  %v335_v37 = vld [vmem:[%s2039_s8 + $0xc8] sm:$0xff]  ;;  %v1531_v46 = vpack.c.bf16 %v420_v34, %v418_v29  ;;  %v422_v50 = vld [vmem:[%s2697_s2 + $0x120] sm:$0xff] }
  0x34   : > { %v423_v38 = vld [vmem:[%s2697_s2 + $0x128] sm:$0xff]  ;;  %v425_v39 = vld [vmem:[%s2697_s2 + $0x138] sm:$0xff]  ;;  %v2103_v40 = vadd.f32 %v2054_v16, %v333_v36  ;;  %v2106_v41 = vadd.f32 %v2054_v16, %v335_v37  ;;  %v424_v51 = vld [vmem:[%s2697_s2 + $0x130] sm:$0xff]  ;;  %v2200_v32 = vrot.slane %v2045_v13, %v346_v24 }
  0x35   : > { %1512 = vmatpush1.bf16.msra.mxu0 %v1511_v58  ;;  %1576 = vmatpush1.bf16.msra.mxu1 %v1511_v58  ;;  %v337_v42 = vld [vmem:[%s2039_s8 + $0xd8] sm:$0xff]  ;;  %v339_v44 = vld [vmem:[%s2039_s8 + $0xe8] sm:$0xff]  ;;  %v1533_v49 = vpack.c.bf16 %v425_v39, %v423_v38  ;;  %v1535_v54 = vpack.c.bf16 %v424_v51, %v422_v50  ;;  %v426_v56 = vld [vmem:[%s2697_s2 + $0x140] sm:$0xff] }
  0x36   : > { %1514 = vmatprep.subr.bf16.mxu0 %v1513_v59  ;;  %1578 = vmatprep.subr.bf16.mxu1 %v1513_v59  ;;  %v2110_v43 = vadd.f32 %v2054_v16, %v337_v42  ;;  %v341_v45 = vld [vmem:[%s2039_s8 + $0xf8] sm:$0xff]  ;;  %v2115_v47 = vadd.f32 %v2054_v16, %v339_v44  ;;  %v427_v52 = vld [vmem:[%s2697_s2 + $0x148] sm:$0xff]  ;;  %v428_v57 = vld [vmem:[%s2697_s2 + $0x150] sm:$0xff] }
  0x37   : > { %v2118_v48 = vadd.f32 %v2054_v16, %v341_v45  ;;  %v429_v53 = vld [vmem:[%s2697_s2 + $0x158] sm:$0xff]  ;;  %v431_v58 = vld [vmem:[%s2697_s2 + $0x168] sm:$0xff]  ;;  %v1539_v60 = vpack.c.bf16 %v428_v57, %v426_v56  ;;  %v430_v62 = vld [vmem:[%s2697_s2 + $0x160] sm:$0xff] }
  0x38   : > { %v1537_v55 = vpack.c.bf16 %v429_v53, %v427_v52  ;;  %v433_v59 = vld [vmem:[%s2697_s2 + $0x178] sm:$0xff]  ;;  %v432_v63 = vld [vmem:[%s2697_s2 + $0x170] sm:$0xff]  ;;  %v434_v5 = vld [vmem:[%s2697_s2 + $0x180] sm:$0xff] }
  0x39   : > { %1516 = vmatpush1.bf16.msra.mxu0 %v1515_v1  ;;  %1580 = vmatpush1.bf16.msra.mxu1 %v1515_v1  ;;  %v1541_v61 = vpack.c.bf16 %v433_v59, %v431_v58  ;;  %v435_v1 = vld [vmem:[%s2697_s2 + $0x188] sm:$0xff]  ;;  %v1543_v3 = vpack.c.bf16 %v432_v63, %v430_v62  ;;  %v436_v6 = vld [vmem:[%s2697_s2 + $0x190] sm:$0xff]  ;;  %v438_v11 = vld [vmem:[%s2697_s2 + $0x1a0] sm:$0xff] }
  0x3a   : > { %1518 = vmatprep.subr.bf16.mxu0 %v1517_v2  ;;  %1582 = vmatprep.subr.bf16.mxu1 %v1517_v2  ;;  %v437_v2 = vld [vmem:[%s2697_s2 + $0x198] sm:$0xff]  ;;  %v439_v7 = vld [vmem:[%s2697_s2 + $0x1a8] sm:$0xff]  ;;  %v1547_v9 = vpack.c.bf16 %v436_v6, %v434_v5  ;;  %v440_v12 = vld [vmem:[%s2697_s2 + $0x1b0] sm:$0xff] }
  0x3b   : > { %v1545_v4 = vpack.c.bf16 %v437_v2, %v435_v1  ;;  %v443_v14 = vld [vmem:[%s2697_s2 + $0x1c8] sm:$0xff]  ;;  %v445_v15 = vld [vmem:[%s2697_s2 + $0x1d8] sm:$0xff]  ;;  %v442_v20 = vld [vmem:[%s2697_s2 + $0x1c0] sm:$0xff] }
  0x3c   : > { %v444_v21 = vld [vmem:[%s2697_s2 + $0x1d0] sm:$0xff]  ;;  %v447_v22 = vld [vmem:[%s2697_s2 + $0x1e8] sm:$0xff]  ;;  %v449_v23 = vld [vmem:[%s2697_s2 + $0x1f8] sm:$0xff] }
  0x3d   : > { %1520 = vmatpush1.bf16.msra.mxu0 %v1519_v8  ;;  %1584 = vmatpush1.bf16.msra.mxu1 %v1519_v8  ;;  %v441_v8 = vld [vmem:[%s2697_s2 + $0x1b8] sm:$0xff]  ;;  %v1555_v26 = vpack.c.bf16 %v444_v21, %v442_v20  ;;  %v1557_v27 = vpack.c.bf16 %v449_v23, %v447_v22  ;;  %v448_v29 = vld [vmem:[%s2697_s2 + $0x1f0] sm:$0xff]  ;;  %v315_v38 = vld [vmem:[%s2039_s8 + $0x28] sm:$0xff] }
  0x3e   : > { %1522 = vmatprep.subr.bf16.mxu0 %v1521_v10  ;;  %1586 = vmatprep.subr.bf16.mxu1 %v1521_v10  ;;  %v1549_v10 = vpack.c.bf16 %v441_v8, %v439_v7  ;;  %v313_v34 = vld [vmem:[%s2039_s8 + $0x18] sm:$0xff]  ;;  %v312_v13 = vld [vmem:[%s2039_s8 + $0x10] sm:$0xff]  ;;  %v2218_v42 = vadd.f32 %v2054_v16, %v315_v38  ;;  %v314_v44 = vld [vmem:[%s2039_s8 + $0x20] sm:$0xff] }
  0x3f   : > { %v2208_v37 = vadd.f32 %v2054_v16, %v313_v34  ;;  %v2214_v39 = vadd.f32 %v2200_v32, %v312_v13  ;;  %v317_v45 = vld [vmem:[%s2039_s8 + $0x38] sm:$0xff]  ;;  %v316_v50 = vld [vmem:[%s2039_s8 + $0x30] sm:$0xff]  ;;  %v319_v51 = vld [vmem:[%s2039_s8 + $0x48] sm:$0xff] }
  0x40   : > { %v2234_v52 = vadd.f32 %v2200_v32, %v316_v50  ;;  %v2238_v53 = vadd.f32 %v2054_v16, %v319_v51  ;;  %v320_v58 = vld [vmem:[%s2039_s8 + $0x50] sm:$0xff]  ;;  %v323_v59 = vld [vmem:[%s2039_s8 + $0x68] sm:$0xff]  ;;  %v322_v62 = vld [vmem:[%s2039_s8 + $0x60] sm:$0xff] }
  0x41   : > { %1524 = vmatpush1.bf16.msra.mxu0 %v1523_v17  ;;  %1588 = vmatpush1.bf16.msra.mxu1 %v1523_v17  ;;  %v1551_v17 = vpack.c.bf16 %v440_v12, %v438_v11  ;;  %v2263_v63 = vadd.f32 %v2200_v32, %v322_v62  ;;  %v324_v1 = vld [vmem:[%s2039_s8 + $0x70] sm:$0xff]  ;;  %v330_v6 = vld [vmem:[%s2039_s8 + $0xa0] sm:$0xff]  ;;  %v917_v22 = vld [vmem:[%s2698_s3 + $0x88] sm:$0xff] }
  0x42   : > { %1526 = vmatprep.subr.bf16.mxu0 %v1525_v19  ;;  %1590 = vmatprep.subr.bf16.mxu1 %v1525_v19  ;;  %v1553_v19 = vpack.c.bf16 %v445_v15, %v443_v14  ;;  %v2269_v2 = vadd.f32 %v2200_v32, %v324_v1  ;;  %v2287_v7 = vadd.f32 %v2200_v32, %v330_v6  ;;  %v332_v8 = vld [vmem:[%s2039_s8 + $0xb0] sm:$0xff]  ;;  %v338_v15 = vld [vmem:[%s2039_s8 + $0xe0] sm:$0xff]  ;;  %v921_v13 = vld [vmem:[%s2698_s3 + $0xa8] sm:$0xff] }
  0x43   : > { %v336_v12 = vld [vmem:[%s2039_s8 + $0xd0] sm:$0xff]  ;;  %v916_v21 = vld [vmem:[%s2698_s3 + $0x80] sm:$0xff]  ;;  %v905_v50 = vld [vmem:[%s2698_s3 + $0x28] sm:$0xff] }
  0x44   : > { %v2305_v14 = vadd.f32 %v2200_v32, %v336_v12  ;;  %v900_v23 = vld [vmem:[%s2698_s3] sm:$0xff]  ;;  %v1625_v24 = vpack.c.bf16 %v917_v22, %v916_v21  ;;  %v922_v51 = vld [vmem:[%s2698_s3 + $0xb0] sm:$0xff]  ;;  %v907_v62 = vld [vmem:[%s2698_s3 + $0x38] sm:$0xff] }
  0x45   : > { %1528 = vmatpush1.bf16.msra.mxu0 %v1527_v28  ;;  %1592 = vmatpush1.bf16.msra.mxu1 %v1527_v28  ;;  %v446_v28 = vld [vmem:[%s2697_s2 + $0x1e0] sm:$0xff]  ;;  %v926_v12 = vld [vmem:[%s2698_s3 + $0xd0] sm:$0xff] }
  0x46   : > { %1530 = vmatprep.subr.bf16.mxu0 %v1529_v33  ;;  %1594 = vmatprep.subr.bf16.mxu1 %v1529_v33  ;;  %v1559_v0 = vpack.c.bf16 %v448_v29, %v446_v28  ;;  %v310_v33 = vld [vmem:[%s2039_s8] sm:$0xff]  ;;  %v919_v28 = vld [vmem:[%s2698_s3 + $0x98] sm:$0xff]  ;;  %v910_v22 = vld [vmem:[%s2698_s3 + $0x50] sm:$0xff] }
  0x47   : > { %v2205_v36 = vadd.f32 %v2200_v32, %v310_v33  ;;  %v903_v33 = vld [vmem:[%s2698_s3 + $0x18] sm:$0xff]  ;;  %v920_v34 = vld [vmem:[%s2698_s3 + $0xa0] sm:$0xff] }
  0x48   : > { %v924_v1 = vld [vmem:[%s2698_s3 + $0xc0] sm:$0xff] }
  0x49   : > { %1532 = vmatpush1.bf16.msra.mxu0 %v1531_v46  ;;  %1596 = vmatpush1.bf16.msra.mxu1 %v1531_v46  ;;  %v2224_v46 = vadd.f32 %v2200_v32, %v314_v44  ;;  %v1633_v44 = vpack.c.bf16 %v921_v13, %v920_v34 }
  0x4a   : > { %1534 = vmatprep.subr.bf16.mxu0 %v1533_v49  ;;  %1598 = vmatprep.subr.bf16.mxu1 %v1533_v49  ;;  %v2228_v49 = vadd.f32 %v2054_v16, %v317_v45  ;;  %v904_v45 = vld [vmem:[%s2698_s3 + $0x20] sm:$0xff] }
  0x4d   : > { %1536 = vmatpush1.bf16.msra.mxu0 %v1535_v54  ;;  %1600 = vmatpush1.bf16.msra.mxu1 %v1535_v54  ;;  %v318_v54 = vld [vmem:[%s2039_s8 + $0x40] sm:$0xff] }
  0x4e   : > { %1538 = vmatprep.subr.bf16.mxu0 %v1537_v55  ;;  %1602 = vmatprep.subr.bf16.mxu1 %v1537_v55  ;;  %v321_v55 = vld [vmem:[%s2039_s8 + $0x58] sm:$0xff]  ;;  %v2244_v56 = vadd.f32 %v2200_v32, %v318_v54 }
  0x4f   : > { %v2248_v57 = vadd.f32 %v2054_v16, %v321_v55  ;;  %v923_v54 = vld [vmem:[%s2698_s3 + $0xb8] sm:$0xff]  ;;  %v1635_v55 = vpack.c.bf16 %v905_v50, %v904_v45 }
  0x51   : > { %1540 = vmatpush1.bf16.msra.mxu0 %v1539_v60  ;;  %1604 = vmatpush1.bf16.msra.mxu1 %v1539_v60  ;;  %v2254_v60 = vadd.f32 %v2200_v32, %v320_v58  ;;  %v1637_v58 = vpack.c.bf16 %v923_v54, %v922_v51 }
  0x52   : > { %1542 = vmatprep.subr.bf16.mxu0 %v1541_v61  ;;  %1606 = vmatprep.subr.bf16.mxu1 %v1541_v61  ;;  %v2258_v61 = vadd.f32 %v2054_v16, %v323_v59  ;;  %v326_v16 = vld [vmem:[%s2039_s8 + $0x80] sm:$0xff]  ;;  %v906_v59 = vld [vmem:[%s2698_s3 + $0x30] sm:$0xff] }
  0x55   : > { %1544 = vmatpush1.bf16.msra.mxu0 %v1543_v3  ;;  %1608 = vmatpush1.bf16.msra.mxu1 %v1543_v3  ;;  %v2275_v3 = vadd.f32 %v2200_v32, %v326_v16  ;;  %v925_v16 = vld [vmem:[%s2698_s3 + $0xc8] sm:$0xff] }
  0x56   : > { %1546 = vmatprep.subr.bf16.mxu0 %v1545_v4  ;;  %1610 = vmatprep.subr.bf16.mxu1 %v1545_v4  ;;  %v328_v4 = vld [vmem:[%s2039_s8 + $0x90] sm:$0xff]  ;;  %v1641_v6 = vpack.c.bf16 %v925_v16, %v924_v1 }
  0x57   : > { %v2281_v5 = vadd.f32 %v2200_v32, %v328_v4  ;;  %v1639_v4 = vpack.c.bf16 %v907_v62, %v906_v59 }
  0x59   : > { %1548 = vmatpush1.bf16.msra.mxu0 %v1547_v9  ;;  %1612 = vmatpush1.bf16.msra.mxu1 %v1547_v9  ;;  %v2293_v9 = vadd.f32 %v2200_v32, %v332_v8  ;;  %v908_v8 = vld [vmem:[%s2698_s3 + $0x40] sm:$0xff] }
  0x5a   : > { %1550 = vmatprep.subr.bf16.mxu0 %v1549_v10  ;;  %1614 = vmatprep.subr.bf16.mxu1 %v1549_v10  ;;  %v334_v10 = vld [vmem:[%s2039_s8 + $0xc0] sm:$0xff] }
  0x5b   : > { %v2299_v11 = vadd.f32 %v2200_v32, %v334_v10  ;;  %v909_v10 = vld [vmem:[%s2698_s3 + $0x48] sm:$0xff] }
  0x5d   : > { %1552 = vmatpush1.bf16.msra.mxu0 %v1551_v17  ;;  %1616 = vmatpush1.bf16.msra.mxu1 %v1551_v17  ;;  %v2311_v17 = vadd.f32 %v2200_v32, %v338_v15  ;;  %v927_v15 = vld [vmem:[%s2698_s3 + $0xd8] sm:$0xff] }
  0x5e   : > { %1554 = vmatprep.subr.bf16.mxu0 %v1553_v19  ;;  %1618 = vmatprep.subr.bf16.mxu1 %v1553_v19  ;;  %v340_v19 = vld [vmem:[%s2039_s8 + $0xf0] sm:$0xff]  ;;  %v1645_v21 = vpack.c.bf16 %v927_v15, %v926_v12 }
  0x5f   : > { %v2317_v20 = vadd.f32 %v2200_v32, %v340_v19  ;;  %v1643_v19 = vpack.c.bf16 %v909_v10, %v908_v8 }
  0x61   : > { %1556 = vmatpush1.bf16.msra.mxu0 %v1555_v26  ;;  %1620 = vmatpush1.bf16.msra.mxu1 %v1555_v26  ;;  %v901_v26 = vld [vmem:[%s2698_s3 + $0x8] sm:$0xff] }
  0x62   : > { %1558 = vmatprep.subr.bf16.mxu0 %v1557_v27  ;;  %1622 = vmatprep.subr.bf16.mxu1 %v1557_v27  ;;  %v918_v27 = vld [vmem:[%s2698_s3 + $0x90] sm:$0xff]  ;;  %v1627_v29 = vpack.c.bf16 %v901_v26, %v900_v23  ;;  %v911_v23 = vld [vmem:[%s2698_s3 + $0x58] sm:$0xff] }
  0x63   : > { %v1629_v32 = vpack.c.bf16 %v919_v28, %v918_v27 }
  0x65   : > { %1560 = vmatpush1.bf16.msra.mxu0 %v1559_v0  ;;  %1624 = vmatpush1.bf16.msra.mxu1 %v1559_v0  ;;  %v902_v0 = vld [vmem:[%s2698_s3 + $0x10] sm:$0xff] }
  0x66   : > { %1626 = vmatprep.subr.bf16.mxu0 %v1625_v24  ;;  %v1631_v38 = vpack.c.bf16 %v903_v33, %v902_v0  ;;  %v1647_v24 = vpack.c.bf16 %v911_v23, %v910_v22 }
  0x68   : > { %515 = vmatmul.mubr.f32.vlgmr.msra.gmra.mrb[0].mxu0 %v2205_v36 }
  0x69   : > { %520 = vmatprep.mubr.f32.mxu0 %v2208_v37  ;;  %1628 = vmatpush3.bf16.msra.mxu0 %v1627_v29 }
  0x6a   : > { %1630 = vmatprep.subr.bf16.mxu0 %v1629_v32 }
  0x6c   : > { %521 = vmatmul.mubr.f32.gmra.mrb[2].mxu0 %v2214_v39 }
  0x6d   : > { %526 = vmatprep.mubr.f32.mxu0 %v2218_v42  ;;  %1632 = vmatpush3.bf16.msra.mxu0 %v1631_v38 }
  0x6e   : > { %1634 = vmatprep.subr.bf16.mxu0 %v1633_v44 }
  0x70   : > { %527 = vmatmul.mubr.f32.gmra.mrb[4].mxu0 %v2224_v46 }
  0x71   : > { %532 = vmatprep.mubr.f32.mxu0 %v2228_v49  ;;  %1636 = vmatpush3.bf16.msra.mxu0 %v1635_v55 }
  0x72   : > { %1638 = vmatprep.subr.bf16.mxu0 %v1637_v58 }
  0x74   : > { %533 = vmatmul.mubr.f32.gmra.mrb[6].mxu0 %v2234_v52 }
  0x75   : > { %538 = vmatprep.mubr.f32.mxu0 %v2238_v53  ;;  %1640 = vmatpush3.bf16.msra.mxu0 %v1639_v4 }
  0x76   : > { %1642 = vmatprep.subr.bf16.mxu0 %v1641_v6 }
  0x78   : > { %539 = vmatmul.mubr.f32.gmra.mrb[8].mxu0 %v2244_v56 }
  0x79   : > { %544 = vmatprep.mubr.f32.mxu0 %v2248_v57  ;;  %1644 = vmatpush3.bf16.msra.mxu0 %v1643_v19 }
  0x7a   : > { %1646 = vmatprep.subr.bf16.mxu0 %v1645_v21 }
  0x7c   : > { %545 = vmatmul.mubr.f32.gmra.mrb[10].mxu0 %v2254_v60 }
  0x7d   : > { %550 = vmatprep.mubr.f32.mxu0 %v2258_v61  ;;  %1648 = vmatpush3.bf16.msra.mxu0 %v1647_v24 }
  0x80   : > { %551 = vmatmul.mubr.f32.gmra.mrb[12].mxu0 %v2263_v63 }
  0x81   : > { %556 = vmatprep.mubr.f32.mxu0 %v2074_v25 }
  0x84   : > { %557 = vmatmul.mubr.f32.gmra.mrb[14].mxu0 %v2269_v2 }
  0x85   : > { %562 = vmatprep.mubr.f32.mxu0 %v2082_v30 }
  0x88   : > { %563 = vmatmul.mubr.f32.gmra.mrb[16].mxu0 %v2275_v3 }
  0x89   : > { %568 = vmatprep.mubr.f32.mxu0 %v2085_v31 }
  0x8c   : > { %569 = vmatmul.mubr.f32.gmra.mrb[18].mxu0 %v2281_v5 }
  0x8d   : > { %574 = vmatprep.mubr.f32.mxu0 %v2092_v35 }
  0x90   : > { %575 = vmatmul.mubr.f32.gmra.mrb[20].mxu0 %v2287_v7 }
  0x91   : > { %580 = vmatprep.mubr.f32.mxu0 %v2103_v40 }
  0x94   : > { %581 = vmatmul.mubr.f32.gmra.mrb[22].mxu0 %v2293_v9 }
  0x95   : > { %586 = vmatprep.mubr.f32.mxu0 %v2106_v41 }
  0x98   : > { %587 = vmatmul.mubr.f32.gmra.mrb[24].mxu0 %v2299_v11 }
  0x99   : > { %592 = vmatprep.mubr.f32.mxu0 %v2110_v43 }
  0x9c   : > { %593 = vmatmul.mubr.f32.gmra.mrb[26].mxu0 %v2305_v14 }
  0x9d   : > { %598 = vmatprep.mubr.f32.mxu0 %v2115_v47 }
  0xa0   : > { %599 = vmatmul.mubr.f32.gmra.mrb[28].mxu0 %v2311_v17 }
  0xa1   : > { %604 = vmatprep.mubr.f32.mxu0 %v2118_v48 }
  0xa4   : > { %605 = vmatmul.mubr.f32.gmra.mrb[30].mxu0 %v2317_v20 }
 0x13b   : > { %v516_v26 = vpop.f32.mrb[0].mxu0 }
 0x13c   : > { %v2394_v27 = vsub.f32 %v2205_v36, %v516_v26  ;;  %v518_v28 = vpop.f32.mrb[1].mxu0 }
 0x13d   : > { %v2397_v29 = vsub.f32 %v2057_v18, %v518_v28 }
 0x13e   : > { %v643_v33 = vmul.f32 %v2394_v27, %v2394_v27 }
 0x13f   : > { %v522_v32 = vpop.f32.mrb[2].mxu0  ;;  %v644_v0 = vmul.f32 %v2397_v29, %v2397_v29 }
 0x140   : > { %v2404_v34 = vsub.f32 %v2214_v39, %v522_v32  ;;  %v524_v13 = vpop.f32.mrb[3].mxu0 }
 0x141   : > { %v2407_v38 = vsub.f32 %v2208_v37, %v524_v13  ;;  %739 = vmatprep.mubr.f32.mxu1 %v644_v0 }
 0x142   : > { %740 = vmatmul.mubr.f32.vlgmr.msra.gmra.mrb[0].mxu1 %v643_v33  ;;  %v645_v44 = vmul.f32 %v2404_v34, %v2404_v34 }
 0x143   : > { %v646_v18 = vmul.f32 %v2407_v38, %v2407_v38  ;;  %v528_v36 = vpop.f32.mrb[4].mxu0 }
 0x144   : > { %v2414_v45 = vsub.f32 %v2224_v46, %v528_v36  ;;  %v530_v50 = vpop.f32.mrb[5].mxu0 }
 0x145   : > { %v2417_v39 = vsub.f32 %v2218_v42, %v530_v50  ;;  %745 = vmatprep.mubr.f32.mxu1 %v646_v18 }
 0x146   : > { %746 = vmatmul.mubr.f32.gmra.mrb[2].mxu1 %v645_v44  ;;  %v647_v54 = vmul.f32 %v2414_v45, %v2414_v45 }
 0x147   : > { %v648_v37 = vmul.f32 %v2417_v39, %v2417_v39  ;;  %v534_v51 = vpop.f32.mrb[6].mxu0 }
 0x148   : > { %v2424_v55 = vsub.f32 %v2234_v52, %v534_v51  ;;  %v536_v58 = vpop.f32.mrb[7].mxu0 }
 0x149   : > { %v2427_v46 = vsub.f32 %v2228_v49, %v536_v58  ;;  %751 = vmatprep.mubr.f32.mxu1 %v648_v37 }
 0x14a   : > { %752 = vmatmul.mubr.f32.gmra.mrb[4].mxu1 %v647_v54  ;;  %v649_v62 = vmul.f32 %v2424_v55, %v2424_v55 }
 0x14b   : > { %v650_v42 = vmul.f32 %v2427_v46, %v2427_v46  ;;  %v540_v59 = vpop.f32.mrb[8].mxu0 }
 0x14c   : > { %v2434_v1 = vsub.f32 %v2244_v56, %v540_v59  ;;  %v542_v16 = vpop.f32.mrb[9].mxu0 }
 0x14d   : > { %v2437_v52 = vsub.f32 %v2238_v53, %v542_v16  ;;  %757 = vmatprep.mubr.f32.mxu1 %v650_v42 }
 0x14e   : > { %758 = vmatmul.mubr.f32.gmra.mrb[6].mxu1 %v649_v62  ;;  %v651_v6 = vmul.f32 %v2434_v1, %v2434_v1 }
 0x14f   : > { %v652_v49 = vmul.f32 %v2437_v52, %v2437_v52  ;;  %v546_v4 = vpop.f32.mrb[10].mxu0 }
 0x150   : > { %v2444_v8 = vsub.f32 %v2254_v60, %v546_v4  ;;  %v548_v10 = vpop.f32.mrb[11].mxu0 }
 0x151   : > { %v2447_v56 = vsub.f32 %v2248_v57, %v548_v10  ;;  %763 = vmatprep.mubr.f32.mxu1 %v652_v49 }
 0x152   : > { %764 = vmatmul.mubr.f32.gmra.mrb[8].mxu1 %v651_v6  ;;  %v653_v15 = vmul.f32 %v2444_v8, %v2444_v8 }
 0x153   : > { %v654_v53 = vmul.f32 %v2447_v56, %v2447_v56  ;;  %v552_v12 = vpop.f32.mrb[12].mxu0 }
 0x154   : > { %v2454_v19 = vsub.f32 %v2263_v63, %v552_v12  ;;  %v554_v21 = vpop.f32.mrb[13].mxu0 }
 0x155   : > { %v2457_v60 = vsub.f32 %v2258_v61, %v554_v21  ;;  %769 = vmatprep.mubr.f32.mxu1 %v654_v53 }
 0x156   : > { %770 = vmatmul.mubr.f32.gmra.mrb[10].mxu1 %v653_v15  ;;  %v655_v23 = vmul.f32 %v2454_v19, %v2454_v19 }
 0x157   : > { %v656_v57 = vmul.f32 %v2457_v60, %v2457_v60  ;;  %v558_v22 = vpop.f32.mrb[14].mxu0 }
 0x158   : > { %v2464_v24 = vsub.f32 %v2269_v2, %v558_v22  ;;  %v560_v26 = vpop.f32.mrb[15].mxu0 }
 0x159   : > { %v2467_v63 = vsub.f32 %v2074_v25, %v560_v26  ;;  %775 = vmatprep.mubr.f32.mxu1 %v656_v57 }
 0x15a   : > { %776 = vmatmul.mubr.f32.gmra.mrb[12].mxu1 %v655_v23  ;;  %v657_v32 = vmul.f32 %v2464_v24, %v2464_v24 }
 0x15b   : > { %v658_v61 = vmul.f32 %v2467_v63, %v2467_v63  ;;  %v564_v28 = vpop.f32.mrb[16].mxu0 }
 0x15c   : > { %v2474_v0 = vsub.f32 %v2275_v3, %v564_v28  ;;  %v566_v33 = vpop.f32.mrb[17].mxu0 }
 0x15d   : > { %v2477_v2 = vsub.f32 %v2082_v30, %v566_v33  ;;  %781 = vmatprep.mubr.f32.mxu1 %v658_v61 }
 0x15e   : > { %782 = vmatmul.mubr.f32.gmra.mrb[14].mxu1 %v657_v32  ;;  %v659_v18 = vmul.f32 %v2474_v0, %v2474_v0 }
 0x15f   : > { %v660_v25 = vmul.f32 %v2477_v2, %v2477_v2  ;;  %v570_v13 = vpop.f32.mrb[18].mxu0 }
 0x160   : > { %v2484_v36 = vsub.f32 %v2281_v5, %v570_v13  ;;  %v572_v44 = vpop.f32.mrb[19].mxu0  ;;  %v912_v13 = vld [vmem:[%s2698_s3 + $0x60] sm:$0xff] }
 0x161   : > { %v2487_v3 = vsub.f32 %v2085_v31, %v572_v44  ;;  %787 = vmatprep.mubr.f32.mxu1 %v660_v25  ;;  %v928_v25 = vld [vmem:[%s2698_s3 + $0xe0] sm:$0xff] }
 0x162   : > { %788 = vmatmul.mubr.f32.gmra.mrb[16].mxu1 %v659_v18  ;;  %v661_v37 = vmul.f32 %v2484_v36, %v2484_v36  ;;  %v913_v18 = vld [vmem:[%s2698_s3 + $0x68] sm:$0xff] }
 0x163   : > { %v662_v30 = vmul.f32 %v2487_v3, %v2487_v3  ;;  %v576_v50 = vpop.f32.mrb[20].mxu0  ;;  %v1651_v44 = vpack.c.bf16 %v913_v18, %v912_v13 }
 0x164   : > { %v2494_v51 = vsub.f32 %v2287_v7, %v576_v50  ;;  %v578_v54 = vpop.f32.mrb[21].mxu0  ;;  %v931_v50 = vld [vmem:[%s2698_s3 + $0xf8] sm:$0xff] }
 0x165   : > { %v2497_v5 = vsub.f32 %v2092_v35, %v578_v54  ;;  %793 = vmatprep.mubr.f32.mxu1 %v662_v30  ;;  %v930_v30 = vld [vmem:[%s2698_s3 + $0xf0] sm:$0xff] }
 0x166   : > { %794 = vmatmul.mubr.f32.gmra.mrb[18].mxu1 %v661_v37  ;;  %v663_v42 = vmul.f32 %v2494_v51, %v2494_v51  ;;  %v1653_v37 = vpack.c.bf16 %v931_v50, %v930_v30  ;;  %v914_v54 = vld [vmem:[%s2698_s3 + $0x70] sm:$0xff] }
 0x167   : > { %v664_v31 = vmul.f32 %v2497_v5, %v2497_v5  ;;  %v582_v58 = vpop.f32.mrb[22].mxu0 }
 0x168   : > { %v2504_v59 = vsub.f32 %v2293_v9, %v582_v58  ;;  %v584_v62 = vpop.f32.mrb[23].mxu0 }
 0x169   : > { %v2507_v7 = vsub.f32 %v2103_v40, %v584_v62  ;;  %799 = vmatprep.mubr.f32.mxu1 %v664_v31  ;;  %v915_v31 = vld [vmem:[%s2698_s3 + $0x78] sm:$0xff] }
 0x16a   : > { %800 = vmatmul.mubr.f32.gmra.mrb[20].mxu1 %v663_v42  ;;  %v665_v49 = vmul.f32 %v2504_v59, %v2504_v59  ;;  %v1655_v58 = vpack.c.bf16 %v915_v31, %v914_v54 }
 0x16b   : > { %v666_v35 = vmul.f32 %v2507_v7, %v2507_v7  ;;  %v588_v16 = vpop.f32.mrb[24].mxu0 }
 0x16c   : > { %v2514_v4 = vsub.f32 %v2299_v11, %v588_v16  ;;  %v590_v6 = vpop.f32.mrb[25].mxu0 }
 0x16d   : > { %v2517_v9 = vsub.f32 %v2106_v41, %v590_v6  ;;  %805 = vmatprep.mubr.f32.mxu1 %v666_v35 }
 0x16e   : > { %806 = vmatmul.mubr.f32.gmra.mrb[22].mxu1 %v665_v49  ;;  %v667_v53 = vmul.f32 %v2514_v4, %v2514_v4 }
 0x16f   : > { %v668_v40 = vmul.f32 %v2517_v9, %v2517_v9  ;;  %v594_v10 = vpop.f32.mrb[26].mxu0 }
 0x170   : > { %v2524_v12 = vsub.f32 %v2305_v14, %v594_v10  ;;  %v596_v15 = vpop.f32.mrb[27].mxu0 }
 0x171   : > { %v2527_v11 = vsub.f32 %v2110_v43, %v596_v15  ;;  %811 = vmatprep.mubr.f32.mxu1 %v668_v40 }
 0x172   : > { %812 = vmatmul.mubr.f32.gmra.mrb[24].mxu1 %v667_v53  ;;  %v669_v57 = vmul.f32 %v2524_v12, %v2524_v12 }
 0x173   : > { %v670_v41 = vmul.f32 %v2527_v11, %v2527_v11  ;;  %v600_v21 = vpop.f32.mrb[28].mxu0 }
 0x174   : > { %v2534_v22 = vsub.f32 %v2311_v17, %v600_v21  ;;  %v602_v23 = vpop.f32.mrb[29].mxu0 }
 0x175   : > { %v2537_v14 = vsub.f32 %v2115_v47, %v602_v23  ;;  %817 = vmatprep.mubr.f32.mxu1 %v670_v41 }
 0x176   : > { %818 = vmatmul.mubr.f32.gmra.mrb[26].mxu1 %v669_v57  ;;  %v671_v61 = vmul.f32 %v2534_v22, %v2534_v22 }
 0x177   : > { %v672_v43 = vmul.f32 %v2537_v14, %v2537_v14  ;;  %v606_v26 = vpop.f32.mrb[30].mxu0 }
 0x178   : > { %v2544_v28 = vsub.f32 %v2317_v20, %v606_v26  ;;  %v608_v32 = vpop.f32.mrb[31].mxu0  ;;  %v929_v20 = vld [vmem:[%s2698_s3 + $0xe8] sm:$0xff] }
 0x179   : > { %v2547_v17 = vsub.f32 %v2118_v48, %v608_v32  ;;  %823 = vmatprep.mubr.f32.mxu1 %v672_v43  ;;  %v1649_v48 = vpack.c.bf16 %v929_v20, %v928_v25 }
 0x17a   : > { %824 = vmatmul.mubr.f32.gmra.mrb[28].mxu1 %v671_v61  ;;  %v673_v33 = vmul.f32 %v2544_v28, %v2544_v28 }
 0x17b   : > { %v674_v47 = vmul.f32 %v2547_v17, %v2547_v17  ;;  %1650 = vmatprep.subr.bf16.mxu0 %v1649_v48 }
 0x17c   : > { %1652 = vmatpush3.bf16.msra.mxu0 %v1651_v44 }
 0x17d   : > { %829 = vmatprep.mubr.f32.mxu1 %v674_v47  ;;  %1654 = vmatprep.subr.bf16.mxu0 %v1653_v37 }
 0x17e   : > { %830 = vmatmul.mubr.f32.gmra.mrb[30].mxu1 %v673_v33 }
 0x180   : > { %1656 = vmatpush3.bf16.msra.mxu0 %v1655_v58 }
 0x215   : > { %v741_v42 = vpop.f32.mrb[0].mxu1 }
 0x216   : > { %v742_v62 = vadd.f32 1e-05, %v741_v42  ;;  %v743_v35 = vpop.f32.mrb[1].mxu1 }
 0x217   : > { %v744_v16 = vadd.f32 1e-05, %v743_v35 }
 0x218   : > { %1713 = vrsqrt.f32 %v742_v62 }
 0x219   : > { %1715 = vrsqrt.f32 %v744_v16  ;;  %v747_v49 = vpop.f32.mrb[2].mxu1 }
 0x21a   : > { %v748_v6 = vadd.f32 1e-05, %v747_v49  ;;  %v749_v40 = vpop.f32.mrb[3].mxu1 }
 0x21b   : > { %v750_v10 = vadd.f32 1e-05, %v749_v40 }
 0x21c   : > { %1717 = vrsqrt.f32 %v748_v6 }
 0x21d   : > { %1719 = vrsqrt.f32 %v750_v10  ;;  %v753_v53 = vpop.f32.mrb[4].mxu1 }
 0x21e   : > { %v754_v15 = vadd.f32 1e-05, %v753_v53  ;;  %v755_v41 = vpop.f32.mrb[5].mxu1 }
 0x21f   : > { %v756_v21 = vadd.f32 1e-05, %v755_v41 }
 0x220   : > { %1721 = vrsqrt.f32 %v754_v15 }
 0x221   : > { %1723 = vrsqrt.f32 %v756_v21  ;;  %v759_v57 = vpop.f32.mrb[6].mxu1 }
 0x222   : > { %v1714_v23 = vpop.eup %1713  ;;  %v760_v43 = vadd.f32 1e-05, %v759_v57  ;;  %v761_v26 = vpop.f32.mrb[7].mxu1 }
 0x223   : > { %v1716_v61 = vpop.eup %1715  ;;  %v762_v32 = vadd.f32 1e-05, %v761_v26  ;;  %v868_v25 = vmul.f32 %v1714_v23, %v2394_v27 }
 0x224   : > { %1725 = vrsqrt.f32 %v760_v43  ;;  %v869_v47 = vmul.f32 %v1716_v61, %v2397_v29 }
 0x225   : > { %1727 = vrsqrt.f32 %v762_v32  ;;  %v765_v33 = vpop.f32.mrb[8].mxu1 }
 0x226   : > { %v1718_v20 = vpop.eup %1717  ;;  %v766_v48 = vadd.f32 1e-05, %v765_v33  ;;  %v767_v13 = vpop.f32.mrb[9].mxu1  ;;  %996 = vmatprep.mubr.f32.mxu0 %v869_v47 }
 0x227   : > { %v1720_v18 = vpop.eup %1719  ;;  %v768_v44 = vadd.f32 1e-05, %v767_v13  ;;  %997 = vmatmul.mubr.f32.vlgmr.msra.gmra.mrb[32].mxu0 %v868_v25  ;;  %v870_v37 = vmul.f32 %v1718_v20, %v2404_v34 }
 0x228   : > { %1729 = vrsqrt.f32 %v766_v48  ;;  %v871_v30 = vmul.f32 %v1720_v18, %v2407_v38 }
 0x229   : > { %1731 = vrsqrt.f32 %v768_v44  ;;  %v771_v50 = vpop.f32.mrb[10].mxu1 }
 0x22a   : > { %v1722_v54 = vpop.eup %1721  ;;  %v772_v29 = vadd.f32 1e-05, %v771_v50  ;;  %v773_v31 = vpop.f32.mrb[11].mxu1  ;;  %1001 = vmatprep.mubr.f32.mxu0 %v871_v30 }
 0x22b   : > { %v1724_v58 = vpop.eup %1723  ;;  %v774_v27 = vadd.f32 1e-05, %v773_v31  ;;  %1002 = vmatmul.mubr.f32.gmra.mrb[34].mxu0 %v870_v37  ;;  %v872_v35 = vmul.f32 %v1722_v54, %v2414_v45 }
 0x22c   : > { %1733 = vrsqrt.f32 %v772_v29  ;;  %v873_v42 = vmul.f32 %v1724_v58, %v2417_v39 }
 0x22d   : > { %1735 = vrsqrt.f32 %v774_v27  ;;  %v777_v62 = vpop.f32.mrb[12].mxu1 }
 0x22e   : > { %v1726_v16 = vpop.eup %1725  ;;  %v778_v38 = vadd.f32 1e-05, %v777_v62  ;;  %v779_v49 = vpop.f32.mrb[13].mxu1  ;;  %1006 = vmatprep.mubr.f32.mxu0 %v873_v42 }
 0x22f   : > { %v1728_v6 = vpop.eup %1727  ;;  %v780_v34 = vadd.f32 1e-05, %v779_v49  ;;  %1007 = vmatmul.mubr.f32.gmra.mrb[36].mxu0 %v872_v35  ;;  %v874_v53 = vmul.f32 %v1726_v16, %v2424_v55 }
 0x230   : > { %1737 = vrsqrt.f32 %v778_v38  ;;  %v875_v40 = vmul.f32 %v1728_v6, %v2427_v46 }
 0x231   : > { %1739 = vrsqrt.f32 %v780_v34  ;;  %v783_v10 = vpop.f32.mrb[14].mxu1 }
 0x232   : > { %v1730_v15 = vpop.eup %1729  ;;  %v784_v39 = vadd.f32 1e-05, %v783_v10  ;;  %v785_v41 = vpop.f32.mrb[15].mxu1  ;;  %1011 = vmatprep.mubr.f32.mxu0 %v875_v40 }
 0x233   : > { %v1732_v21 = vpop.eup %1731  ;;  %v786_v45 = vadd.f32 1e-05, %v785_v41  ;;  %1012 = vmatmul.mubr.f32.gmra.mrb[38].mxu0 %v874_v53  ;;  %v876_v43 = vmul.f32 %v1730_v15, %v2434_v1 }
 0x234   : > { %1741 = vrsqrt.f32 %v784_v39  ;;  %v877_v57 = vmul.f32 %v1732_v21, %v2437_v52 }
 0x235   : > { %1743 = vrsqrt.f32 %v786_v45  ;;  %v789_v23 = vpop.f32.mrb[16].mxu1 }
 0x236   : > { %v1734_v26 = vpop.eup %1733  ;;  %v790_v46 = vadd.f32 1e-05, %v789_v23  ;;  %v791_v61 = vpop.f32.mrb[17].mxu1  ;;  %1016 = vmatprep.mubr.f32.mxu0 %v877_v57 }
 0x237   : > { %v1736_v32 = vpop.eup %1735  ;;  %v792_v55 = vadd.f32 1e-05, %v791_v61  ;;  %1017 = vmatmul.mubr.f32.gmra.mrb[40].mxu0 %v876_v43  ;;  %v878_v25 = vmul.f32 %v1734_v26, %v2444_v8 }
 0x238   : > { %1745 = vrsqrt.f32 %v790_v46  ;;  %v879_v47 = vmul.f32 %v1736_v32, %v2447_v56 }
 0x239   : > { %1747 = vrsqrt.f32 %v792_v55  ;;  %v795_v33 = vpop.f32.mrb[18].mxu1 }
 0x23a   : > { %v1738_v20 = vpop.eup %1737  ;;  %v796_v52 = vadd.f32 1e-05, %v795_v33  ;;  %v797_v48 = vpop.f32.mrb[19].mxu1  ;;  %1021 = vmatprep.mubr.f32.mxu0 %v879_v47 }
 0x23b   : > { %v1740_v13 = vpop.eup %1739  ;;  %v798_v1 = vadd.f32 1e-05, %v797_v48  ;;  %1022 = vmatmul.mubr.f32.gmra.mrb[42].mxu0 %v878_v25  ;;  %v880_v30 = vmul.f32 %v1738_v20, %v2454_v19 }
 0x23c   : > { %1749 = vrsqrt.f32 %v796_v52  ;;  %v881_v18 = vmul.f32 %v1740_v13, %v2457_v60 }
 0x23d   : > { %1751 = vrsqrt.f32 %v798_v1  ;;  %v801_v44 = vpop.f32.mrb[20].mxu1 }
 0x23e   : > { %v1742_v50 = vpop.eup %1741  ;;  %v802_v56 = vadd.f32 1e-05, %v801_v44  ;;  %v803_v37 = vpop.f32.mrb[21].mxu1  ;;  %1026 = vmatprep.mubr.f32.mxu0 %v881_v18 }
 0x23f   : > { %v1744_v54 = vpop.eup %1743  ;;  %v804_v8 = vadd.f32 1e-05, %v803_v37  ;;  %1027 = vmatmul.mubr.f32.gmra.mrb[44].mxu0 %v880_v30  ;;  %v882_v58 = vmul.f32 %v1742_v50, %v2464_v24 }
 0x240   : > { %1753 = vrsqrt.f32 %v802_v56  ;;  %v883_v29 = vmul.f32 %v1744_v54, %v2467_v63 }
 0x241   : > { %1755 = vrsqrt.f32 %v804_v8  ;;  %v807_v31 = vpop.f32.mrb[22].mxu1 }
 0x242   : > { %v1746_v27 = vpop.eup %1745  ;;  %v808_v60 = vadd.f32 1e-05, %v807_v31  ;;  %v809_v42 = vpop.f32.mrb[23].mxu1  ;;  %1031 = vmatprep.mubr.f32.mxu0 %v883_v29 }
 0x243   : > { %v1748_v62 = vpop.eup %1747  ;;  %v810_v19 = vadd.f32 1e-05, %v809_v42  ;;  %1032 = vmatmul.mubr.f32.gmra.mrb[46].mxu0 %v882_v58  ;;  %v884_v38 = vmul.f32 %v1746_v27, %v2474_v0 }
 0x244   : > { %1757 = vrsqrt.f32 %v808_v60  ;;  %v885_v35 = vmul.f32 %v1748_v62, %v2477_v2 }
 0x245   : > { %1759 = vrsqrt.f32 %v810_v19  ;;  %v813_v16 = vpop.f32.mrb[24].mxu1 }
 0x246   : > { %v1750_v49 = vpop.eup %1749  ;;  %v814_v63 = vadd.f32 1e-05, %v813_v16  ;;  %v815_v6 = vpop.f32.mrb[25].mxu1  ;;  %1036 = vmatprep.mubr.f32.mxu0 %v885_v35 }
 0x247   : > { %v1752_v34 = vpop.eup %1751  ;;  %v816_v24 = vadd.f32 1e-05, %v815_v6  ;;  %1037 = vmatmul.mubr.f32.gmra.mrb[48].mxu0 %v884_v38  ;;  %v886_v53 = vmul.f32 %v1750_v49, %v2484_v36 }
 0x248   : > { %1761 = vrsqrt.f32 %v814_v63  ;;  %v887_v40 = vmul.f32 %v1752_v34, %v2487_v3 }
 0x249   : > { %1763 = vrsqrt.f32 %v816_v24  ;;  %v819_v10 = vpop.f32.mrb[26].mxu1 }
 0x24a   : > { %v1754_v15 = vpop.eup %1753  ;;  %v820_v2 = vadd.f32 1e-05, %v819_v10  ;;  %v821_v39 = vpop.f32.mrb[27].mxu1  ;;  %1041 = vmatprep.mubr.f32.mxu0 %v887_v40 }
 0x24b   : > { %v1756_v41 = vpop.eup %1755  ;;  %v822_v0 = vadd.f32 1e-05, %v821_v39  ;;  %1042 = vmatmul.mubr.f32.gmra.mrb[50].mxu0 %v886_v53  ;;  %v888_v57 = vmul.f32 %v1754_v15, %v2494_v51 }
 0x24c   : > { %1765 = vrsqrt.f32 %v820_v2  ;;  %v889_v21 = vmul.f32 %v1756_v41, %v2497_v5 }
 0x24d   : > { %1767 = vrsqrt.f32 %v822_v0  ;;  %v825_v45 = vpop.f32.mrb[28].mxu1 }
 0x24e   : > { %v1758_v23 = vpop.eup %1757  ;;  %v826_v3 = vadd.f32 1e-05, %v825_v45  ;;  %v827_v43 = vpop.f32.mrb[29].mxu1  ;;  %1046 = vmatprep.mubr.f32.mxu0 %v889_v21 }
 0x24f   : > { %v1760_v26 = vpop.eup %1759  ;;  %v828_v36 = vadd.f32 1e-05, %v827_v43  ;;  %1047 = vmatmul.mubr.f32.gmra.mrb[52].mxu0 %v888_v57  ;;  %v890_v32 = vmul.f32 %v1758_v23, %v2504_v59 }
 0x250   : > { %1769 = vrsqrt.f32 %v826_v3  ;;  %v891_v46 = vmul.f32 %v1760_v26, %v2507_v7 }
 0x251   : > { %1771 = vrsqrt.f32 %v828_v36  ;;  %v831_v61 = vpop.f32.mrb[30].mxu1 }
 0x252   : > { %v1762_v55 = vpop.eup %1761  ;;  %v832_v5 = vadd.f32 1e-05, %v831_v61  ;;  %v833_v47 = vpop.f32.mrb[31].mxu1  ;;  %1051 = vmatprep.mubr.f32.mxu0 %v891_v46 }
 0x253   : > { %v1764_v33 = vpop.eup %1763  ;;  %v834_v51 = vadd.f32 1e-05, %v833_v47  ;;  %1052 = vmatmul.mubr.f32.gmra.mrb[54].mxu0 %v890_v32  ;;  %v892_v20 = vmul.f32 %v1762_v55, %v2514_v4 }
 0x254   : > { %1773 = vrsqrt.f32 %v832_v5  ;;  %v893_v25 = vmul.f32 %v1764_v33, %v2517_v9 }
 0x255   : > { %1775 = vrsqrt.f32 %v834_v51 }
 0x256   : > { %v1766_v52 = vpop.eup %1765  ;;  %1056 = vmatprep.mubr.f32.mxu0 %v893_v25 }
 0x257   : > { %v1768_v7 = vpop.eup %1767  ;;  %1057 = vmatmul.mubr.f32.gmra.mrb[56].mxu0 %v892_v20  ;;  %v894_v59 = vmul.f32 %v1766_v52, %v2524_v12  ;;  %v1077_v12 = vld [vmem:[%s2699_s4] sm:$0xff] }
 0x258   : > { %v895_v48 = vmul.f32 %v1768_v7, %v2527_v11  ;;  %1485 = vmatprep.mubr.f32.mxu1 %v1077_v12 }
 0x25a   : > { %v1770_v13 = vpop.eup %1769  ;;  %1061 = vmatprep.mubr.f32.mxu0 %v895_v48 }
 0x25b   : > { %v1772_v1 = vpop.eup %1771  ;;  %1062 = vmatmul.mubr.f32.gmra.mrb[58].mxu0 %v894_v59  ;;  %v896_v44 = vmul.f32 %v1770_v13, %v2534_v22 }
 0x25c   : > { %v897_v18 = vmul.f32 %v1772_v1, %v2537_v14  ;;  %v1078_v1 = vld [vmem:[%s2699_s4 + $0x8] sm:$0xff] }
 0x25e   : > { %v1774_v9 = vpop.eup %1773  ;;  %1066 = vmatprep.mubr.f32.mxu0 %v897_v18  ;;  %v1079_v18 = vld [vmem:[%s2699_s4 + $0x10] sm:$0xff] }
 0x25f   : > { %v1776_v30 = vpop.eup %1775  ;;  %1067 = vmatmul.mubr.f32.gmra.mrb[60].mxu0 %v896_v44  ;;  %v898_v50 = vmul.f32 %v1774_v9, %v2544_v28  ;;  %v1080_v44 = vld [vmem:[%s2699_s4 + $0x18] sm:$0xff]  ;;  %v1081_v9 = vld [vmem:[%s2699_s4 + $0x20] sm:$0xff] }
 0x260   : > { %v899_v4 = vmul.f32 %v1776_v30, %v2547_v17  ;;  %v1082_v30 = vld [vmem:[%s2699_s4 + $0x28] sm:$0xff] }
 0x262   : > { %1071 = vmatprep.mubr.f32.mxu0 %v899_v4  ;;  %v1083_v4 = vld [vmem:[%s2699_s4 + $0x30] sm:$0xff] }
 0x263   : > { %1072 = vmatmul.mubr.f32.gmra.mrb[62].mxu0 %v898_v50  ;;  %v1084_v50 = vld [vmem:[%s2699_s4 + $0x38] sm:$0xff] }
 0x2fa   : > { %v1381_v11 = vpop.f32.mrb[32].mxu0 }
 0x2fb   : > { %v1382_v56 = vpop.f32.mrb[33].mxu0 }
 0x2fc   : > { %v1383_v14 = vadd.f32 %v1382_v56, %v1381_v11 }
 0x2fe   : > { %v1384_v37 = vpop.f32.mrb[34].mxu0 }
 0x2ff   : > { %v1385_v22 = vpop.f32.mrb[35].mxu0 }
 0x300   : > { %v1386_v54 = vadd.f32 %v1385_v22, %v1384_v37 }
 0x302   : > { %v1657_v8 = vpack.c.bf16 %v1386_v54, %v1383_v14  ;;  %v1387_v29 = vpop.f32.mrb[36].mxu0 }
 0x303   : > { %v1388_v31 = vpop.f32.mrb[37].mxu0 }
 0x304   : > { %v1389_v58 = vadd.f32 %v1388_v31, %v1387_v29  ;;  %1658 = vmatprep.subr.bf16.mxu1 %v1657_v8 }
 0x305   : > { %1660 = vmatpush3.bf16.msra.mxu1 %v1657_v8 }
 0x306   : > { %v1390_v28 = vpop.f32.mrb[38].mxu0 }
 0x307   : > { %v1391_v17 = vpop.f32.mrb[39].mxu0 }
 0x308   : > { %v1392_v27 = vadd.f32 %v1391_v17, %v1390_v28 }
 0x30a   : > { %v1661_v60 = vpack.c.bf16 %v1392_v27, %v1389_v58  ;;  %v1393_v42 = vpop.f32.mrb[40].mxu0 }
 0x30b   : > { %v1394_v62 = vpop.f32.mrb[41].mxu0 }
 0x30c   : > { %v1395_v19 = vadd.f32 %v1394_v62, %v1393_v42  ;;  %1662 = vmatprep.subr.bf16.mxu1 %v1661_v60 }
 0x30d   : > { %1664 = vmatpush3.bf16.msra.mxu1 %v1661_v60 }
 0x30e   : > { %v1396_v35 = vpop.f32.mrb[42].mxu0 }
 0x30f   : > { %v1397_v16 = vpop.f32.mrb[43].mxu0 }
 0x310   : > { %v1398_v38 = vadd.f32 %v1397_v16, %v1396_v35 }
 0x312   : > { %v1665_v49 = vpack.c.bf16 %v1398_v38, %v1395_v19  ;;  %v1399_v63 = vpop.f32.mrb[44].mxu0 }
 0x313   : > { %v1400_v6 = vpop.f32.mrb[45].mxu0 }
 0x314   : > { %v1401_v34 = vadd.f32 %v1400_v6, %v1399_v63  ;;  %1666 = vmatprep.subr.bf16.mxu1 %v1665_v49 }
 0x315   : > { %1668 = vmatpush3.bf16.msra.mxu1 %v1665_v49 }
 0x316   : > { %v1402_v24 = vpop.f32.mrb[46].mxu0 }
 0x317   : > { %v1403_v40 = vpop.f32.mrb[47].mxu0 }
 0x318   : > { %v1404_v10 = vadd.f32 %v1403_v40, %v1402_v24 }
 0x31a   : > { %v1669_v53 = vpack.c.bf16 %v1404_v10, %v1401_v34  ;;  %v1405_v15 = vpop.f32.mrb[48].mxu0 }
 0x31b   : > { %v1406_v2 = vpop.f32.mrb[49].mxu0 }
 0x31c   : > { %v1407_v39 = vadd.f32 %v1406_v2, %v1405_v15  ;;  %1670 = vmatprep.subr.bf16.mxu1 %v1669_v53 }
 0x31d   : > { %1672 = vmatpush3.bf16.msra.mxu1 %v1669_v53 }
 0x31e   : > { %v1408_v41 = vpop.f32.mrb[50].mxu0 }
 0x31f   : > { %v1409_v0 = vpop.f32.mrb[51].mxu0 }
 0x320   : > { %v1410_v21 = vadd.f32 %v1409_v0, %v1408_v41 }
 0x322   : > { %v1673_v45 = vpack.c.bf16 %v1410_v21, %v1407_v39  ;;  %v1411_v57 = vpop.f32.mrb[52].mxu0 }
 0x323   : > { %v1412_v23 = vpop.f32.mrb[53].mxu0 }
 0x324   : > { %v1413_v3 = vadd.f32 %v1412_v23, %v1411_v57  ;;  %1674 = vmatprep.subr.bf16.mxu1 %v1673_v45 }
 0x325   : > { %1676 = vmatpush3.bf16.msra.mxu1 %v1673_v45 }
 0x326   : > { %v1414_v43 = vpop.f32.mrb[54].mxu0 }
 0x327   : > { %v1415_v26 = vpop.f32.mrb[55].mxu0 }
 0x328   : > { %v1416_v36 = vadd.f32 %v1415_v26, %v1414_v43 }
 0x32a   : > { %v1677_v46 = vpack.c.bf16 %v1416_v36, %v1413_v3  ;;  %v1417_v61 = vpop.f32.mrb[56].mxu0 }
 0x32b   : > { %v1418_v32 = vpop.f32.mrb[57].mxu0 }
 0x32c   : > { %v1419_v55 = vadd.f32 %v1418_v32, %v1417_v61  ;;  %1678 = vmatprep.subr.bf16.mxu1 %v1677_v46 }
 0x32d   : > { %1680 = vmatpush3.bf16.msra.mxu1 %v1677_v46 }
 0x32e   : > { %v1420_v5 = vpop.f32.mrb[58].mxu0 }
 0x32f   : > { %v1421_v47 = vpop.f32.mrb[59].mxu0 }
 0x330   : > { %v1422_v33 = vadd.f32 %v1421_v47, %v1420_v5 }
 0x332   : > { %v1681_v51 = vpack.c.bf16 %v1422_v33, %v1419_v55  ;;  %v1423_v25 = vpop.f32.mrb[60].mxu0 }
 0x333   : > { %v1424_v20 = vpop.f32.mrb[61].mxu0 }
 0x334   : > { %v1425_v52 = vadd.f32 %v1424_v20, %v1423_v25  ;;  %1682 = vmatprep.subr.bf16.mxu1 %v1681_v51 }
 0x335   : > { %1684 = vmatpush3.bf16.msra.mxu1 %v1681_v51 }
 0x336   : > { %v1426_v7 = vpop.f32.mrb[62].mxu0 }
 0x337   : > { %v1427_v48 = vpop.f32.mrb[63].mxu0 }
 0x338   : > { %v1428_v59 = vadd.f32 %v1427_v48, %v1426_v7 }
 0x33a   : > { %v1685_v13 = vpack.c.bf16 %v1428_v59, %v1425_v52 }
 0x33c   : > { %1686 = vmatprep.subr.bf16.mxu1 %v1685_v13 }
 0x33d   : > { %1688 = vmatpush3.bf16.msra.mxu1 %v1685_v13 }
 0x340   : > { %1486 = vmatmul.mubr.f32.vlgmr.msra.gmra.mrb[32].mxu1 %v1078_v1 }
 0x341   : > { %1488 = vmatprep.mubr.f32.mxu1 %v1079_v18 }
 0x344   : > { %1489 = vmatmul.mubr.f32.gmra.mrb[34].mxu1 %v1080_v44 }
 0x345   : > { %1491 = vmatprep.mubr.f32.mxu1 %v1081_v9 }
 0x348   : > { %1492 = vmatmul.mubr.f32.gmra.mrb[36].mxu1 %v1082_v30 }
 0x349   : > { %1494 = vmatprep.mubr.f32.mxu1 %v1083_v4 }
 0x34c   : > { %1495 = vmatmul.mubr.f32.gmra.mrb[38].mxu1 %v1084_v50 }
 0x413   : > { %v1487_v12 = vpop.f32.mrb[32].mxu1 }
 0x414   : > { %v1199_v11 = vmul.f32 0.044715, %v1487_v12  ;;  %v1151_v56 = vpop.f32.mrb[33].mxu1  ;;  %v1191_v51 = vmul.f32 0.5, %v1487_v12 }
 0x415   : > { %v1198_v14 = vmul.f32 0.044715, %v1151_v56  ;;  %v1190_v52 = vmul.f32 0.5, %v1151_v56 }
 0x416   : > { %v1207_v37 = vmul.f32 %v1487_v12, %v1199_v11 }
 0x417   : > { %v1206_v22 = vmul.f32 %v1198_v14, %v1151_v56  ;;  %v2633_v54 = vpop.f32.mrb[34].mxu1 }
 0x418   : > { %v1215_v8 = vmul.f32 %v1487_v12, %v1207_v37  ;;  %v1201_v29 = vmul.f32 0.044715, %v2633_v54  ;;  %v2636_v31 = vpop.f32.mrb[35].mxu1  ;;  %v1193_v18 = vmul.f32 0.5, %v2633_v54 }
 0x419   : > { %v1214_v58 = vmul.f32 %v1206_v22, %v1151_v56  ;;  %v1200_v28 = vmul.f32 0.044715, %v2636_v31  ;;  %v1192_v9 = vmul.f32 0.5, %v2636_v31 }
 0x41a   : > { %v1223_v17 = vadd.f32 %v1487_v12, %v1215_v8  ;;  %v1209_v27 = vmul.f32 %v2633_v54, %v1201_v29 }
 0x41b   : > { %v1222_v60 = vadd.f32 %v1214_v58, %v1151_v56  ;;  %v1208_v42 = vmul.f32 %v1200_v28, %v2636_v31  ;;  %v2641_v62 = vpop.f32.mrb[36].mxu1 }
 0x41c   : > { %v1231_v19 = vmul.f32 0.7978846, %v1223_v17  ;;  %v1217_v35 = vmul.f32 %v2633_v54, %v1209_v27  ;;  %v1203_v16 = vmul.f32 0.044715, %v2641_v62  ;;  %v2647_v38 = vpop.f32.mrb[37].mxu1  ;;  %v1195_v56 = vmul.f32 0.5, %v2641_v62 }
 0x41d   : > { %v1230_v49 = vmul.f32 0.7978846, %v1222_v60  ;;  %v1216_v63 = vmul.f32 %v1208_v42, %v2636_v31  ;;  %v1202_v6 = vmul.f32 0.044715, %v2647_v38  ;;  %v1194_v37 = vmul.f32 0.5, %v2647_v38 }
 0x41e   : > { %1777 = vtanh.f32 %v1231_v19  ;;  %v1225_v34 = vadd.f32 %v2633_v54, %v1217_v35  ;;  %v1211_v24 = vmul.f32 %v2641_v62, %v1203_v16 }
 0x41f   : > { %1779 = vtanh.f32 %v1230_v49  ;;  %v1224_v40 = vadd.f32 %v1216_v63, %v2636_v31  ;;  %v1210_v10 = vmul.f32 %v1202_v6, %v2647_v38  ;;  %v1496_v53 = vpop.f32.mrb[38].mxu1 }
 0x420   : > { %v1233_v15 = vmul.f32 0.7978846, %v1225_v34  ;;  %v1219_v2 = vmul.f32 %v2641_v62, %v1211_v24  ;;  %v1205_v39 = vmul.f32 0.044715, %v1496_v53  ;;  %v1181_v41 = vpop.f32.mrb[39].mxu1  ;;  %v1197_v58 = vmul.f32 0.5, %v1496_v53 }
 0x421   : > { %v1232_v0 = vmul.f32 0.7978846, %v1224_v40  ;;  %v1218_v21 = vmul.f32 %v1210_v10, %v2647_v38  ;;  %v1204_v45 = vmul.f32 0.044715, %v1181_v41  ;;  %v1196_v17 = vmul.f32 0.5, %v1181_v41 }
 0x422   : > { %1781 = vtanh.f32 %v1233_v15  ;;  %v1227_v57 = vadd.f32 %v2641_v62, %v1219_v2  ;;  %v1213_v23 = vmul.f32 %v1496_v53, %v1205_v39 }
 0x423   : > { %1783 = vtanh.f32 %v1232_v0  ;;  %v1226_v3 = vadd.f32 %v1218_v21, %v2647_v38  ;;  %v1212_v43 = vmul.f32 %v1204_v45, %v1181_v41 }
 0x424   : > { %v1235_v26 = vmul.f32 0.7978846, %v1227_v57  ;;  %v1221_v36 = vmul.f32 %v1496_v53, %v1213_v23 }
 0x425   : > { %v1234_v46 = vmul.f32 0.7978846, %v1226_v3  ;;  %v1220_v61 = vmul.f32 %v1212_v43, %v1181_v41 }
 0x426   : > { %1785 = vtanh.f32 %v1235_v26  ;;  %v1229_v32 = vadd.f32 %v1496_v53, %v1221_v36 }
 0x427   : > { %1787 = vtanh.f32 %v1234_v46  ;;  %v1228_v55 = vadd.f32 %v1220_v61, %v1181_v41 }
 0x428   : > { %v1778_v5 = vpop.eup %1777  ;;  %v1237_v47 = vmul.f32 0.7978846, %v1229_v32 }
 0x429   : > { %v1780_v33 = vpop.eup %1779  ;;  %v1247_v25 = vadd.f32 1.0, %v1778_v5  ;;  %v1236_v20 = vmul.f32 0.7978846, %v1228_v55 }
 0x42a   : > { %v1246_v7 = vadd.f32 1.0, %v1780_v33  ;;  %1789 = vtanh.f32 %v1237_v47 }
 0x42b   : > { %v1255_v48 = vmul.f32 %v1247_v25, %v1191_v51  ;;  %1791 = vtanh.f32 %v1236_v20 }
 0x42c   : > { %v1782_v59 = vpop.eup %1781  ;;  %v1254_v13 = vmul.f32 %v1246_v7, %v1190_v52 }
 0x42d   : > { %v1784_v1 = vpop.eup %1783  ;;  %1264 = vst.msk [vmem:[%s2663_s9 + $0x8] sm:$0xff] %vm1262_vm0, %v1255_v48  ;;  %v1249_v44 = vadd.f32 1.0, %v1782_v59 }
 0x42e   : > { %1263 = vst.msk [vmem:[%s2663_s9] sm:$0xff] %vm1262_vm0, %v1254_v13  ;;  %v1248_v30 = vadd.f32 1.0, %v1784_v1 }
 0x42f   : > { %v1257_v4 = vmul.f32 %v1249_v44, %v1193_v18 }
 0x430   : > { %v1786_v50 = vpop.eup %1785  ;;  %v1256_v12 = vmul.f32 %v1248_v30, %v1192_v9 }
 0x431   : > { %v1788_v11 = vpop.eup %1787  ;;  %1266 = vst.msk [vmem:[%s2663_s9 + $0x18] sm:$0xff] %vm1262_vm0, %v1257_v4  ;;  %v1251_v14 = vadd.f32 1.0, %v1786_v50 }
 0x432   : > { %1265 = vst.msk [vmem:[%s2663_s9 + $0x10] sm:$0xff] %vm1262_vm0, %v1256_v12  ;;  %v1250_v22 = vadd.f32 1.0, %v1788_v11 }
 0x433   : > { %v1259_v54 = vmul.f32 %v1251_v14, %v1195_v56 }
 0x434   : > { %v1790_v8 = vpop.eup %1789  ;;  %v1258_v29 = vmul.f32 %v1250_v22, %v1194_v37 }
 0x435   : > { %v1792_v31 = vpop.eup %1791  ;;  %1268 = vst.msk [vmem:[%s2663_s9 + $0x28] sm:$0xff] %vm1262_vm0, %v1259_v54  ;;  %v1253_v28 = vadd.f32 1.0, %v1790_v8 }
 0x436   : > { %1267 = vst.msk [vmem:[%s2663_s9 + $0x20] sm:$0xff] %vm1262_vm0, %v1258_v29  ;;  %v1252_v27 = vadd.f32 1.0, %v1792_v31 }
 0x437   : > { %v1261_v60 = vmul.f32 %v1253_v28, %v1197_v58 }
 0x438   : > { %v1260_v42 = vmul.f32 %v1252_v27, %v1196_v17 }
 0x439   : > { %1270 = vst.msk [vmem:[%s2663_s9 + $0x38] sm:$0xff] %vm1262_vm0, %v1261_v60 }
 0x43a   : > { %1269 = vst.msk [vmem:[%s2663_s9 + $0x30] sm:$0xff] %vm1262_vm0, %v1260_v42 }
 0x43b PF: > { %p12_p9 = scmp.ge.s32.totalorder %s1864_s22, 4   ;;  %s2701_s18 = smov %s1811_s19 }
 0x43c   : > { %s2702_s19 = smov %s1873_s25  ;;  %s2703_s20 = smov %s1864_s22 }
 0x43d   :  { %14 = sbr.rel (!%p12_p9) target bundleno = 2 (0x2), region = 98 }

</bundles_post_ra>
